<compile_context>
chip_gen: v7x
topology: tpu7x:2x2x1
jax: 0.10.0
libtpu: 0.0.40
codegen_flags: <defaults>
</compile_context>

<pallas_src>
import functools
import math

import jax
import jax.numpy as jnp
from jax.experimental import pallas as pl
from jax.experimental.pallas import tpu as pltpu


# ----------------------------------------------------------------------------
# helpers traced inside the kernel bodies
# ----------------------------------------------------------------------------
def _layernorm(y, g, b, eps):
    mu = jnp.mean(y, axis=-1, keepdims=True)
    var = jnp.mean((y - mu) ** 2, axis=-1, keepdims=True)
    return (y - mu) * jax.lax.rsqrt(var + eps) * g + b


def _pair_mask(batch, q_len, k_len, causal):
    """Additive f32 mask over flattened (batch*q_len, batch*k_len) scores.

    Block-diagonal over batch; optionally causal (only used when q_len==k_len,
    where local causality == global `col <= row`).  Built from iota +
    comparisons only (no integer division) so it lowers cleanly on Mosaic.
    """
    mq, mk = batch * q_len, batch * k_len
    r = jax.lax.broadcasted_iota(jnp.int32, (mq, mk), 0)
    c = jax.lax.broadcasted_iota(jnp.int32, (mq, mk), 1)
    keep = None
    for b in range(batch):                    # static, tiny loop
        in_q = jnp.logical_and(r >= b * q_len, r < (b + 1) * q_len)
        in_k = jnp.logical_and(c >= b * k_len, c < (b + 1) * k_len)
        blk = jnp.logical_and(in_q, in_k)
        keep = blk if keep is None else jnp.logical_or(keep, blk)
    if causal:
        keep = jnp.logical_and(keep, c <= r)
    return jnp.where(keep, jnp.float32(0.0), jnp.float32(-1e30))


def _attention(q, k, v, wo, bo, nhead, mask):
    """q: (Mq, D) bf16, k/v: (Mk, D) bf16 (1/sqrt(Dh) pre-folded into Wq),
    wo: (D, D) bf16, bo: (1, D) f32, mask: (Mq, Mk) additive f32."""
    Mq, D = q.shape
    Dh = D // nhead
    ctx_heads = []
    for h in range(nhead):                    # static unroll over heads
        sl = slice(h * Dh, (h + 1) * Dh)
        s = jax.lax.dot_general(q[:, sl], k[:, sl],
                                (((1,), (1,)), ((), ())),
                                preferred_element_type=jnp.float32)
        s = s + mask
        s = s - jnp.max(s, axis=-1, keepdims=True)
        p = jnp.exp(s)
        denom = jnp.sum(p, axis=-1, keepdims=True)
        ctx = jnp.dot(p.astype(jnp.bfloat16), v[:, sl],
                      preferred_element_type=jnp.float32)
        # normalize the small (Mq, Dh) ctx, exact reciprocal (correctness)
        ctx_heads.append(ctx * pl.reciprocal(denom, approx=False))
    ctx = jnp.concatenate(ctx_heads, axis=-1).astype(jnp.bfloat16)  # (Mq, D)
    # single consolidated output projection (no per-head K=Dh matmuls)
    return jnp.dot(ctx, wo, preferred_element_type=jnp.float32) + bo


# ----------------------------------------------------------------------------
# fused encoder stack kernel  (grid over layers, activation carried in o_ref)
# ----------------------------------------------------------------------------
def _encoder_stack_kernel(x_ref, wqkv_ref, bqkv_ref, wo_ref, bo_ref,
                          g1_ref, c1_ref, w1_ref, b1_ref, w2_ref, b2_ref,
                          g2_ref, c2_ref, o_ref, *, nhead, batch, seq, eps):
    layer = pl.program_id(0)

    @pl.when(layer == 0)
    def _():
        o_ref[...] = x_ref[...]

    x = o_ref[...]                                            # (M, D) f32
    D = x.shape[1]

    # ---- self-attention (block-diag over batch, no causal mask) ----
    mask = _pair_mask(batch, seq, seq, causal=False)
    qkv = (jnp.dot(x.astype(jnp.bfloat16), wqkv_ref[0],
                   preferred_element_type=jnp.float32)
           + bqkv_ref[0]).astype(jnp.bfloat16)                # one cast
    attn = _attention(qkv[:, :D], qkv[:, D:2 * D], qkv[:, 2 * D:],
                      wo_ref[0], bo_ref[0], nhead, mask)
    x = _layernorm(x + attn, g1_ref[0], c1_ref[0], eps)

    # ---- FFN (hidden activation never leaves VMEM) ----
    h = jnp.dot(x.astype(jnp.bfloat16), w1_ref[0],
                preferred_element_type=jnp.float32) + b1_ref[0]
    h = jnp.maximum(h, 0.0)
    ff = jnp.dot(h.astype(jnp.bfloat16), w2_ref[0],
                 preferred_element_type=jnp.float32) + b2_ref[0]
    o_ref[...] = _layernorm(x + ff, g2_ref[0], c2_ref[0], eps)


def encoder_stack(x_emb, p, *, nhead, eps=1e-5):
    B, S, D = x_emb.shape
    M = B * S
    L, _, F = p["w1"].shape

    def layer3(shape):
        return pl.BlockSpec(shape, lambda l: (l, 0, 0))

    def whole(shape):
        return pl.BlockSpec(shape, lambda l: (0, 0))

    return pl.pallas_call(
        functools.partial(_encoder_stack_kernel, nhead=nhead, batch=B,
                          seq=S, eps=eps),
        out_shape=jax.ShapeDtypeStruct((M, D), jnp.float32),
        grid=(L,),
        in_specs=[
            whole((M, D)),
            layer3((1, D, 3 * D)), layer3((1, 1, 3 * D)),
            layer3((1, D, D)), layer3((1, 1, D)),
            layer3((1, 1, D)), layer3((1, 1, D)),
            layer3((1, D, F)), layer3((1, 1, F)),
            layer3((1, F, D)), layer3((1, 1, D)),
            layer3((1, 1, D)), layer3((1, 1, D)),
        ],
        out_specs=whole((M, D)),
        compiler_params=pltpu.CompilerParams(
            dimension_semantics=("arbitrary",),
            vmem_limit_bytes=32 * 1024 * 1024),
    )(x_emb.reshape(M, D),
      p["wqkv"], p["bqkv"], p["wo"], p["bo"], p["ln1_g"], p["ln1_b"],
      p["w1"], p["b1"], p["w2"], p["b2"], p["ln2_g"], p["ln2_b"])


# ----------------------------------------------------------------------------
# fused decoder stack kernel (+ output head), activation carried in VMEM scratch
# ----------------------------------------------------------------------------
def _decoder_stack_kernel(y_ref, mem_ref,
                          swqkv_ref, sbqkv_ref, swo_ref, sbo_ref, g1_ref, c1_ref,
                          cwq_ref, cbq_ref, cwkv_ref, cbkv_ref, cwo_ref, cbo_ref,
                          g2_ref, c2_ref,
                          w1_ref, b1_ref, w2_ref, b2_ref, g3_ref, c3_ref,
                          ow_ref, ob_ref,
                          logits_ref, y_scr,
                          *, nhead, batch, tgt_len, src_len, eps):
    layer = pl.program_id(0)

    @pl.when(layer == 0)
    def _():
        y_scr[...] = y_ref[...]

    y = y_scr[...]                                            # (Mt, D) f32
    D = y.shape[1]

    # ---- masked self-attention (causal + block-diag over batch) ----
    mask = _pair_mask(batch, tgt_len, tgt_len, causal=True)
    qkv = (jnp.dot(y.astype(jnp.bfloat16), swqkv_ref[0],
                   preferred_element_type=jnp.float32)
           + sbqkv_ref[0]).astype(jnp.bfloat16)
    attn = _attention(qkv[:, :D], qkv[:, D:2 * D], qkv[:, 2 * D:],
                      swo_ref[0], sbo_ref[0], nhead, mask)
    y = _layernorm(y + attn, g1_ref[0], c1_ref[0], eps)

    # ---- cross-attention over the encoder memory ----
    mask = _pair_mask(batch, tgt_len, src_len, causal=False)
    q = (jnp.dot(y.astype(jnp.bfloat16), cwq_ref[0],
                 preferred_element_type=jnp.float32)
         + cbq_ref[0]).astype(jnp.bfloat16)
    kv = (jnp.dot(mem_ref[...].astype(jnp.bfloat16), cwkv_ref[0],
                  preferred_element_type=jnp.float32)
          + cbkv_ref[0]).astype(jnp.bfloat16)
    attn = _attention(q, kv[:, :D], kv[:, D:], cwo_ref[0], cbo_ref[0],
                      nhead, mask)
    y = _layernorm(y + attn, g2_ref[0], c2_ref[0], eps)

    # ---- FFN ----
    h = jnp.dot(y.astype(jnp.bfloat16), w1_ref[0],
                preferred_element_type=jnp.float32) + b1_ref[0]
    h = jnp.maximum(h, 0.0)
    ff = jnp.dot(h.astype(jnp.bfloat16), w2_ref[0],
                 preferred_element_type=jnp.float32) + b2_ref[0]
    y = _layernorm(y + ff, g3_ref[0], c3_ref[0], eps)
    y_scr[...] = y

    # ---- fused lane-dense output head, written only at the last layer ----
    @pl.when(layer == pl.num_programs(0) - 1)
    def _():
        logits_ref[...] = (jnp.dot(y.astype(jnp.bfloat16), ow_ref[...],
                                   preferred_element_type=jnp.float32)
                           + ob_ref[...])


def decoder_stack(y_emb, memory_flat, p, out_w, out_b, *, nhead, src_len,
                  eps=1e-5):
    B, St, D = y_emb.shape
    Mt = B * St
    Mc = memory_flat.shape[0]
    L, _, F = p["w1"].shape
    Vp = out_w.shape[1]

    def layer3(shape):
        return pl.BlockSpec(shape, lambda l: (l, 0, 0))

    def whole(shape):
        return pl.BlockSpec(shape, lambda l: (0, 0))

    return pl.pallas_call(
        functools.partial(_decoder_stack_kernel, nhead=nhead, batch=B,
                          tgt_len=St, src_len=src_len, eps=eps),
        out_shape=jax.ShapeDtypeStruct((Mt, Vp), jnp.float32),
        grid=(L,),
        in_specs=[
            whole((Mt, D)), whole((Mc, D)),
            layer3((1, D, 3 * D)), layer3((1, 1, 3 * D)),
            layer3((1, D, D)), layer3((1, 1, D)),
            layer3((1, 1, D)), layer3((1, 1, D)),
            layer3((1, D, D)), layer3((1, 1, D)),
            layer3((1, D, 2 * D)), layer3((1, 1, 2 * D)),
            layer3((1, D, D)), layer3((1, 1, D)),
            layer3((1, 1, D)), layer3((1, 1, D)),
            layer3((1, D, F)), layer3((1, 1, F)),
            layer3((1, F, D)), layer3((1, 1, D)),
            layer3((1, 1, D)), layer3((1, 1, D)),
            whole((D, Vp)), whole((1, Vp)),
        ],
        out_specs=whole((Mt, Vp)),
        scratch_shapes=[pltpu.VMEM((Mt, D), jnp.float32)],
        compiler_params=pltpu.CompilerParams(
            dimension_semantics=("arbitrary",),
            vmem_limit_bytes=32 * 1024 * 1024),
    )(y_emb.reshape(Mt, D), memory_flat,
      p["wqkv"], p["bqkv"], p["wo_s"], p["bo_s"], p["ln1_g"], p["ln1_b"],
      p["wq"], p["bq"], p["wkv"], p["bkv"], p["wo_c"], p["bo_c"],
      p["ln2_g"], p["ln2_b"],
      p["w1"], p["b1"], p["w2"], p["b2"], p["ln3_g"], p["ln3_b"],
      out_w, out_b)


# ----------------------------------------------------------------------------
# model forward (glue is plain JAX: embedding gathers, PE add, slicing)
# ----------------------------------------------------------------------------
def positional_encoding(max_len, d_model):
    position = jnp.arange(max_len, dtype=jnp.float32)[:, None]
    div_term = jnp.exp(
        jnp.arange(0, d_model, 2, dtype=jnp.float32)
        * (-math.log(10000.0) / d_model))
    pe = jnp.zeros((max_len, d_model), jnp.float32)
    pe = pe.at[:, 0::2].set(jnp.sin(position * div_term))
    pe = pe.at[:, 1::2].set(jnp.cos(position * div_term))
    return pe


@functools.partial(jax.jit, static_argnames=("nhead", "vocab_size"))
def forward(params, chord_seq, melody_input, *, nhead, vocab_size):
    B, Sc = chord_seq.shape
    St = melody_input.shape[1]

    chord_emb = params["chord_emb"][chord_seq] + params["pe"][None, :Sc, :]
    melody_emb = params["melody_emb"][melody_input] + params["pe"][None, :St, :]

    memory = encoder_stack(chord_emb, params["encoder"], nhead=nhead)  # (B*Sc, D)
    logits = decoder_stack(melody_emb, memory, params["decoder"],
                           params["out_w"], params["out_b"],
                           nhead=nhead, src_len=Sc)                    # (B*St, Vp)
    Vp = params["out_w"].shape[1]
    return logits.reshape(B, St, Vp)[:, :, :vocab_size]   # drop lane padding


# ----------------------------------------------------------------------------
# deterministic parameter init (layer-stacked layout, bf16 matmul weights)
# ----------------------------------------------------------------------------
def init_params(key, vocab_size, chord_vocab_size, d_model, nhead,
                dim_feedforward, num_encoder_layers, num_decoder_layers,
                max_len=5000):
    assert d_model % nhead == 0
    D, F = d_model, dim_feedforward
    scale = 1.0 / math.sqrt(D // nhead)              # folded into Q weights
    vocab_pad = int(pl.cdiv(vocab_size, 128)) * 128  # lane-dense output head

    keys = iter(jax.random.split(key, 32))

    def dense(shape, std=0.02):
        return jax.random.normal(next(keys), shape, jnp.float32) * std

    def ones(shape):
        return jnp.ones(shape, jnp.float32)

    def zeros(shape):
        return jnp.zeros(shape, jnp.float32)

    def qkv_packed(n_layers):
        w = dense((n_layers, D, 3 * D))
        w = w.at[:, :, :D].multiply(scale)           # pre-scale Q columns
        return w.astype(jnp.bfloat16), zeros((n_layers, 1, 3 * D))

    Le, Ld = num_encoder_layers, num_decoder_layers

    enc_wqkv, enc_bqkv = qkv_packed(Le)
    encoder = dict(
        wqkv=enc_wqkv, bqkv=enc_bqkv,
        wo=dense((Le, D, D)).astype(jnp.bfloat16), bo=zeros((Le, 1, D)),
        ln1_g=ones((Le, 1, D)), ln1_b=zeros((Le, 1, D)),
        w1=dense((Le, D, F)).astype(jnp.bfloat16), b1=zeros((Le, 1, F)),
        w2=dense((Le, F, D)).astype(jnp.bfloat16), b2=zeros((Le, 1, D)),
        ln2_g=ones((Le, 1, D)), ln2_b=zeros((Le, 1, D)),
    )

    dec_wqkv, dec_bqkv = qkv_packed(Ld)
    decoder = dict(
        wqkv=dec_wqkv, bqkv=dec_bqkv,
        wo_s=dense((Ld, D, D)).astype(jnp.bfloat16), bo_s=zeros((Ld, 1, D)),
        ln1_g=ones((Ld, 1, D)), ln1_b=zeros((Ld, 1, D)),
        wq=(dense((Ld, D, D)) * scale).astype(jnp.bfloat16),
        bq=zeros((Ld, 1, D)),
        wkv=dense((Ld, D, 2 * D)).astype(jnp.bfloat16),
        bkv=zeros((Ld, 1, 2 * D)),
        wo_c=dense((Ld, D, D)).astype(jnp.bfloat16), bo_c=zeros((Ld, 1, D)),
        ln2_g=ones((Ld, 1, D)), ln2_b=zeros((Ld, 1, D)),
        w1=dense((Ld, D, F)).astype(jnp.bfloat16), b1=zeros((Ld, 1, F)),
        w2=dense((Ld, F, D)).astype(jnp.bfloat16), b2=zeros((Ld, 1, D)),
        ln3_g=ones((Ld, 1, D)), ln3_b=zeros((Ld, 1, D)),
    )

    return dict(
        chord_emb=jax.random.normal(next(keys), (chord_vocab_size, D),
                                    jnp.float32),
        melody_emb=jax.random.normal(next(keys), (vocab_size, D), jnp.float32),
        pe=positional_encoding(max_len, D),
        encoder=encoder, decoder=decoder,
        out_w=dense((D, vocab_pad)).astype(jnp.bfloat16),
        out_b=zeros((1, vocab_pad)),
    )


# ----------------------------------------------------------------------------
if __name__ == "__main__":
    # Constructor hyper-parameters of ChordMelodyTransformerV2, scaled down
    # (default: d_model=256, nhead=8, 4 enc / 6 dec layers, ff=1024).
    vocab_size = 129
    chord_vocab_size = 128
    d_model = 128
    nhead = 4
    num_encoder_layers = 2
    num_decoder_layers = 2
    dim_feedforward = 256

    B, S_chord, S_melody = 2, 8, 8

    key = jax.random.PRNGKey(0)
    k_params, k_chord, k_melody = jax.random.split(key, 3)

    params = init_params(
        k_params, vocab_size, chord_vocab_size, d_model, nhead,
        dim_feedforward, num_encoder_layers, num_decoder_layers, max_len=64,
    )

    chord_seq = jax.random.randint(k_chord, (B, S_chord), 0,
                                   chord_vocab_size, jnp.int32)
    melody_input = jax.random.randint(k_melody, (B, S_melody), 0,
                                      vocab_size, jnp.int32)

    logits = forward(params, chord_seq, melody_input,
                     nhead=nhead, vocab_size=vocab_size)
    logits = jax.block_until_ready(logits)

    assert logits.shape == (B, S_melody, vocab_size), logits.shape
    assert bool(jnp.all(jnp.isfinite(logits)))
    print("KERNEL_OK")
</pallas_src>

<mosaic_0001>
module attributes {stable_mosaic.version = 11 : i64} {
  func.func @_encoder_stack_kernel(%arg0: i32, %arg1: memref<16x128xf32, #tpu.memory_space<vmem>>, %arg2: memref<1x128x384xbf16, #tpu.memory_space<vmem>>, %arg3: memref<1x1x384xf32, #tpu.memory_space<vmem>>, %arg4: memref<1x128x128xbf16, #tpu.memory_space<vmem>>, %arg5: memref<1x1x128xf32, #tpu.memory_space<vmem>>, %arg6: memref<1x1x128xf32, #tpu.memory_space<vmem>>, %arg7: memref<1x1x128xf32, #tpu.memory_space<vmem>>, %arg8: memref<1x128x256xbf16, #tpu.memory_space<vmem>>, %arg9: memref<1x1x256xf32, #tpu.memory_space<vmem>>, %arg10: memref<1x256x128xbf16, #tpu.memory_space<vmem>>, %arg11: memref<1x1x128xf32, #tpu.memory_space<vmem>>, %arg12: memref<1x1x128xf32, #tpu.memory_space<vmem>>, %arg13: memref<1x1x128xf32, #tpu.memory_space<vmem>>, %arg14: memref<16x128xf32, #tpu.memory_space<vmem>>) attributes {dimension_semantics = [#tpu.dimension_semantics<arbitrary>], iteration_bounds = array<i64: 2>, scalar_prefetch = 0 : i64, scratch_operands = 0 : i64, tpu.core_type = #tpu.core_type<tc>, window_params = [{pipeline_mode = #tpu.pipeline_mode<synchronous>, transform_indices = @transform_0, window_bounds = array<i64: 16, 128>}, {transform_indices = @transform_1, window_bounds = array<i64: 1, 128, 384>}, {transform_indices = @transform_2, window_bounds = array<i64: 1, 1, 384>}, {transform_indices = @transform_3, window_bounds = array<i64: 1, 128, 128>}, {transform_indices = @transform_4, window_bounds = array<i64: 1, 1, 128>}, {transform_indices = @transform_5, window_bounds = array<i64: 1, 1, 128>}, {transform_indices = @transform_6, window_bounds = array<i64: 1, 1, 128>}, {transform_indices = @transform_7, window_bounds = array<i64: 1, 128, 256>}, {transform_indices = @transform_8, window_bounds = array<i64: 1, 1, 256>}, {transform_indices = @transform_9, window_bounds = array<i64: 1, 256, 128>}, {transform_indices = @transform_10, window_bounds = array<i64: 1, 1, 128>}, {transform_indices = @transform_11, window_bounds = array<i64: 1, 1, 128>}, {transform_indices = @transform_12, window_bounds = array<i64: 1, 1, 128>}, {pipeline_mode = #tpu.pipeline_mode<synchronous>, transform_indices = @transform_13, window_bounds = array<i64: 16, 128>}]} {
    %c0_i32 = arith.constant 0 : i32
    %0 = arith.cmpi eq, %arg0, %c0_i32 : i32
    %1 = arith.extui %0 : i1 to i32
    %c0_i32_0 = arith.constant 0 : i32
    %2 = arith.cmpi ne, %1, %c0_i32_0 : i32
    scf.if %2 {
      %c0_78 = arith.constant 0 : index
      %c0_79 = arith.constant 0 : index
      %194 = vector.load %arg1[%c0_78, %c0_79] : memref<16x128xf32, #tpu.memory_space<vmem>>, vector<16x128xf32>
      %c0_80 = arith.constant 0 : index
      %c0_81 = arith.constant 0 : index
      %195 = vector.load %arg14[%c0_80, %c0_81] : memref<16x128xf32, #tpu.memory_space<vmem>>, vector<16x128xf32>
      tpu.vector_store %arg14[%c0_80, %c0_81], %194 {strides = array<i32>} : memref<16x128xf32, #tpu.memory_space<vmem>>, vector<16x128xf32>,
    } else {
    }
    %c0 = arith.constant 0 : index
    %c0_1 = arith.constant 0 : index
    %3 = vector.load %arg14[%c0, %c0_1] : memref<16x128xf32, #tpu.memory_space<vmem>>, vector<16x128xf32>
    %4 = tpu.iota {dimensions = array<i32: 0>} : vector<16x16xi32>
    %5 = tpu.iota {dimensions = array<i32: 1>} : vector<16x16xi32>
    %c0_i32_2 = arith.constant 0 : i32
    %6 = vector.broadcast %c0_i32_2 : i32 to vector<16x16xi32>
    %7 = arith.cmpi sge, %4, %6 : vector<16x16xi32>
    %c8_i32 = arith.constant 8 : i32
    %8 = vector.broadcast %c8_i32 : i32 to vector<16x16xi32>
    %9 = arith.cmpi slt, %4, %8 : vector<16x16xi32>
    %10 = arith.andi %7, %9 : vector<16x16xi1>
    %c0_i32_3 = arith.constant 0 : i32
    %11 = vector.broadcast %c0_i32_3 : i32 to vector<16x16xi32>
    %12 = arith.cmpi sge, %5, %11 : vector<16x16xi32>
    %c8_i32_4 = arith.constant 8 : i32
    %13 = vector.broadcast %c8_i32_4 : i32 to vector<16x16xi32>
    %14 = arith.cmpi slt, %5, %13 : vector<16x16xi32>
    %15 = arith.andi %12, %14 : vector<16x16xi1>
    %16 = arith.andi %10, %15 : vector<16x16xi1>
    %c8_i32_5 = arith.constant 8 : i32
    %17 = vector.broadcast %c8_i32_5 : i32 to vector<16x16xi32>
    %18 = arith.cmpi sge, %4, %17 : vector<16x16xi32>
    %c16_i32 = arith.constant 16 : i32
    %19 = vector.broadcast %c16_i32 : i32 to vector<16x16xi32>
    %20 = arith.cmpi slt, %4, %19 : vector<16x16xi32>
    %21 = arith.andi %18, %20 : vector<16x16xi1>
    %c8_i32_6 = arith.constant 8 : i32
    %22 = vector.broadcast %c8_i32_6 : i32 to vector<16x16xi32>
    %23 = arith.cmpi sge, %5, %22 : vector<16x16xi32>
    %c16_i32_7 = arith.constant 16 : i32
    %24 = vector.broadcast %c16_i32_7 : i32 to vector<16x16xi32>
    %25 = arith.cmpi slt, %5, %24 : vector<16x16xi32>
    %26 = arith.andi %23, %25 : vector<16x16xi1>
    %27 = arith.andi %21, %26 : vector<16x16xi1>
    %28 = arith.ori %16, %27 : vector<16x16xi1>
    %cst = arith.constant 0.000000e+00 : f32
    %cst_8 = arith.constant -1.000000e+30 : f32
    %29 = vector.broadcast %cst : f32 to vector<16x16xf32>
    %30 = vector.broadcast %cst_8 : f32 to vector<16x16xf32>
    %31 = arith.select %28, %29, %30 : vector<16x16xi1>, vector<16x16xf32>
    %32 = arith.truncf %3 : vector<16x128xf32> to vector<16x128xbf16>
    %c0_9 = arith.constant 0 : index
    %c0_10 = arith.constant 0 : index
    %c0_11 = arith.constant 0 : index
    %33 = vector.load %arg2[%c0_9, %c0_10, %c0_11] : memref<1x128x384xbf16, #tpu.memory_space<vmem>>, vector<1x128x384xbf16>
    %34 = vector.shape_cast %33 : vector<1x128x384xbf16> to vector<128x384xbf16>
    %cst_12 = arith.constant dense<0.000000e+00> : vector<16x384xf32>
    %35 = tpu.matmul %32, %34, %cst_12 {dimension_numbers = #tpu.dot_dimension_numbers<[1], [0], [0], [1], [0, 0, 1, 1], [], []>} : vector<16x128xbf16>, vector<128x384xbf16>, vector<16x384xf32> -> vector<16x384xf32>
    %c0_13 = arith.constant 0 : index
    %c0_14 = arith.constant 0 : index
    %c0_15 = arith.constant 0 : index
    %36 = vector.load %arg3[%c0_13, %c0_14, %c0_15] : memref<1x1x384xf32, #tpu.memory_space<vmem>>, vector<1x1x384xf32>
    %37 = vector.shape_cast %36 : vector<1x1x384xf32> to vector<1x384xf32>
    %38 = vector.broadcast %37 : vector<1x384xf32> to vector<16x384xf32>
    %39 = arith.addf %35, %38 : vector<16x384xf32>
    %40 = arith.truncf %39 : vector<16x384xf32> to vector<16x384xbf16>
    %41 = vector.extract_strided_slice %40 {offsets = [0, 0], sizes = [16, 128], strides = [1, 1]} : vector<16x384xbf16> to vector<16x128xbf16>
    %42 = vector.extract_strided_slice %40 {offsets = [0, 128], sizes = [16, 128], strides = [1, 1]} : vector<16x384xbf16> to vector<16x128xbf16>
    %43 = vector.extract_strided_slice %40 {offsets = [0, 256], sizes = [16, 128], strides = [1, 1]} : vector<16x384xbf16> to vector<16x128xbf16>
    %c0_16 = arith.constant 0 : index
    %c0_17 = arith.constant 0 : index
    %c0_18 = arith.constant 0 : index
    %44 = vector.load %arg4[%c0_16, %c0_17, %c0_18] : memref<1x128x128xbf16, #tpu.memory_space<vmem>>, vector<1x128x128xbf16>
    %45 = vector.shape_cast %44 : vector<1x128x128xbf16> to vector<128x128xbf16>
    %c0_19 = arith.constant 0 : index
    %c0_20 = arith.constant 0 : index
    %c0_21 = arith.constant 0 : index
    %46 = vector.load %arg5[%c0_19, %c0_20, %c0_21] : memref<1x1x128xf32, #tpu.memory_space<vmem>>, vector<1x1x128xf32>
    %47 = vector.shape_cast %46 : vector<1x1x128xf32> to vector<1x128xf32>
    %48 = vector.extract_strided_slice %41 {offsets = [0, 0], sizes = [16, 32], strides = [1, 1]} : vector<16x128xbf16> to vector<16x32xbf16>
    %49 = vector.extract_strided_slice %42 {offsets = [0, 0], sizes = [16, 32], strides = [1, 1]} : vector<16x128xbf16> to vector<16x32xbf16>
    %cst_22 = arith.constant dense<0.000000e+00> : vector<16x16xf32>
    %50 = tpu.matmul %48, %49, %cst_22 {dimension_numbers = #tpu.dot_dimension_numbers<[1], [1], [0], [0], [0, 0, 1, 0], [], []>} : vector<16x32xbf16>, vector<16x32xbf16>, vector<16x16xf32> -> vector<16x16xf32>
    %51 = arith.addf %50, %31 : vector<16x16xf32>
    %cst_23 = arith.constant dense<0xFF800000> : vector<16xf32>
    %52 = vector.multi_reduction <maximumf>, %51, %cst_23 [1] : vector<16x16xf32> to vector<16xf32>
    %53 = vector.shape_cast %52 : vector<16xf32> to vector<16x1xf32>
    %54 = vector.broadcast %53 : vector<16x1xf32> to vector<16x16xf32>
    %55 = arith.subf %51, %54 : vector<16x16xf32>
    %56 = math.exp %55 : vector<16x16xf32>
    %cst_24 = arith.constant dense<0.000000e+00> : vector<16xf32>
    %57 = vector.multi_reduction <add>, %56, %cst_24 [1] : vector<16x16xf32> to vector<16xf32>
    %58 = vector.shape_cast %57 : vector<16xf32> to vector<16x1xf32>
    %59 = arith.truncf %56 : vector<16x16xf32> to vector<16x16xbf16>
    %60 = vector.extract_strided_slice %43 {offsets = [0, 0], sizes = [16, 32], strides = [1, 1]} : vector<16x128xbf16> to vector<16x32xbf16>
    %cst_25 = arith.constant dense<0.000000e+00> : vector<16x32xf32>
    %61 = tpu.matmul %59, %60, %cst_25 {dimension_numbers = #tpu.dot_dimension_numbers<[1], [0], [0], [1], [0, 0, 1, 1], [], []>} : vector<16x16xbf16>, vector<16x32xbf16>, vector<16x32xf32> -> vector<16x32xf32>
    %62 = tpu.reciprocal %58 : vector<16x1xf32> -> vector<16x1xf32>
    %63 = vector.broadcast %62 : vector<16x1xf32> to vector<16x32xf32>
    %64 = arith.mulf %61, %63 : vector<16x32xf32>
    %65 = vector.extract_strided_slice %41 {offsets = [0, 32], sizes = [16, 32], strides = [1, 1]} : vector<16x128xbf16> to vector<16x32xbf16>
    %66 = vector.extract_strided_slice %42 {offsets = [0, 32], sizes = [16, 32], strides = [1, 1]} : vector<16x128xbf16> to vector<16x32xbf16>
    %cst_26 = arith.constant dense<0.000000e+00> : vector<16x16xf32>
    %67 = tpu.matmul %65, %66, %cst_26 {dimension_numbers = #tpu.dot_dimension_numbers<[1], [1], [0], [0], [0, 0, 1, 0], [], []>} : vector<16x32xbf16>, vector<16x32xbf16>, vector<16x16xf32> -> vector<16x16xf32>
    %68 = arith.addf %67, %31 : vector<16x16xf32>
    %cst_27 = arith.constant dense<0xFF800000> : vector<16xf32>
    %69 = vector.multi_reduction <maximumf>, %68, %cst_27 [1] : vector<16x16xf32> to vector<16xf32>
    %70 = vector.shape_cast %69 : vector<16xf32> to vector<16x1xf32>
    %71 = vector.broadcast %70 : vector<16x1xf32> to vector<16x16xf32>
    %72 = arith.subf %68, %71 : vector<16x16xf32>
    %73 = math.exp %72 : vector<16x16xf32>
    %cst_28 = arith.constant dense<0.000000e+00> : vector<16xf32>
    %74 = vector.multi_reduction <add>, %73, %cst_28 [1] : vector<16x16xf32> to vector<16xf32>
    %75 = vector.shape_cast %74 : vector<16xf32> to vector<16x1xf32>
    %76 = arith.truncf %73 : vector<16x16xf32> to vector<16x16xbf16>
    %77 = vector.extract_strided_slice %43 {offsets = [0, 32], sizes = [16, 32], strides = [1, 1]} : vector<16x128xbf16> to vector<16x32xbf16>
    %cst_29 = arith.constant dense<0.000000e+00> : vector<16x32xf32>
    %78 = tpu.matmul %76, %77, %cst_29 {dimension_numbers = #tpu.dot_dimension_numbers<[1], [0], [0], [1], [0, 0, 1, 1], [], []>} : vector<16x16xbf16>, vector<16x32xbf16>, vector<16x32xf32> -> vector<16x32xf32>
    %79 = tpu.reciprocal %75 : vector<16x1xf32> -> vector<16x1xf32>
    %80 = vector.broadcast %79 : vector<16x1xf32> to vector<16x32xf32>
    %81 = arith.mulf %78, %80 : vector<16x32xf32>
    %82 = vector.extract_strided_slice %41 {offsets = [0, 64], sizes = [16, 32], strides = [1, 1]} : vector<16x128xbf16> to vector<16x32xbf16>
    %83 = vector.extract_strided_slice %42 {offsets = [0, 64], sizes = [16, 32], strides = [1, 1]} : vector<16x128xbf16> to vector<16x32xbf16>
    %cst_30 = arith.constant dense<0.000000e+00> : vector<16x16xf32>
    %84 = tpu.matmul %82, %83, %cst_30 {dimension_numbers = #tpu.dot_dimension_numbers<[1], [1], [0], [0], [0, 0, 1, 0], [], []>} : vector<16x32xbf16>, vector<16x32xbf16>, vector<16x16xf32> -> vector<16x16xf32>
    %85 = arith.addf %84, %31 : vector<16x16xf32>
    %cst_31 = arith.constant dense<0xFF800000> : vector<16xf32>
    %86 = vector.multi_reduction <maximumf>, %85, %cst_31 [1] : vector<16x16xf32> to vector<16xf32>
    %87 = vector.shape_cast %86 : vector<16xf32> to vector<16x1xf32>
    %88 = vector.broadcast %87 : vector<16x1xf32> to vector<16x16xf32>
    %89 = arith.subf %85, %88 : vector<16x16xf32>
    %90 = math.exp %89 : vector<16x16xf32>
    %cst_32 = arith.constant dense<0.000000e+00> : vector<16xf32>
    %91 = vector.multi_reduction <add>, %90, %cst_32 [1] : vector<16x16xf32> to vector<16xf32>
    %92 = vector.shape_cast %91 : vector<16xf32> to vector<16x1xf32>
    %93 = arith.truncf %90 : vector<16x16xf32> to vector<16x16xbf16>
    %94 = vector.extract_strided_slice %43 {offsets = [0, 64], sizes = [16, 32], strides = [1, 1]} : vector<16x128xbf16> to vector<16x32xbf16>
    %cst_33 = arith.constant dense<0.000000e+00> : vector<16x32xf32>
    %95 = tpu.matmul %93, %94, %cst_33 {dimension_numbers = #tpu.dot_dimension_numbers<[1], [0], [0], [1], [0, 0, 1, 1], [], []>} : vector<16x16xbf16>, vector<16x32xbf16>, vector<16x32xf32> -> vector<16x32xf32>
    %96 = tpu.reciprocal %92 : vector<16x1xf32> -> vector<16x1xf32>
    %97 = vector.broadcast %96 : vector<16x1xf32> to vector<16x32xf32>
    %98 = arith.mulf %95, %97 : vector<16x32xf32>
    %99 = vector.extract_strided_slice %41 {offsets = [0, 96], sizes = [16, 32], strides = [1, 1]} : vector<16x128xbf16> to vector<16x32xbf16>
    %100 = vector.extract_strided_slice %42 {offsets = [0, 96], sizes = [16, 32], strides = [1, 1]} : vector<16x128xbf16> to vector<16x32xbf16>
    %cst_34 = arith.constant dense<0.000000e+00> : vector<16x16xf32>
    %101 = tpu.matmul %99, %100, %cst_34 {dimension_numbers = #tpu.dot_dimension_numbers<[1], [1], [0], [0], [0, 0, 1, 0], [], []>} : vector<16x32xbf16>, vector<16x32xbf16>, vector<16x16xf32> -> vector<16x16xf32>
    %102 = arith.addf %101, %31 : vector<16x16xf32>
    %cst_35 = arith.constant dense<0xFF800000> : vector<16xf32>
    %103 = vector.multi_reduction <maximumf>, %102, %cst_35 [1] : vector<16x16xf32> to vector<16xf32>
    %104 = vector.shape_cast %103 : vector<16xf32> to vector<16x1xf32>
    %105 = vector.broadcast %104 : vector<16x1xf32> to vector<16x16xf32>
    %106 = arith.subf %102, %105 : vector<16x16xf32>
    %107 = math.exp %106 : vector<16x16xf32>
    %cst_36 = arith.constant dense<0.000000e+00> : vector<16xf32>
    %108 = vector.multi_reduction <add>, %107, %cst_36 [1] : vector<16x16xf32> to vector<16xf32>
    %109 = vector.shape_cast %108 : vector<16xf32> to vector<16x1xf32>
    %110 = arith.truncf %107 : vector<16x16xf32> to vector<16x16xbf16>
    %111 = vector.extract_strided_slice %43 {offsets = [0, 96], sizes = [16, 32], strides = [1, 1]} : vector<16x128xbf16> to vector<16x32xbf16>
    %cst_37 = arith.constant dense<0.000000e+00> : vector<16x32xf32>
    %112 = tpu.matmul %110, %111, %cst_37 {dimension_numbers = #tpu.dot_dimension_numbers<[1], [0], [0], [1], [0, 0, 1, 1], [], []>} : vector<16x16xbf16>, vector<16x32xbf16>, vector<16x32xf32> -> vector<16x32xf32>
    %113 = tpu.reciprocal %109 : vector<16x1xf32> -> vector<16x1xf32>
    %114 = vector.broadcast %113 : vector<16x1xf32> to vector<16x32xf32>
    %115 = arith.mulf %112, %114 : vector<16x32xf32>
    %116 = tpu.concatenate %64, %81, %98, %115 in 1 : vector<16x32xf32>, vector<16x32xf32>, vector<16x32xf32>, vector<16x32xf32> -> vector<16x128xf32>
    %117 = arith.truncf %116 : vector<16x128xf32> to vector<16x128xbf16>
    %cst_38 = arith.constant dense<0.000000e+00> : vector<16x128xf32>
    %118 = tpu.matmul %117, %45, %cst_38 {dimension_numbers = #tpu.dot_dimension_numbers<[1], [0], [0], [1], [0, 0, 1, 1], [], []>} : vector<16x128xbf16>, vector<128x128xbf16>, vector<16x128xf32> -> vector<16x128xf32>
    %119 = vector.broadcast %47 : vector<1x128xf32> to vector<16x128xf32>
    %120 = arith.addf %118, %119 : vector<16x128xf32>
    %121 = arith.addf %3, %120 : vector<16x128xf32>
    %c0_39 = arith.constant 0 : index
    %c0_40 = arith.constant 0 : index
    %c0_41 = arith.constant 0 : index
    %122 = vector.load %arg6[%c0_39, %c0_40, %c0_41] : memref<1x1x128xf32, #tpu.memory_space<vmem>>, vector<1x1x128xf32>
    %123 = vector.shape_cast %122 : vector<1x1x128xf32> to vector<1x128xf32>
    %c0_42 = arith.constant 0 : index
    %c0_43 = arith.constant 0 : index
    %c0_44 = arith.constant 0 : index
    %124 = vector.load %arg7[%c0_42, %c0_43, %c0_44] : memref<1x1x128xf32, #tpu.memory_space<vmem>>, vector<1x1x128xf32>
    %125 = vector.shape_cast %124 : vector<1x1x128xf32> to vector<1x128xf32>
    %cst_45 = arith.constant dense<0.000000e+00> : vector<16xf32>
    %126 = vector.multi_reduction <add>, %121, %cst_45 [1] : vector<16x128xf32> to vector<16xf32>
    %127 = vector.shape_cast %126 : vector<16xf32> to vector<16x1xf32>
    %cst_46 = arith.constant 1.280000e+02 : f32
    %128 = vector.broadcast %cst_46 : f32 to vector<16x1xf32>
    %129 = arith.divf %127, %128 : vector<16x1xf32>
    %130 = vector.broadcast %129 : vector<16x1xf32> to vector<16x128xf32>
    %131 = arith.subf %121, %130 : vector<16x128xf32>
    %132 = arith.mulf %131, %131 : vector<16x128xf32>
    %cst_47 = arith.constant dense<0.000000e+00> : vector<16xf32>
    %133 = vector.multi_reduction <add>, %132, %cst_47 [1] : vector<16x128xf32> to vector<16xf32>
    %134 = vector.shape_cast %133 : vector<16xf32> to vector<16x1xf32>
    %cst_48 = arith.constant 1.280000e+02 : f32
    %135 = vector.broadcast %cst_48 : f32 to vector<16x1xf32>
    %136 = arith.divf %134, %135 : vector<16x1xf32>
    %137 = vector.broadcast %129 : vector<16x1xf32> to vector<16x128xf32>
    %138 = arith.subf %121, %137 : vector<16x128xf32>
    %cst_49 = arith.constant 9.99999974E-6 : f32
    %139 = vector.broadcast %cst_49 : f32 to vector<16x1xf32>
    %140 = arith.addf %136, %139 : vector<16x1xf32>
    %141 = math.rsqrt %140 : vector<16x1xf32>
    %142 = vector.broadcast %141 : vector<16x1xf32> to vector<16x128xf32>
    %143 = arith.mulf %138, %142 : vector<16x128xf32>
    %144 = vector.broadcast %123 : vector<1x128xf32> to vector<16x128xf32>
    %145 = arith.mulf %143, %144 : vector<16x128xf32>
    %146 = vector.broadcast %125 : vector<1x128xf32> to vector<16x128xf32>
    %147 = arith.addf %145, %146 : vector<16x128xf32>
    %148 = arith.truncf %147 : vector<16x128xf32> to vector<16x128xbf16>
    %c0_50 = arith.constant 0 : index
    %c0_51 = arith.constant 0 : index
    %c0_52 = arith.constant 0 : index
    %149 = vector.load %arg8[%c0_50, %c0_51, %c0_52] : memref<1x128x256xbf16, #tpu.memory_space<vmem>>, vector<1x128x256xbf16>
    %150 = vector.shape_cast %149 : vector<1x128x256xbf16> to vector<128x256xbf16>
    %cst_53 = arith.constant dense<0.000000e+00> : vector<16x256xf32>
    %151 = tpu.matmul %148, %150, %cst_53 {dimension_numbers = #tpu.dot_dimension_numbers<[1], [0], [0], [1], [0, 0, 1, 1], [], []>} : vector<16x128xbf16>, vector<128x256xbf16>, vector<16x256xf32> -> vector<16x256xf32>
    %c0_54 = arith.constant 0 : index
    %c0_55 = arith.constant 0 : index
    %c0_56 = arith.constant 0 : index
    %152 = vector.load %arg9[%c0_54, %c0_55, %c0_56] : memref<1x1x256xf32, #tpu.memory_space<vmem>>, vector<1x1x256xf32>
    %153 = vector.shape_cast %152 : vector<1x1x256xf32> to vector<1x256xf32>
    %154 = vector.broadcast %153 : vector<1x256xf32> to vector<16x256xf32>
    %155 = arith.addf %151, %154 : vector<16x256xf32>
    %cst_57 = arith.constant 0.000000e+00 : f32
    %156 = vector.broadcast %cst_57 : f32 to vector<16x256xf32>
    %157 = arith.maximumf %155, %156 : vector<16x256xf32>
    %158 = arith.truncf %157 : vector<16x256xf32> to vector<16x256xbf16>
    %c0_58 = arith.constant 0 : index
    %c0_59 = arith.constant 0 : index
    %c0_60 = arith.constant 0 : index
    %159 = vector.load %arg10[%c0_58, %c0_59, %c0_60] : memref<1x256x128xbf16, #tpu.memory_space<vmem>>, vector<1x256x128xbf16>
    %160 = vector.shape_cast %159 : vector<1x256x128xbf16> to vector<256x128xbf16>
    %cst_61 = arith.constant dense<0.000000e+00> : vector<16x128xf32>
    %161 = tpu.matmul %158, %160, %cst_61 {dimension_numbers = #tpu.dot_dimension_numbers<[1], [0], [0], [1], [0, 0, 1, 1], [], []>} : vector<16x256xbf16>, vector<256x128xbf16>, vector<16x128xf32> -> vector<16x128xf32>
    %c0_62 = arith.constant 0 : index
    %c0_63 = arith.constant 0 : index
    %c0_64 = arith.constant 0 : index
    %162 = vector.load %arg11[%c0_62, %c0_63, %c0_64] : memref<1x1x128xf32, #tpu.memory_space<vmem>>, vector<1x1x128xf32>
    %163 = vector.shape_cast %162 : vector<1x1x128xf32> to vector<1x128xf32>
    %164 = vector.broadcast %163 : vector<1x128xf32> to vector<16x128xf32>
    %165 = arith.addf %161, %164 : vector<16x128xf32>
    %166 = arith.addf %147, %165 : vector<16x128xf32>
    %c0_65 = arith.constant 0 : index
    %c0_66 = arith.constant 0 : index
    %c0_67 = arith.constant 0 : index
    %167 = vector.load %arg12[%c0_65, %c0_66, %c0_67] : memref<1x1x128xf32, #tpu.memory_space<vmem>>, vector<1x1x128xf32>
    %168 = vector.shape_cast %167 : vector<1x1x128xf32> to vector<1x128xf32>
    %c0_68 = arith.constant 0 : index
    %c0_69 = arith.constant 0 : index
    %c0_70 = arith.constant 0 : index
    %169 = vector.load %arg13[%c0_68, %c0_69, %c0_70] : memref<1x1x128xf32, #tpu.memory_space<vmem>>, vector<1x1x128xf32>
    %170 = vector.shape_cast %169 : vector<1x1x128xf32> to vector<1x128xf32>
    %cst_71 = arith.constant dense<0.000000e+00> : vector<16xf32>
    %171 = vector.multi_reduction <add>, %166, %cst_71 [1] : vector<16x128xf32> to vector<16xf32>
    %172 = vector.shape_cast %171 : vector<16xf32> to vector<16x1xf32>
    %cst_72 = arith.constant 1.280000e+02 : f32
    %173 = vector.broadcast %cst_72 : f32 to vector<16x1xf32>
    %174 = arith.divf %172, %173 : vector<16x1xf32>
    %175 = vector.broadcast %174 : vector<16x1xf32> to vector<16x128xf32>
    %176 = arith.subf %166, %175 : vector<16x128xf32>
    %177 = arith.mulf %176, %176 : vector<16x128xf32>
    %cst_73 = arith.constant dense<0.000000e+00> : vector<16xf32>
    %178 = vector.multi_reduction <add>, %177, %cst_73 [1] : vector<16x128xf32> to vector<16xf32>
    %179 = vector.shape_cast %178 : vector<16xf32> to vector<16x1xf32>
    %cst_74 = arith.constant 1.280000e+02 : f32
    %180 = vector.broadcast %cst_74 : f32 to vector<16x1xf32>
    %181 = arith.divf %179, %180 : vector<16x1xf32>
    %182 = vector.broadcast %174 : vector<16x1xf32> to vector<16x128xf32>
    %183 = arith.subf %166, %182 : vector<16x128xf32>
    %cst_75 = arith.constant 9.99999974E-6 : f32
    %184 = vector.broadcast %cst_75 : f32 to vector<16x1xf32>
    %185 = arith.addf %181, %184 : vector<16x1xf32>
    %186 = math.rsqrt %185 : vector<16x1xf32>
    %187 = vector.broadcast %186 : vector<16x1xf32> to vector<16x128xf32>
    %188 = arith.mulf %183, %187 : vector<16x128xf32>
    %189 = vector.broadcast %168 : vector<1x128xf32> to vector<16x128xf32>
    %190 = arith.mulf %188, %189 : vector<16x128xf32>
    %191 = vector.broadcast %170 : vector<1x128xf32> to vector<16x128xf32>
    %192 = arith.addf %190, %191 : vector<16x128xf32>
    %c0_76 = arith.constant 0 : index
    %c0_77 = arith.constant 0 : index
    %193 = vector.load %arg14[%c0_76, %c0_77] : memref<16x128xf32, #tpu.memory_space<vmem>>, vector<16x128xf32>
    tpu.vector_store %arg14[%c0_76, %c0_77], %192 {strides = array<i32>} : memref<16x128xf32, #tpu.memory_space<vmem>>, vector<16x128xf32>,
    return
  }
  func.func @transform_0(%arg0: i32) -> (i32, i32) {
    %c0_i32 = arith.constant 0 : i32
    %c0_i32_0 = arith.constant 0 : i32
    %c0_i32_1 = arith.constant 0 : i32
    return %c0_i32, %c0_i32_0 : i32, i32
  }
  func.func @transform_1(%arg0: i32) -> (i32, i32, i32) {
    %c0_i32 = arith.constant 0 : i32
    %c0_i32_0 = arith.constant 0 : i32
    %c0_i32_1 = arith.constant 0 : i32
    return %arg0, %c0_i32, %c0_i32_0 : i32, i32, i32
  }
  func.func @transform_2(%arg0: i32) -> (i32, i32, i32) {
    %c0_i32 = arith.constant 0 : i32
    %c0_i32_0 = arith.constant 0 : i32
    %c0_i32_1 = arith.constant 0 : i32
    return %arg0, %c0_i32, %c0_i32_0 : i32, i32, i32
  }
  func.func @transform_3(%arg0: i32) -> (i32, i32, i32) {
    %c0_i32 = arith.constant 0 : i32
    %c0_i32_0 = arith.constant 0 : i32
    %c0_i32_1 = arith.constant 0 : i32
    return %arg0, %c0_i32, %c0_i32_0 : i32, i32, i32
  }
  func.func @transform_4(%arg0: i32) -> (i32, i32, i32) {
    %c0_i32 = arith.constant 0 : i32
    %c0_i32_0 = arith.constant 0 : i32
    %c0_i32_1 = arith.constant 0 : i32
    return %arg0, %c0_i32, %c0_i32_0 : i32, i32, i32
  }
  func.func @transform_5(%arg0: i32) -> (i32, i32, i32) {
    %c0_i32 = arith.constant 0 : i32
    %c0_i32_0 = arith.constant 0 : i32
    %c0_i32_1 = arith.constant 0 : i32
    return %arg0, %c0_i32, %c0_i32_0 : i32, i32, i32
  }
  func.func @transform_6(%arg0: i32) -> (i32, i32, i32) {
    %c0_i32 = arith.constant 0 : i32
    %c0_i32_0 = arith.constant 0 : i32
    %c0_i32_1 = arith.constant 0 : i32
    return %arg0, %c0_i32, %c0_i32_0 : i32, i32, i32
  }
  func.func @transform_7(%arg0: i32) -> (i32, i32, i32) {
    %c0_i32 = arith.constant 0 : i32
    %c0_i32_0 = arith.constant 0 : i32
    %c0_i32_1 = arith.constant 0 : i32
    return %arg0, %c0_i32, %c0_i32_0 : i32, i32, i32
  }
  func.func @transform_8(%arg0: i32) -> (i32, i32, i32) {
    %c0_i32 = arith.constant 0 : i32
    %c0_i32_0 = arith.constant 0 : i32
    %c0_i32_1 = arith.constant 0 : i32
    return %arg0, %c0_i32, %c0_i32_0 : i32, i32, i32
  }
  func.func @transform_9(%arg0: i32) -> (i32, i32, i32) {
    %c0_i32 = arith.constant 0 : i32
    %c0_i32_0 = arith.constant 0 : i32
    %c0_i32_1 = arith.constant 0 : i32
    return %arg0, %c0_i32, %c0_i32_0 : i32, i32, i32
  }
  func.func @transform_10(%arg0: i32) -> (i32, i32, i32) {
    %c0_i32 = arith.constant 0 : i32
    %c0_i32_0 = arith.constant 0 : i32
    %c0_i32_1 = arith.constant 0 : i32
    return %arg0, %c0_i32, %c0_i32_0 : i32, i32, i32
  }
  func.func @transform_11(%arg0: i32) -> (i32, i32, i32) {
    %c0_i32 = arith.constant 0 : i32
    %c0_i32_0 = arith.constant 0 : i32
    %c0_i32_1 = arith.constant 0 : i32
    return %arg0, %c0_i32, %c0_i32_0 : i32, i32, i32
  }
  func.func @transform_12(%arg0: i32) -> (i32, i32, i32) {
    %c0_i32 = arith.constant 0 : i32
    %c0_i32_0 = arith.constant 0 : i32
    %c0_i32_1 = arith.constant 0 : i32
    return %arg0, %c0_i32, %c0_i32_0 : i32, i32, i32
  }
  func.func @transform_13(%arg0: i32) -> (i32, i32) {
    %c0_i32 = arith.constant 0 : i32
    %c0_i32_0 = arith.constant 0 : i32
    %c0_i32_1 = arith.constant 0 : i32
    return %c0_i32, %c0_i32_0 : i32, i32
  }
}

module attributes {stable_mosaic.version = 11 : i64} {
  func.func @_decoder_stack_kernel(%arg0: i32, %arg1: memref<16x128xf32, #tpu.memory_space<vmem>>, %arg2: memref<16x128xf32, #tpu.memory_space<vmem>>, %arg3: memref<1x128x384xbf16, #tpu.memory_space<vmem>>, %arg4: memref<1x1x384xf32, #tpu.memory_space<vmem>>, %arg5: memref<1x128x128xbf16, #tpu.memory_space<vmem>>, %arg6: memref<1x1x128xf32, #tpu.memory_space<vmem>>, %arg7: memref<1x1x128xf32, #tpu.memory_space<vmem>>, %arg8: memref<1x1x128xf32, #tpu.memory_space<vmem>>, %arg9: memref<1x128x128xbf16, #tpu.memory_space<vmem>>, %arg10: memref<1x1x128xf32, #tpu.memory_space<vmem>>, %arg11: memref<1x128x256xbf16, #tpu.memory_space<vmem>>, %arg12: memref<1x1x256xf32, #tpu.memory_space<vmem>>, %arg13: memref<1x128x128xbf16, #tpu.memory_space<vmem>>, %arg14: memref<1x1x128xf32, #tpu.memory_space<vmem>>, %arg15: memref<1x1x128xf32, #tpu.memory_space<vmem>>, %arg16: memref<1x1x128xf32, #tpu.memory_space<vmem>>, %arg17: memref<1x128x256xbf16, #tpu.memory_space<vmem>>, %arg18: memref<1x1x256xf32, #tpu.memory_space<vmem>>, %arg19: memref<1x256x128xbf16, #tpu.memory_space<vmem>>, %arg20: memref<1x1x128xf32, #tpu.memory_space<vmem>>, %arg21: memref<1x1x128xf32, #tpu.memory_space<vmem>>, %arg22: memref<1x1x128xf32, #tpu.memory_space<vmem>>, %arg23: memref<128x256xbf16, #tpu.memory_space<vmem>>, %arg24: memref<1x256xf32, #tpu.memory_space<vmem>>, %arg25: memref<16x256xf32, #tpu.memory_space<vmem>>, %arg26: memref<16x128xf32, #tpu.memory_space<vmem>>) attributes {dimension_semantics = [#tpu.dimension_semantics<arbitrary>], iteration_bounds = array<i64: 2>, scalar_prefetch = 0 : i64, scratch_operands = 1 : i64, tpu.core_type = #tpu.core_type<tc>, window_params = [{pipeline_mode = #tpu.pipeline_mode<synchronous>, transform_indices = @transform_0, window_bounds = array<i64: 16, 128>}, {pipeline_mode = #tpu.pipeline_mode<synchronous>, transform_indices = @transform_1, window_bounds = array<i64: 16, 128>}, {transform_indices = @transform_2, window_bounds = array<i64: 1, 128, 384>}, {transform_indices = @transform_3, window_bounds = array<i64: 1, 1, 384>}, {transform_indices = @transform_4, window_bounds = array<i64: 1, 128, 128>}, {transform_indices = @transform_5, window_bounds = array<i64: 1, 1, 128>}, {transform_indices = @transform_6, window_bounds = array<i64: 1, 1, 128>}, {transform_indices = @transform_7, window_bounds = array<i64: 1, 1, 128>}, {transform_indices = @transform_8, window_bounds = array<i64: 1, 128, 128>}, {transform_indices = @transform_9, window_bounds = array<i64: 1, 1, 128>}, {transform_indices = @transform_10, window_bounds = array<i64: 1, 128, 256>}, {transform_indices = @transform_11, window_bounds = array<i64: 1, 1, 256>}, {transform_indices = @transform_12, window_bounds = array<i64: 1, 128, 128>}, {transform_indices = @transform_13, window_bounds = array<i64: 1, 1, 128>}, {transform_indices = @transform_14, window_bounds = array<i64: 1, 1, 128>}, {transform_indices = @transform_15, window_bounds = array<i64: 1, 1, 128>}, {transform_indices = @transform_16, window_bounds = array<i64: 1, 128, 256>}, {transform_indices = @transform_17, window_bounds = array<i64: 1, 1, 256>}, {transform_indices = @transform_18, window_bounds = array<i64: 1, 256, 128>}, {transform_indices = @transform_19, window_bounds = array<i64: 1, 1, 128>}, {transform_indices = @transform_20, window_bounds = array<i64: 1, 1, 128>}, {transform_indices = @transform_21, window_bounds = array<i64: 1, 1, 128>}, {pipeline_mode = #tpu.pipeline_mode<synchronous>, transform_indices = @transform_22, window_bounds = array<i64: 128, 256>}, {pipeline_mode = #tpu.pipeline_mode<synchronous>, transform_indices = @transform_23, window_bounds = array<i64: 1, 256>}, {pipeline_mode = #tpu.pipeline_mode<synchronous>, transform_indices = @transform_24, window_bounds = array<i64: 16, 256>}]} {
    %c0_i32 = arith.constant 0 : i32
    %0 = arith.cmpi eq, %arg0, %c0_i32 : i32
    %1 = arith.extui %0 : i1 to i32
    %c0_i32_0 = arith.constant 0 : i32
    %2 = arith.cmpi ne, %1, %c0_i32_0 : i32
    scf.if %2 {
      %c0_139 = arith.constant 0 : index
      %c0_140 = arith.constant 0 : index
      %352 = vector.load %arg1[%c0_139, %c0_140] : memref<16x128xf32, #tpu.memory_space<vmem>>, vector<16x128xf32>
      %c0_141 = arith.constant 0 : index
      %c0_142 = arith.constant 0 : index
      %353 = vector.load %arg26[%c0_141, %c0_142] : memref<16x128xf32, #tpu.memory_space<vmem>>, vector<16x128xf32>
      tpu.vector_store %arg26[%c0_141, %c0_142], %352 {strides = array<i32>} : memref<16x128xf32, #tpu.memory_space<vmem>>, vector<16x128xf32>,
    } else {
    }
    %c0 = arith.constant 0 : index
    %c0_1 = arith.constant 0 : index
    %3 = vector.load %arg26[%c0, %c0_1] : memref<16x128xf32, #tpu.memory_space<vmem>>, vector<16x128xf32>
    %4 = tpu.iota {dimensions = array<i32: 0>} : vector<16x16xi32>
    %5 = tpu.iota {dimensions = array<i32: 1>} : vector<16x16xi32>
    %c0_i32_2 = arith.constant 0 : i32
    %6 = vector.broadcast %c0_i32_2 : i32 to vector<16x16xi32>
    %7 = arith.cmpi sge, %4, %6 : vector<16x16xi32>
    %c8_i32 = arith.constant 8 : i32
    %8 = vector.broadcast %c8_i32 : i32 to vector<16x16xi32>
    %9 = arith.cmpi slt, %4, %8 : vector<16x16xi32>
    %10 = arith.andi %7, %9 : vector<16x16xi1>
    %c0_i32_3 = arith.constant 0 : i32
    %11 = vector.broadcast %c0_i32_3 : i32 to vector<16x16xi32>
    %12 = arith.cmpi sge, %5, %11 : vector<16x16xi32>
    %c8_i32_4 = arith.constant 8 : i32
    %13 = vector.broadcast %c8_i32_4 : i32 to vector<16x16xi32>
    %14 = arith.cmpi slt, %5, %13 : vector<16x16xi32>
    %15 = arith.andi %12, %14 : vector<16x16xi1>
    %16 = arith.andi %10, %15 : vector<16x16xi1>
    %c8_i32_5 = arith.constant 8 : i32
    %17 = vector.broadcast %c8_i32_5 : i32 to vector<16x16xi32>
    %18 = arith.cmpi sge, %4, %17 : vector<16x16xi32>
    %c16_i32 = arith.constant 16 : i32
    %19 = vector.broadcast %c16_i32 : i32 to vector<16x16xi32>
    %20 = arith.cmpi slt, %4, %19 : vector<16x16xi32>
    %21 = arith.andi %18, %20 : vector<16x16xi1>
    %c8_i32_6 = arith.constant 8 : i32
    %22 = vector.broadcast %c8_i32_6 : i32 to vector<16x16xi32>
    %23 = arith.cmpi sge, %5, %22 : vector<16x16xi32>
    %c16_i32_7 = arith.constant 16 : i32
    %24 = vector.broadcast %c16_i32_7 : i32 to vector<16x16xi32>
    %25 = arith.cmpi slt, %5, %24 : vector<16x16xi32>
    %26 = arith.andi %23, %25 : vector<16x16xi1>
    %27 = arith.andi %21, %26 : vector<16x16xi1>
    %28 = arith.ori %16, %27 : vector<16x16xi1>
    %29 = arith.cmpi sle, %5, %4 : vector<16x16xi32>
    %30 = arith.andi %28, %29 : vector<16x16xi1>
    %cst = arith.constant 0.000000e+00 : f32
    %cst_8 = arith.constant -1.000000e+30 : f32
    %31 = vector.broadcast %cst : f32 to vector<16x16xf32>
    %32 = vector.broadcast %cst_8 : f32 to vector<16x16xf32>
    %33 = arith.select %30, %31, %32 : vector<16x16xi1>, vector<16x16xf32>
    %34 = arith.truncf %3 : vector<16x128xf32> to vector<16x128xbf16>
    %c0_9 = arith.constant 0 : index
    %c0_10 = arith.constant 0 : index
    %c0_11 = arith.constant 0 : index
    %35 = vector.load %arg3[%c0_9, %c0_10, %c0_11] : memref<1x128x384xbf16, #tpu.memory_space<vmem>>, vector<1x128x384xbf16>
    %36 = vector.shape_cast %35 : vector<1x128x384xbf16> to vector<128x384xbf16>
    %cst_12 = arith.constant dense<0.000000e+00> : vector<16x384xf32>
    %37 = tpu.matmul %34, %36, %cst_12 {dimension_numbers = #tpu.dot_dimension_numbers<[1], [0], [0], [1], [0, 0, 1, 1], [], []>} : vector<16x128xbf16>, vector<128x384xbf16>, vector<16x384xf32> -> vector<16x384xf32>
    %c0_13 = arith.constant 0 : index
    %c0_14 = arith.constant 0 : index
    %c0_15 = arith.constant 0 : index
    %38 = vector.load %arg4[%c0_13, %c0_14, %c0_15] : memref<1x1x384xf32, #tpu.memory_space<vmem>>, vector<1x1x384xf32>
    %39 = vector.shape_cast %38 : vector<1x1x384xf32> to vector<1x384xf32>
    %40 = vector.broadcast %39 : vector<1x384xf32> to vector<16x384xf32>
    %41 = arith.addf %37, %40 : vector<16x384xf32>
    %42 = arith.truncf %41 : vector<16x384xf32> to vector<16x384xbf16>
    %43 = vector.extract_strided_slice %42 {offsets = [0, 0], sizes = [16, 128], strides = [1, 1]} : vector<16x384xbf16> to vector<16x128xbf16>
    %44 = vector.extract_strided_slice %42 {offsets = [0, 128], sizes = [16, 128], strides = [1, 1]} : vector<16x384xbf16> to vector<16x128xbf16>
    %45 = vector.extract_strided_slice %42 {offsets = [0, 256], sizes = [16, 128], strides = [1, 1]} : vector<16x384xbf16> to vector<16x128xbf16>
    %c0_16 = arith.constant 0 : index
    %c0_17 = arith.constant 0 : index
    %c0_18 = arith.constant 0 : index
    %46 = vector.load %arg5[%c0_16, %c0_17, %c0_18] : memref<1x128x128xbf16, #tpu.memory_space<vmem>>, vector<1x128x128xbf16>
    %47 = vector.shape_cast %46 : vector<1x128x128xbf16> to vector<128x128xbf16>
    %c0_19 = arith.constant 0 : index
    %c0_20 = arith.constant 0 : index
    %c0_21 = arith.constant 0 : index
    %48 = vector.load %arg6[%c0_19, %c0_20, %c0_21] : memref<1x1x128xf32, #tpu.memory_space<vmem>>, vector<1x1x128xf32>
    %49 = vector.shape_cast %48 : vector<1x1x128xf32> to vector<1x128xf32>
    %50 = vector.extract_strided_slice %43 {offsets = [0, 0], sizes = [16, 32], strides = [1, 1]} : vector<16x128xbf16> to vector<16x32xbf16>
    %51 = vector.extract_strided_slice %44 {offsets = [0, 0], sizes = [16, 32], strides = [1, 1]} : vector<16x128xbf16> to vector<16x32xbf16>
    %cst_22 = arith.constant dense<0.000000e+00> : vector<16x16xf32>
    %52 = tpu.matmul %50, %51, %cst_22 {dimension_numbers = #tpu.dot_dimension_numbers<[1], [1], [0], [0], [0, 0, 1, 0], [], []>} : vector<16x32xbf16>, vector<16x32xbf16>, vector<16x16xf32> -> vector<16x16xf32>
    %53 = arith.addf %52, %33 : vector<16x16xf32>
    %cst_23 = arith.constant dense<0xFF800000> : vector<16xf32>
    %54 = vector.multi_reduction <maximumf>, %53, %cst_23 [1] : vector<16x16xf32> to vector<16xf32>
    %55 = vector.shape_cast %54 : vector<16xf32> to vector<16x1xf32>
    %56 = vector.broadcast %55 : vector<16x1xf32> to vector<16x16xf32>
    %57 = arith.subf %53, %56 : vector<16x16xf32>
    %58 = math.exp %57 : vector<16x16xf32>
    %cst_24 = arith.constant dense<0.000000e+00> : vector<16xf32>
    %59 = vector.multi_reduction <add>, %58, %cst_24 [1] : vector<16x16xf32> to vector<16xf32>
    %60 = vector.shape_cast %59 : vector<16xf32> to vector<16x1xf32>
    %61 = arith.truncf %58 : vector<16x16xf32> to vector<16x16xbf16>
    %62 = vector.extract_strided_slice %45 {offsets = [0, 0], sizes = [16, 32], strides = [1, 1]} : vector<16x128xbf16> to vector<16x32xbf16>
    %cst_25 = arith.constant dense<0.000000e+00> : vector<16x32xf32>
    %63 = tpu.matmul %61, %62, %cst_25 {dimension_numbers = #tpu.dot_dimension_numbers<[1], [0], [0], [1], [0, 0, 1, 1], [], []>} : vector<16x16xbf16>, vector<16x32xbf16>, vector<16x32xf32> -> vector<16x32xf32>
    %64 = tpu.reciprocal %60 : vector<16x1xf32> -> vector<16x1xf32>
    %65 = vector.broadcast %64 : vector<16x1xf32> to vector<16x32xf32>
    %66 = arith.mulf %63, %65 : vector<16x32xf32>
    %67 = vector.extract_strided_slice %43 {offsets = [0, 32], sizes = [16, 32], strides = [1, 1]} : vector<16x128xbf16> to vector<16x32xbf16>
    %68 = vector.extract_strided_slice %44 {offsets = [0, 32], sizes = [16, 32], strides = [1, 1]} : vector<16x128xbf16> to vector<16x32xbf16>
    %cst_26 = arith.constant dense<0.000000e+00> : vector<16x16xf32>
    %69 = tpu.matmul %67, %68, %cst_26 {dimension_numbers = #tpu.dot_dimension_numbers<[1], [1], [0], [0], [0, 0, 1, 0], [], []>} : vector<16x32xbf16>, vector<16x32xbf16>, vector<16x16xf32> -> vector<16x16xf32>
    %70 = arith.addf %69, %33 : vector<16x16xf32>
    %cst_27 = arith.constant dense<0xFF800000> : vector<16xf32>
    %71 = vector.multi_reduction <maximumf>, %70, %cst_27 [1] : vector<16x16xf32> to vector<16xf32>
    %72 = vector.shape_cast %71 : vector<16xf32> to vector<16x1xf32>
    %73 = vector.broadcast %72 : vector<16x1xf32> to vector<16x16xf32>
    %74 = arith.subf %70, %73 : vector<16x16xf32>
    %75 = math.exp %74 : vector<16x16xf32>
    %cst_28 = arith.constant dense<0.000000e+00> : vector<16xf32>
    %76 = vector.multi_reduction <add>, %75, %cst_28 [1] : vector<16x16xf32> to vector<16xf32>
    %77 = vector.shape_cast %76 : vector<16xf32> to vector<16x1xf32>
    %78 = arith.truncf %75 : vector<16x16xf32> to vector<16x16xbf16>
    %79 = vector.extract_strided_slice %45 {offsets = [0, 32], sizes = [16, 32], strides = [1, 1]} : vector<16x128xbf16> to vector<16x32xbf16>
    %cst_29 = arith.constant dense<0.000000e+00> : vector<16x32xf32>
    %80 = tpu.matmul %78, %79, %cst_29 {dimension_numbers = #tpu.dot_dimension_numbers<[1], [0], [0], [1], [0, 0, 1, 1], [], []>} : vector<16x16xbf16>, vector<16x32xbf16>, vector<16x32xf32> -> vector<16x32xf32>
    %81 = tpu.reciprocal %77 : vector<16x1xf32> -> vector<16x1xf32>
    %82 = vector.broadcast %81 : vector<16x1xf32> to vector<16x32xf32>
    %83 = arith.mulf %80, %82 : vector<16x32xf32>
    %84 = vector.extract_strided_slice %43 {offsets = [0, 64], sizes = [16, 32], strides = [1, 1]} : vector<16x128xbf16> to vector<16x32xbf16>
    %85 = vector.extract_strided_slice %44 {offsets = [0, 64], sizes = [16, 32], strides = [1, 1]} : vector<16x128xbf16> to vector<16x32xbf16>
    %cst_30 = arith.constant dense<0.000000e+00> : vector<16x16xf32>
    %86 = tpu.matmul %84, %85, %cst_30 {dimension_numbers = #tpu.dot_dimension_numbers<[1], [1], [0], [0], [0, 0, 1, 0], [], []>} : vector<16x32xbf16>, vector<16x32xbf16>, vector<16x16xf32> -> vector<16x16xf32>
    %87 = arith.addf %86, %33 : vector<16x16xf32>
    %cst_31 = arith.constant dense<0xFF800000> : vector<16xf32>
    %88 = vector.multi_reduction <maximumf>, %87, %cst_31 [1] : vector<16x16xf32> to vector<16xf32>
    %89 = vector.shape_cast %88 : vector<16xf32> to vector<16x1xf32>
    %90 = vector.broadcast %89 : vector<16x1xf32> to vector<16x16xf32>
    %91 = arith.subf %87, %90 : vector<16x16xf32>
    %92 = math.exp %91 : vector<16x16xf32>
    %cst_32 = arith.constant dense<0.000000e+00> : vector<16xf32>
    %93 = vector.multi_reduction <add>, %92, %cst_32 [1] : vector<16x16xf32> to vector<16xf32>
    %94 = vector.shape_cast %93 : vector<16xf32> to vector<16x1xf32>
    %95 = arith.truncf %92 : vector<16x16xf32> to vector<16x16xbf16>
    %96 = vector.extract_strided_slice %45 {offsets = [0, 64], sizes = [16, 32], strides = [1, 1]} : vector<16x128xbf16> to vector<16x32xbf16>
    %cst_33 = arith.constant dense<0.000000e+00> : vector<16x32xf32>
    %97 = tpu.matmul %95, %96, %cst_33 {dimension_numbers = #tpu.dot_dimension_numbers<[1], [0], [0], [1], [0, 0, 1, 1], [], []>} : vector<16x16xbf16>, vector<16x32xbf16>, vector<16x32xf32> -> vector<16x32xf32>
    %98 = tpu.reciprocal %94 : vector<16x1xf32> -> vector<16x1xf32>
    %99 = vector.broadcast %98 : vector<16x1xf32> to vector<16x32xf32>
    %100 = arith.mulf %97, %99 : vector<16x32xf32>
    %101 = vector.extract_strided_slice %43 {offsets = [0, 96], sizes = [16, 32], strides = [1, 1]} : vector<16x128xbf16> to vector<16x32xbf16>
    %102 = vector.extract_strided_slice %44 {offsets = [0, 96], sizes = [16, 32], strides = [1, 1]} : vector<16x128xbf16> to vector<16x32xbf16>
    %cst_34 = arith.constant dense<0.000000e+00> : vector<16x16xf32>
    %103 = tpu.matmul %101, %102, %cst_34 {dimension_numbers = #tpu.dot_dimension_numbers<[1], [1], [0], [0], [0, 0, 1, 0], [], []>} : vector<16x32xbf16>, vector<16x32xbf16>, vector<16x16xf32> -> vector<16x16xf32>
    %104 = arith.addf %103, %33 : vector<16x16xf32>
    %cst_35 = arith.constant dense<0xFF800000> : vector<16xf32>
    %105 = vector.multi_reduction <maximumf>, %104, %cst_35 [1] : vector<16x16xf32> to vector<16xf32>
    %106 = vector.shape_cast %105 : vector<16xf32> to vector<16x1xf32>
    %107 = vector.broadcast %106 : vector<16x1xf32> to vector<16x16xf32>
    %108 = arith.subf %104, %107 : vector<16x16xf32>
    %109 = math.exp %108 : vector<16x16xf32>
    %cst_36 = arith.constant dense<0.000000e+00> : vector<16xf32>
    %110 = vector.multi_reduction <add>, %109, %cst_36 [1] : vector<16x16xf32> to vector<16xf32>
    %111 = vector.shape_cast %110 : vector<16xf32> to vector<16x1xf32>
    %112 = arith.truncf %109 : vector<16x16xf32> to vector<16x16xbf16>
    %113 = vector.extract_strided_slice %45 {offsets = [0, 96], sizes = [16, 32], strides = [1, 1]} : vector<16x128xbf16> to vector<16x32xbf16>
    %cst_37 = arith.constant dense<0.000000e+00> : vector<16x32xf32>
    %114 = tpu.matmul %112, %113, %cst_37 {dimension_numbers = #tpu.dot_dimension_numbers<[1], [0], [0], [1], [0, 0, 1, 1], [], []>} : vector<16x16xbf16>, vector<16x32xbf16>, vector<16x32xf32> -> vector<16x32xf32>
    %115 = tpu.reciprocal %111 : vector<16x1xf32> -> vector<16x1xf32>
    %116 = vector.broadcast %115 : vector<16x1xf32> to vector<16x32xf32>
    %117 = arith.mulf %114, %116 : vector<16x32xf32>
    %118 = tpu.concatenate %66, %83, %100, %117 in 1 : vector<16x32xf32>, vector<16x32xf32>, vector<16x32xf32>, vector<16x32xf32> -> vector<16x128xf32>
    %119 = arith.truncf %118 : vector<16x128xf32> to vector<16x128xbf16>
    %cst_38 = arith.constant dense<0.000000e+00> : vector<16x128xf32>
    %120 = tpu.matmul %119, %47, %cst_38 {dimension_numbers = #tpu.dot_dimension_numbers<[1], [0], [0], [1], [0, 0, 1, 1], [], []>} : vector<16x128xbf16>, vector<128x128xbf16>, vector<16x128xf32> -> vector<16x128xf32>
    %121 = vector.broadcast %49 : vector<1x128xf32> to vector<16x128xf32>
    %122 = arith.addf %120, %121 : vector<16x128xf32>
    %123 = arith.addf %3, %122 : vector<16x128xf32>
    %c0_39 = arith.constant 0 : index
    %c0_40 = arith.constant 0 : index
    %c0_41 = arith.constant 0 : index
    %124 = vector.load %arg7[%c0_39, %c0_40, %c0_41] : memref<1x1x128xf32, #tpu.memory_space<vmem>>, vector<1x1x128xf32>
    %125 = vector.shape_cast %124 : vector<1x1x128xf32> to vector<1x128xf32>
    %c0_42 = arith.constant 0 : index
    %c0_43 = arith.constant 0 : index
    %c0_44 = arith.constant 0 : index
    %126 = vector.load %arg8[%c0_42, %c0_43, %c0_44] : memref<1x1x128xf32, #tpu.memory_space<vmem>>, vector<1x1x128xf32>
    %127 = vector.shape_cast %126 : vector<1x1x128xf32> to vector<1x128xf32>
    %cst_45 = arith.constant dense<0.000000e+00> : vector<16xf32>
    %128 = vector.multi_reduction <add>, %123, %cst_45 [1] : vector<16x128xf32> to vector<16xf32>
    %129 = vector.shape_cast %128 : vector<16xf32> to vector<16x1xf32>
    %cst_46 = arith.constant 1.280000e+02 : f32
    %130 = vector.broadcast %cst_46 : f32 to vector<16x1xf32>
    %131 = arith.divf %129, %130 : vector<16x1xf32>
    %132 = vector.broadcast %131 : vector<16x1xf32> to vector<16x128xf32>
    %133 = arith.subf %123, %132 : vector<16x128xf32>
    %134 = arith.mulf %133, %133 : vector<16x128xf32>
    %cst_47 = arith.constant dense<0.000000e+00> : vector<16xf32>
    %135 = vector.multi_reduction <add>, %134, %cst_47 [1] : vector<16x128xf32> to vector<16xf32>
    %136 = vector.shape_cast %135 : vector<16xf32> to vector<16x1xf32>
    %cst_48 = arith.constant 1.280000e+02 : f32
    %137 = vector.broadcast %cst_48 : f32 to vector<16x1xf32>
    %138 = arith.divf %136, %137 : vector<16x1xf32>
    %139 = vector.broadcast %131 : vector<16x1xf32> to vector<16x128xf32>
    %140 = arith.subf %123, %139 : vector<16x128xf32>
    %cst_49 = arith.constant 9.99999974E-6 : f32
    %141 = vector.broadcast %cst_49 : f32 to vector<16x1xf32>
    %142 = arith.addf %138, %141 : vector<16x1xf32>
    %143 = math.rsqrt %142 : vector<16x1xf32>
    %144 = vector.broadcast %143 : vector<16x1xf32> to vector<16x128xf32>
    %145 = arith.mulf %140, %144 : vector<16x128xf32>
    %146 = vector.broadcast %125 : vector<1x128xf32> to vector<16x128xf32>
    %147 = arith.mulf %145, %146 : vector<16x128xf32>
    %148 = vector.broadcast %127 : vector<1x128xf32> to vector<16x128xf32>
    %149 = arith.addf %147, %148 : vector<16x128xf32>
    %150 = tpu.iota {dimensions = array<i32: 0>} : vector<16x16xi32>
    %151 = tpu.iota {dimensions = array<i32: 1>} : vector<16x16xi32>
    %c0_i32_50 = arith.constant 0 : i32
    %152 = vector.broadcast %c0_i32_50 : i32 to vector<16x16xi32>
    %153 = arith.cmpi sge, %150, %152 : vector<16x16xi32>
    %c8_i32_51 = arith.constant 8 : i32
    %154 = vector.broadcast %c8_i32_51 : i32 to vector<16x16xi32>
    %155 = arith.cmpi slt, %150, %154 : vector<16x16xi32>
    %156 = arith.andi %153, %155 : vector<16x16xi1>
    %c0_i32_52 = arith.constant 0 : i32
    %157 = vector.broadcast %c0_i32_52 : i32 to vector<16x16xi32>
    %158 = arith.cmpi sge, %151, %157 : vector<16x16xi32>
    %c8_i32_53 = arith.constant 8 : i32
    %159 = vector.broadcast %c8_i32_53 : i32 to vector<16x16xi32>
    %160 = arith.cmpi slt, %151, %159 : vector<16x16xi32>
    %161 = arith.andi %158, %160 : vector<16x16xi1>
    %162 = arith.andi %156, %161 : vector<16x16xi1>
    %c8_i32_54 = arith.constant 8 : i32
    %163 = vector.broadcast %c8_i32_54 : i32 to vector<16x16xi32>
    %164 = arith.cmpi sge, %150, %163 : vector<16x16xi32>
    %c16_i32_55 = arith.constant 16 : i32
    %165 = vector.broadcast %c16_i32_55 : i32 to vector<16x16xi32>
    %166 = arith.cmpi slt, %150, %165 : vector<16x16xi32>
    %167 = arith.andi %164, %166 : vector<16x16xi1>
    %c8_i32_56 = arith.constant 8 : i32
    %168 = vector.broadcast %c8_i32_56 : i32 to vector<16x16xi32>
    %169 = arith.cmpi sge, %151, %168 : vector<16x16xi32>
    %c16_i32_57 = arith.constant 16 : i32
    %170 = vector.broadcast %c16_i32_57 : i32 to vector<16x16xi32>
    %171 = arith.cmpi slt, %151, %170 : vector<16x16xi32>
    %172 = arith.andi %169, %171 : vector<16x16xi1>
    %173 = arith.andi %167, %172 : vector<16x16xi1>
    %174 = arith.ori %162, %173 : vector<16x16xi1>
    %cst_58 = arith.constant 0.000000e+00 : f32
    %cst_59 = arith.constant -1.000000e+30 : f32
    %175 = vector.broadcast %cst_58 : f32 to vector<16x16xf32>
    %176 = vector.broadcast %cst_59 : f32 to vector<16x16xf32>
    %177 = arith.select %174, %175, %176 : vector<16x16xi1>, vector<16x16xf32>
    %178 = arith.truncf %149 : vector<16x128xf32> to vector<16x128xbf16>
    %c0_60 = arith.constant 0 : index
    %c0_61 = arith.constant 0 : index
    %c0_62 = arith.constant 0 : index
    %179 = vector.load %arg9[%c0_60, %c0_61, %c0_62] : memref<1x128x128xbf16, #tpu.memory_space<vmem>>, vector<1x128x128xbf16>
    %180 = vector.shape_cast %179 : vector<1x128x128xbf16> to vector<128x128xbf16>
    %cst_63 = arith.constant dense<0.000000e+00> : vector<16x128xf32>
    %181 = tpu.matmul %178, %180, %cst_63 {dimension_numbers = #tpu.dot_dimension_numbers<[1], [0], [0], [1], [0, 0, 1, 1], [], []>} : vector<16x128xbf16>, vector<128x128xbf16>, vector<16x128xf32> -> vector<16x128xf32>
    %c0_64 = arith.constant 0 : index
    %c0_65 = arith.constant 0 : index
    %c0_66 = arith.constant 0 : index
    %182 = vector.load %arg10[%c0_64, %c0_65, %c0_66] : memref<1x1x128xf32, #tpu.memory_space<vmem>>, vector<1x1x128xf32>
    %183 = vector.shape_cast %182 : vector<1x1x128xf32> to vector<1x128xf32>
    %184 = vector.broadcast %183 : vector<1x128xf32> to vector<16x128xf32>
    %185 = arith.addf %181, %184 : vector<16x128xf32>
    %186 = arith.truncf %185 : vector<16x128xf32> to vector<16x128xbf16>
    %c0_67 = arith.constant 0 : index
    %c0_68 = arith.constant 0 : index
    %187 = vector.load %arg2[%c0_67, %c0_68] : memref<16x128xf32, #tpu.memory_space<vmem>>, vector<16x128xf32>
    %188 = arith.truncf %187 : vector<16x128xf32> to vector<16x128xbf16>
    %c0_69 = arith.constant 0 : index
    %c0_70 = arith.constant 0 : index
    %c0_71 = arith.constant 0 : index
    %189 = vector.load %arg11[%c0_69, %c0_70, %c0_71] : memref<1x128x256xbf16, #tpu.memory_space<vmem>>, vector<1x128x256xbf16>
    %190 = vector.shape_cast %189 : vector<1x128x256xbf16> to vector<128x256xbf16>
    %cst_72 = arith.constant dense<0.000000e+00> : vector<16x256xf32>
    %191 = tpu.matmul %188, %190, %cst_72 {dimension_numbers = #tpu.dot_dimension_numbers<[1], [0], [0], [1], [0, 0, 1, 1], [], []>} : vector<16x128xbf16>, vector<128x256xbf16>, vector<16x256xf32> -> vector<16x256xf32>
    %c0_73 = arith.constant 0 : index
    %c0_74 = arith.constant 0 : index
    %c0_75 = arith.constant 0 : index
    %192 = vector.load %arg12[%c0_73, %c0_74, %c0_75] : memref<1x1x256xf32, #tpu.memory_space<vmem>>, vector<1x1x256xf32>
    %193 = vector.shape_cast %192 : vector<1x1x256xf32> to vector<1x256xf32>
    %194 = vector.broadcast %193 : vector<1x256xf32> to vector<16x256xf32>
    %195 = arith.addf %191, %194 : vector<16x256xf32>
    %196 = arith.truncf %195 : vector<16x256xf32> to vector<16x256xbf16>
    %197 = vector.extract_strided_slice %196 {offsets = [0, 0], sizes = [16, 128], strides = [1, 1]} : vector<16x256xbf16> to vector<16x128xbf16>
    %198 = vector.extract_strided_slice %196 {offsets = [0, 128], sizes = [16, 128], strides = [1, 1]} : vector<16x256xbf16> to vector<16x128xbf16>
    %c0_76 = arith.constant 0 : index
    %c0_77 = arith.constant 0 : index
    %c0_78 = arith.constant 0 : index
    %199 = vector.load %arg13[%c0_76, %c0_77, %c0_78] : memref<1x128x128xbf16, #tpu.memory_space<vmem>>, vector<1x128x128xbf16>
    %200 = vector.shape_cast %199 : vector<1x128x128xbf16> to vector<128x128xbf16>
    %c0_79 = arith.constant 0 : index
    %c0_80 = arith.constant 0 : index
    %c0_81 = arith.constant 0 : index
    %201 = vector.load %arg14[%c0_79, %c0_80, %c0_81] : memref<1x1x128xf32, #tpu.memory_space<vmem>>, vector<1x1x128xf32>
    %202 = vector.shape_cast %201 : vector<1x1x128xf32> to vector<1x128xf32>
    %203 = vector.extract_strided_slice %186 {offsets = [0, 0], sizes = [16, 32], strides = [1, 1]} : vector<16x128xbf16> to vector<16x32xbf16>
    %204 = vector.extract_strided_slice %197 {offsets = [0, 0], sizes = [16, 32], strides = [1, 1]} : vector<16x128xbf16> to vector<16x32xbf16>
    %cst_82 = arith.constant dense<0.000000e+00> : vector<16x16xf32>
    %205 = tpu.matmul %203, %204, %cst_82 {dimension_numbers = #tpu.dot_dimension_numbers<[1], [1], [0], [0], [0, 0, 1, 0], [], []>} : vector<16x32xbf16>, vector<16x32xbf16>, vector<16x16xf32> -> vector<16x16xf32>
    %206 = arith.addf %205, %177 : vector<16x16xf32>
    %cst_83 = arith.constant dense<0xFF800000> : vector<16xf32>
    %207 = vector.multi_reduction <maximumf>, %206, %cst_83 [1] : vector<16x16xf32> to vector<16xf32>
    %208 = vector.shape_cast %207 : vector<16xf32> to vector<16x1xf32>
    %209 = vector.broadcast %208 : vector<16x1xf32> to vector<16x16xf32>
    %210 = arith.subf %206, %209 : vector<16x16xf32>
    %211 = math.exp %210 : vector<16x16xf32>
    %cst_84 = arith.constant dense<0.000000e+00> : vector<16xf32>
    %212 = vector.multi_reduction <add>, %211, %cst_84 [1] : vector<16x16xf32> to vector<16xf32>
    %213 = vector.shape_cast %212 : vector<16xf32> to vector<16x1xf32>
    %214 = arith.truncf %211 : vector<16x16xf32> to vector<16x16xbf16>
    %215 = vector.extract_strided_slice %198 {offsets = [0, 0], sizes = [16, 32], strides = [1, 1]} : vector<16x128xbf16> to vector<16x32xbf16>
    %cst_85 = arith.constant dense<0.000000e+00> : vector<16x32xf32>
    %216 = tpu.matmul %214, %215, %cst_85 {dimension_numbers = #tpu.dot_dimension_numbers<[1], [0], [0], [1], [0, 0, 1, 1], [], []>} : vector<16x16xbf16>, vector<16x32xbf16>, vector<16x32xf32> -> vector<16x32xf32>
    %217 = tpu.reciprocal %213 : vector<16x1xf32> -> vector<16x1xf32>
    %218 = vector.broadcast %217 : vector<16x1xf32> to vector<16x32xf32>
    %219 = arith.mulf %216, %218 : vector<16x32xf32>
    %220 = vector.extract_strided_slice %186 {offsets = [0, 32], sizes = [16, 32], strides = [1, 1]} : vector<16x128xbf16> to vector<16x32xbf16>
    %221 = vector.extract_strided_slice %197 {offsets = [0, 32], sizes = [16, 32], strides = [1, 1]} : vector<16x128xbf16> to vector<16x32xbf16>
    %cst_86 = arith.constant dense<0.000000e+00> : vector<16x16xf32>
    %222 = tpu.matmul %220, %221, %cst_86 {dimension_numbers = #tpu.dot_dimension_numbers<[1], [1], [0], [0], [0, 0, 1, 0], [], []>} : vector<16x32xbf16>, vector<16x32xbf16>, vector<16x16xf32> -> vector<16x16xf32>
    %223 = arith.addf %222, %177 : vector<16x16xf32>
    %cst_87 = arith.constant dense<0xFF800000> : vector<16xf32>
    %224 = vector.multi_reduction <maximumf>, %223, %cst_87 [1] : vector<16x16xf32> to vector<16xf32>
    %225 = vector.shape_cast %224 : vector<16xf32> to vector<16x1xf32>
    %226 = vector.broadcast %225 : vector<16x1xf32> to vector<16x16xf32>
    %227 = arith.subf %223, %226 : vector<16x16xf32>
    %228 = math.exp %227 : vector<16x16xf32>
    %cst_88 = arith.constant dense<0.000000e+00> : vector<16xf32>
    %229 = vector.multi_reduction <add>, %228, %cst_88 [1] : vector<16x16xf32> to vector<16xf32>
    %230 = vector.shape_cast %229 : vector<16xf32> to vector<16x1xf32>
    %231 = arith.truncf %228 : vector<16x16xf32> to vector<16x16xbf16>
    %232 = vector.extract_strided_slice %198 {offsets = [0, 32], sizes = [16, 32], strides = [1, 1]} : vector<16x128xbf16> to vector<16x32xbf16>
    %cst_89 = arith.constant dense<0.000000e+00> : vector<16x32xf32>
    %233 = tpu.matmul %231, %232, %cst_89 {dimension_numbers = #tpu.dot_dimension_numbers<[1], [0], [0], [1], [0, 0, 1, 1], [], []>} : vector<16x16xbf16>, vector<16x32xbf16>, vector<16x32xf32> -> vector<16x32xf32>
    %234 = tpu.reciprocal %230 : vector<16x1xf32> -> vector<16x1xf32>
    %235 = vector.broadcast %234 : vector<16x1xf32> to vector<16x32xf32>
    %236 = arith.mulf %233, %235 : vector<16x32xf32>
    %237 = vector.extract_strided_slice %186 {offsets = [0, 64], sizes = [16, 32], strides = [1, 1]} : vector<16x128xbf16> to vector<16x32xbf16>
    %238 = vector.extract_strided_slice %197 {offsets = [0, 64], sizes = [16, 32], strides = [1, 1]} : vector<16x128xbf16> to vector<16x32xbf16>
    %cst_90 = arith.constant dense<0.000000e+00> : vector<16x16xf32>
    %239 = tpu.matmul %237, %238, %cst_90 {dimension_numbers = #tpu.dot_dimension_numbers<[1], [1], [0], [0], [0, 0, 1, 0], [], []>} : vector<16x32xbf16>, vector<16x32xbf16>, vector<16x16xf32> -> vector<16x16xf32>
    %240 = arith.addf %239, %177 : vector<16x16xf32>
    %cst_91 = arith.constant dense<0xFF800000> : vector<16xf32>
    %241 = vector.multi_reduction <maximumf>, %240, %cst_91 [1] : vector<16x16xf32> to vector<16xf32>
    %242 = vector.shape_cast %241 : vector<16xf32> to vector<16x1xf32>
    %243 = vector.broadcast %242 : vector<16x1xf32> to vector<16x16xf32>
    %244 = arith.subf %240, %243 : vector<16x16xf32>
    %245 = math.exp %244 : vector<16x16xf32>
    %cst_92 = arith.constant dense<0.000000e+00> : vector<16xf32>
    %246 = vector.multi_reduction <add>, %245, %cst_92 [1] : vector<16x16xf32> to vector<16xf32>
    %247 = vector.shape_cast %246 : vector<16xf32> to vector<16x1xf32>
    %248 = arith.truncf %245 : vector<16x16xf32> to vector<16x16xbf16>
    %249 = vector.extract_strided_slice %198 {offsets = [0, 64], sizes = [16, 32], strides = [1, 1]} : vector<16x128xbf16> to vector<16x32xbf16>
    %cst_93 = arith.constant dense<0.000000e+00> : vector<16x32xf32>
    %250 = tpu.matmul %248, %249, %cst_93 {dimension_numbers = #tpu.dot_dimension_numbers<[1], [0], [0], [1], [0, 0, 1, 1], [], []>} : vector<16x16xbf16>, vector<16x32xbf16>, vector<16x32xf32> -> vector<16x32xf32>
    %251 = tpu.reciprocal %247 : vector<16x1xf32> -> vector<16x1xf32>
    %252 = vector.broadcast %251 : vector<16x1xf32> to vector<16x32xf32>
    %253 = arith.mulf %250, %252 : vector<16x32xf32>
    %254 = vector.extract_strided_slice %186 {offsets = [0, 96], sizes = [16, 32], strides = [1, 1]} : vector<16x128xbf16> to vector<16x32xbf16>
    %255 = vector.extract_strided_slice %197 {offsets = [0, 96], sizes = [16, 32], strides = [1, 1]} : vector<16x128xbf16> to vector<16x32xbf16>
    %cst_94 = arith.constant dense<0.000000e+00> : vector<16x16xf32>
    %256 = tpu.matmul %254, %255, %cst_94 {dimension_numbers = #tpu.dot_dimension_numbers<[1], [1], [0], [0], [0, 0, 1, 0], [], []>} : vector<16x32xbf16>, vector<16x32xbf16>, vector<16x16xf32> -> vector<16x16xf32>
    %257 = arith.addf %256, %177 : vector<16x16xf32>
    %cst_95 = arith.constant dense<0xFF800000> : vector<16xf32>
    %258 = vector.multi_reduction <maximumf>, %257, %cst_95 [1] : vector<16x16xf32> to vector<16xf32>
    %259 = vector.shape_cast %258 : vector<16xf32> to vector<16x1xf32>
    %260 = vector.broadcast %259 : vector<16x1xf32> to vector<16x16xf32>
    %261 = arith.subf %257, %260 : vector<16x16xf32>
    %262 = math.exp %261 : vector<16x16xf32>
    %cst_96 = arith.constant dense<0.000000e+00> : vector<16xf32>
    %263 = vector.multi_reduction <add>, %262, %cst_96 [1] : vector<16x16xf32> to vector<16xf32>
    %264 = vector.shape_cast %263 : vector<16xf32> to vector<16x1xf32>
    %265 = arith.truncf %262 : vector<16x16xf32> to vector<16x16xbf16>
    %266 = vector.extract_strided_slice %198 {offsets = [0, 96], sizes = [16, 32], strides = [1, 1]} : vector<16x128xbf16> to vector<16x32xbf16>
    %cst_97 = arith.constant dense<0.000000e+00> : vector<16x32xf32>
    %267 = tpu.matmul %265, %266, %cst_97 {dimension_numbers = #tpu.dot_dimension_numbers<[1], [0], [0], [1], [0, 0, 1, 1], [], []>} : vector<16x16xbf16>, vector<16x32xbf16>, vector<16x32xf32> -> vector<16x32xf32>
    %268 = tpu.reciprocal %264 : vector<16x1xf32> -> vector<16x1xf32>
    %269 = vector.broadcast %268 : vector<16x1xf32> to vector<16x32xf32>
    %270 = arith.mulf %267, %269 : vector<16x32xf32>
    %271 = tpu.concatenate %219, %236, %253, %270 in 1 : vector<16x32xf32>, vector<16x32xf32>, vector<16x32xf32>, vector<16x32xf32> -> vector<16x128xf32>
    %272 = arith.truncf %271 : vector<16x128xf32> to vector<16x128xbf16>
    %cst_98 = arith.constant dense<0.000000e+00> : vector<16x128xf32>
    %273 = tpu.matmul %272, %200, %cst_98 {dimension_numbers = #tpu.dot_dimension_numbers<[1], [0], [0], [1], [0, 0, 1, 1], [], []>} : vector<16x128xbf16>, vector<128x128xbf16>, vector<16x128xf32> -> vector<16x128xf32>
    %274 = vector.broadcast %202 : vector<1x128xf32> to vector<16x128xf32>
    %275 = arith.addf %273, %274 : vector<16x128xf32>
    %276 = arith.addf %149, %275 : vector<16x128xf32>
    %c0_99 = arith.constant 0 : index
    %c0_100 = arith.constant 0 : index
    %c0_101 = arith.constant 0 : index
    %277 = vector.load %arg15[%c0_99, %c0_100, %c0_101] : memref<1x1x128xf32, #tpu.memory_space<vmem>>, vector<1x1x128xf32>
    %278 = vector.shape_cast %277 : vector<1x1x128xf32> to vector<1x128xf32>
    %c0_102 = arith.constant 0 : index
    %c0_103 = arith.constant 0 : index
    %c0_104 = arith.constant 0 : index
    %279 = vector.load %arg16[%c0_102, %c0_103, %c0_104] : memref<1x1x128xf32, #tpu.memory_space<vmem>>, vector<1x1x128xf32>
    %280 = vector.shape_cast %279 : vector<1x1x128xf32> to vector<1x128xf32>
    %cst_105 = arith.constant dense<0.000000e+00> : vector<16xf32>
    %281 = vector.multi_reduction <add>, %276, %cst_105 [1] : vector<16x128xf32> to vector<16xf32>
    %282 = vector.shape_cast %281 : vector<16xf32> to vector<16x1xf32>
    %cst_106 = arith.constant 1.280000e+02 : f32
    %283 = vector.broadcast %cst_106 : f32 to vector<16x1xf32>
    %284 = arith.divf %282, %283 : vector<16x1xf32>
    %285 = vector.broadcast %284 : vector<16x1xf32> to vector<16x128xf32>
    %286 = arith.subf %276, %285 : vector<16x128xf32>
    %287 = arith.mulf %286, %286 : vector<16x128xf32>
    %cst_107 = arith.constant dense<0.000000e+00> : vector<16xf32>
    %288 = vector.multi_reduction <add>, %287, %cst_107 [1] : vector<16x128xf32> to vector<16xf32>
    %289 = vector.shape_cast %288 : vector<16xf32> to vector<16x1xf32>
    %cst_108 = arith.constant 1.280000e+02 : f32
    %290 = vector.broadcast %cst_108 : f32 to vector<16x1xf32>
    %291 = arith.divf %289, %290 : vector<16x1xf32>
    %292 = vector.broadcast %284 : vector<16x1xf32> to vector<16x128xf32>
    %293 = arith.subf %276, %292 : vector<16x128xf32>
    %cst_109 = arith.constant 9.99999974E-6 : f32
    %294 = vector.broadcast %cst_109 : f32 to vector<16x1xf32>
    %295 = arith.addf %291, %294 : vector<16x1xf32>
    %296 = math.rsqrt %295 : vector<16x1xf32>
    %297 = vector.broadcast %296 : vector<16x1xf32> to vector<16x128xf32>
    %298 = arith.mulf %293, %297 : vector<16x128xf32>
    %299 = vector.broadcast %278 : vector<1x128xf32> to vector<16x128xf32>
    %300 = arith.mulf %298, %299 : vector<16x128xf32>
    %301 = vector.broadcast %280 : vector<1x128xf32> to vector<16x128xf32>
    %302 = arith.addf %300, %301 : vector<16x128xf32>
    %303 = arith.truncf %302 : vector<16x128xf32> to vector<16x128xbf16>
    %c0_110 = arith.constant 0 : index
    %c0_111 = arith.constant 0 : index
    %c0_112 = arith.constant 0 : index
    %304 = vector.load %arg17[%c0_110, %c0_111, %c0_112] : memref<1x128x256xbf16, #tpu.memory_space<vmem>>, vector<1x128x256xbf16>
    %305 = vector.shape_cast %304 : vector<1x128x256xbf16> to vector<128x256xbf16>
    %cst_113 = arith.constant dense<0.000000e+00> : vector<16x256xf32>
    %306 = tpu.matmul %303, %305, %cst_113 {dimension_numbers = #tpu.dot_dimension_numbers<[1], [0], [0], [1], [0, 0, 1, 1], [], []>} : vector<16x128xbf16>, vector<128x256xbf16>, vector<16x256xf32> -> vector<16x256xf32>
    %c0_114 = arith.constant 0 : index
    %c0_115 = arith.constant 0 : index
    %c0_116 = arith.constant 0 : index
    %307 = vector.load %arg18[%c0_114, %c0_115, %c0_116] : memref<1x1x256xf32, #tpu.memory_space<vmem>>, vector<1x1x256xf32>
    %308 = vector.shape_cast %307 : vector<1x1x256xf32> to vector<1x256xf32>
    %309 = vector.broadcast %308 : vector<1x256xf32> to vector<16x256xf32>
    %310 = arith.addf %306, %309 : vector<16x256xf32>
    %cst_117 = arith.constant 0.000000e+00 : f32
    %311 = vector.broadcast %cst_117 : f32 to vector<16x256xf32>
    %312 = arith.maximumf %310, %311 : vector<16x256xf32>
    %313 = arith.truncf %312 : vector<16x256xf32> to vector<16x256xbf16>
    %c0_118 = arith.constant 0 : index
    %c0_119 = arith.constant 0 : index
    %c0_120 = arith.constant 0 : index
    %314 = vector.load %arg19[%c0_118, %c0_119, %c0_120] : memref<1x256x128xbf16, #tpu.memory_space<vmem>>, vector<1x256x128xbf16>
    %315 = vector.shape_cast %314 : vector<1x256x128xbf16> to vector<256x128xbf16>
    %cst_121 = arith.constant dense<0.000000e+00> : vector<16x128xf32>
    %316 = tpu.matmul %313, %315, %cst_121 {dimension_numbers = #tpu.dot_dimension_numbers<[1], [0], [0], [1], [0, 0, 1, 1], [], []>} : vector<16x256xbf16>, vector<256x128xbf16>, vector<16x128xf32> -> vector<16x128xf32>
    %c0_122 = arith.constant 0 : index
    %c0_123 = arith.constant 0 : index
    %c0_124 = arith.constant 0 : index
    %317 = vector.load %arg20[%c0_122, %c0_123, %c0_124] : memref<1x1x128xf32, #tpu.memory_space<vmem>>, vector<1x1x128xf32>
    %318 = vector.shape_cast %317 : vector<1x1x128xf32> to vector<1x128xf32>
    %319 = vector.broadcast %318 : vector<1x128xf32> to vector<16x128xf32>
    %320 = arith.addf %316, %319 : vector<16x128xf32>
    %321 = arith.addf %302, %320 : vector<16x128xf32>
    %c0_125 = arith.constant 0 : index
    %c0_126 = arith.constant 0 : index
    %c0_127 = arith.constant 0 : index
    %322 = vector.load %arg21[%c0_125, %c0_126, %c0_127] : memref<1x1x128xf32, #tpu.memory_space<vmem>>, vector<1x1x128xf32>
    %323 = vector.shape_cast %322 : vector<1x1x128xf32> to vector<1x128xf32>
    %c0_128 = arith.constant 0 : index
    %c0_129 = arith.constant 0 : index
    %c0_130 = arith.constant 0 : index
    %324 = vector.load %arg22[%c0_128, %c0_129, %c0_130] : memref<1x1x128xf32, #tpu.memory_space<vmem>>, vector<1x1x128xf32>
    %325 = vector.shape_cast %324 : vector<1x1x128xf32> to vector<1x128xf32>
    %cst_131 = arith.constant dense<0.000000e+00> : vector<16xf32>
    %326 = vector.multi_reduction <add>, %321, %cst_131 [1] : vector<16x128xf32> to vector<16xf32>
    %327 = vector.shape_cast %326 : vector<16xf32> to vector<16x1xf32>
    %cst_132 = arith.constant 1.280000e+02 : f32
    %328 = vector.broadcast %cst_132 : f32 to vector<16x1xf32>
    %329 = arith.divf %327, %328 : vector<16x1xf32>
    %330 = vector.broadcast %329 : vector<16x1xf32> to vector<16x128xf32>
    %331 = arith.subf %321, %330 : vector<16x128xf32>
    %332 = arith.mulf %331, %331 : vector<16x128xf32>
    %cst_133 = arith.constant dense<0.000000e+00> : vector<16xf32>
    %333 = vector.multi_reduction <add>, %332, %cst_133 [1] : vector<16x128xf32> to vector<16xf32>
    %334 = vector.shape_cast %333 : vector<16xf32> to vector<16x1xf32>
    %cst_134 = arith.constant 1.280000e+02 : f32
    %335 = vector.broadcast %cst_134 : f32 to vector<16x1xf32>
    %336 = arith.divf %334, %335 : vector<16x1xf32>
    %337 = vector.broadcast %329 : vector<16x1xf32> to vector<16x128xf32>
    %338 = arith.subf %321, %337 : vector<16x128xf32>
    %cst_135 = arith.constant 9.99999974E-6 : f32
    %339 = vector.broadcast %cst_135 : f32 to vector<16x1xf32>
    %340 = arith.addf %336, %339 : vector<16x1xf32>
    %341 = math.rsqrt %340 : vector<16x1xf32>
    %342 = vector.broadcast %341 : vector<16x1xf32> to vector<16x128xf32>
    %343 = arith.mulf %338, %342 : vector<16x128xf32>
    %344 = vector.broadcast %323 : vector<1x128xf32> to vector<16x128xf32>
    %345 = arith.mulf %343, %344 : vector<16x128xf32>
    %346 = vector.broadcast %325 : vector<1x128xf32> to vector<16x128xf32>
    %347 = arith.addf %345, %346 : vector<16x128xf32>
    %c0_136 = arith.constant 0 : index
    %c0_137 = arith.constant 0 : index
    %348 = vector.load %arg26[%c0_136, %c0_137] : memref<16x128xf32, #tpu.memory_space<vmem>>, vector<16x128xf32>
    tpu.vector_store %arg26[%c0_136, %c0_137], %347 {strides = array<i32>} : memref<16x128xf32, #tpu.memory_space<vmem>>, vector<16x128xf32>,
    %c1_i32 = arith.constant 1 : i32
    %349 = arith.cmpi eq, %arg0, %c1_i32 : i32
    %350 = arith.extui %349 : i1 to i32
    %c0_i32_138 = arith.constant 0 : i32
    %351 = arith.cmpi ne, %350, %c0_i32_138 : i32
    scf.if %351 {
      %352 = arith.truncf %347 : vector<16x128xf32> to vector<16x128xbf16>
      %c0_139 = arith.constant 0 : index
      %c0_140 = arith.constant 0 : index
      %353 = vector.load %arg23[%c0_139, %c0_140] : memref<128x256xbf16, #tpu.memory_space<vmem>>, vector<128x256xbf16>
      %cst_141 = arith.constant dense<0.000000e+00> : vector<16x256xf32>
      %354 = tpu.matmul %352, %353, %cst_141 {dimension_numbers = #tpu.dot_dimension_numbers<[1], [0], [0], [1], [0, 0, 1, 1], [], []>} : vector<16x128xbf16>, vector<128x256xbf16>, vector<16x256xf32> -> vector<16x256xf32>
      %c0_142 = arith.constant 0 : index
      %c0_143 = arith.constant 0 : index
      %355 = vector.load %arg24[%c0_142, %c0_143] : memref<1x256xf32, #tpu.memory_space<vmem>>, vector<1x256xf32>
      %356 = vector.broadcast %355 : vector<1x256xf32> to vector<16x256xf32>
      %357 = arith.addf %354, %356 : vector<16x256xf32>
      %c0_144 = arith.constant 0 : index
      %c0_145 = arith.constant 0 : index
      %358 = vector.load %arg25[%c0_144, %c0_145] : memref<16x256xf32, #tpu.memory_space<vmem>>, vector<16x256xf32>
      tpu.vector_store %arg25[%c0_144, %c0_145], %357 {strides = array<i32>} : memref<16x256xf32, #tpu.memory_space<vmem>>, vector<16x256xf32>,
    } else {
    }
    return
  }
  func.func @transform_0(%arg0: i32) -> (i32, i32) {
    %c0_i32 = arith.constant 0 : i32
    %c0_i32_0 = arith.constant 0 : i32
    %c0_i32_1 = arith.constant 0 : i32
    return %c0_i32, %c0_i32_0 : i32, i32
  }
  func.func @transform_1(%arg0: i32) -> (i32, i32) {
    %c0_i32 = arith.constant 0 : i32
    %c0_i32_0 = arith.constant 0 : i32
    %c0_i32_1 = arith.constant 0 : i32
    return %c0_i32, %c0_i32_0 : i32, i32
  }
  func.func @transform_2(%arg0: i32) -> (i32, i32, i32) {
    %c0_i32 = arith.constant 0 : i32
    %c0_i32_0 = arith.constant 0 : i32
    %c0_i32_1 = arith.constant 0 : i32
    return %arg0, %c0_i32, %c0_i32_0 : i32, i32, i32
  }
  func.func @transform_3(%arg0: i32) -> (i32, i32, i32) {
    %c0_i32 = arith.constant 0 : i32
    %c0_i32_0 = arith.constant 0 : i32
    %c0_i32_1 = arith.constant 0 : i32
    return %arg0, %c0_i32, %c0_i32_0 : i32, i32, i32
  }
  func.func @transform_4(%arg0: i32) -> (i32, i32, i32) {
    %c0_i32 = arith.constant 0 : i32
    %c0_i32_0 = arith.constant 0 : i32
    %c0_i32_1 = arith.constant 0 : i32
    return %arg0, %c0_i32, %c0_i32_0 : i32, i32, i32
  }
  func.func @transform_5(%arg0: i32) -> (i32, i32, i32) {
    %c0_i32 = arith.constant 0 : i32
    %c0_i32_0 = arith.constant 0 : i32
    %c0_i32_1 = arith.constant 0 : i32
    return %arg0, %c0_i32, %c0_i32_0 : i32, i32, i32
  }
  func.func @transform_6(%arg0: i32) -> (i32, i32, i32) {
    %c0_i32 = arith.constant 0 : i32
    %c0_i32_0 = arith.constant 0 : i32
    %c0_i32_1 = arith.constant 0 : i32
    return %arg0, %c0_i32, %c0_i32_0 : i32, i32, i32
  }
  func.func @transform_7(%arg0: i32) -> (i32, i32, i32) {
    %c0_i32 = arith.constant 0 : i32
    %c0_i32_0 = arith.constant 0 : i32
    %c0_i32_1 = arith.constant 0 : i32
    return %arg0, %c0_i32, %c0_i32_0 : i32, i32, i32
  }
  func.func @transform_8(%arg0: i32) -> (i32, i32, i32) {
    %c0_i32 = arith.constant 0 : i32
    %c0_i32_0 = arith.constant 0 : i32
    %c0_i32_1 = arith.constant 0 : i32
    return %arg0, %c0_i32, %c0_i32_0 : i32, i32, i32
  }
  func.func @transform_9(%arg0: i32) -> (i32, i32, i32) {
    %c0_i32 = arith.constant 0 : i32
    %c0_i32_0 = arith.constant 0 : i32
    %c0_i32_1 = arith.constant 0 : i32
    return %arg0, %c0_i32, %c0_i32_0 : i32, i32, i32
  }
  func.func @transform_10(%arg0: i32) -> (i32, i32, i32) {
    %c0_i32 = arith.constant 0 : i32
    %c0_i32_0 = arith.constant 0 : i32
    %c0_i32_1 = arith.constant 0 : i32
    return %arg0, %c0_i32, %c0_i32_0 : i32, i32, i32
  }
  func.func @transform_11(%arg0: i32) -> (i32, i32, i32) {
    %c0_i32 = arith.constant 0 : i32
    %c0_i32_0 = arith.constant 0 : i32
    %c0_i32_1 = arith.constant 0 : i32
    return %arg0, %c0_i32, %c0_i32_0 : i32, i32, i32
  }
  func.func @transform_12(%arg0: i32) -> (i32, i32, i32) {
    %c0_i32 = arith.constant 0 : i32
    %c0_i32_0 = arith.constant 0 : i32
    %c0_i32_1 = arith.constant 0 : i32
    return %arg0, %c0_i32, %c0_i32_0 : i32, i32, i32
  }
  func.func @transform_13(%arg0: i32) -> (i32, i32, i32) {
    %c0_i32 = arith.constant 0 : i32
    %c0_i32_0 = arith.constant 0 : i32
    %c0_i32_1 = arith.constant 0 : i32
    return %arg0, %c0_i32, %c0_i32_0 : i32, i32, i32
  }
  func.func @transform_14(%arg0: i32) -> (i32, i32, i32) {
    %c0_i32 = arith.constant 0 : i32
    %c0_i32_0 = arith.constant 0 : i32
    %c0_i32_1 = arith.constant 0 : i32
    return %arg0, %c0_i32, %c0_i32_0 : i32, i32, i32
  }
  func.func @transform_15(%arg0: i32) -> (i32, i32, i32) {
    %c0_i32 = arith.constant 0 : i32
    %c0_i32_0 = arith.constant 0 : i32
    %c0_i32_1 = arith.constant 0 : i32
    return %arg0, %c0_i32, %c0_i32_0 : i32, i32, i32
  }
  func.func @transform_16(%arg0: i32) -> (i32, i32, i32) {
    %c0_i32 = arith.constant 0 : i32
    %c0_i32_0 = arith.constant 0 : i32
    %c0_i32_1 = arith.constant 0 : i32
    return %arg0, %c0_i32, %c0_i32_0 : i32, i32, i32
  }
  func.func @transform_17(%arg0: i32) -> (i32, i32, i32) {
    %c0_i32 = arith.constant 0 : i32
    %c0_i32_0 = arith.constant 0 : i32
    %c0_i32_1 = arith.constant 0 : i32
    return %arg0, %c0_i32, %c0_i32_0 : i32, i32, i32
  }
  func.func @transform_18(%arg0: i32) -> (i32, i32, i32) {
    %c0_i32 = arith.constant 0 : i32
    %c0_i32_0 = arith.constant 0 : i32
    %c0_i32_1 = arith.constant 0 : i32
    return %arg0, %c0_i32, %c0_i32_0 : i32, i32, i32
  }
  func.func @transform_19(%arg0: i32) -> (i32, i32, i32) {
    %c0_i32 = arith.constant 0 : i32
    %c0_i32_0 = arith.constant 0 : i32
    %c0_i32_1 = arith.constant 0 : i32
    return %arg0, %c0_i32, %c0_i32_0 : i32, i32, i32
  }
  func.func @transform_20(%arg0: i32) -> (i32, i32, i32) {
    %c0_i32 = arith.constant 0 : i32
    %c0_i32_0 = arith.constant 0 : i32
    %c0_i32_1 = arith.constant 0 : i32
    return %arg0, %c0_i32, %c0_i32_0 : i32, i32, i32
  }
  func.func @transform_21(%arg0: i32) -> (i32, i32, i32) {
    %c0_i32 = arith.constant 0 : i32
    %c0_i32_0 = arith.constant 0 : i32
    %c0_i32_1 = arith.constant 0 : i32
    return %arg0, %c0_i32, %c0_i32_0 : i32, i32, i32
  }
  func.func @transform_22(%arg0: i32) -> (i32, i32) {
    %c0_i32 = arith.constant 0 : i32
    %c0_i32_0 = arith.constant 0 : i32
    %c0_i32_1 = arith.constant 0 : i32
    return %c0_i32, %c0_i32_0 : i32, i32
  }
  func.func @transform_23(%arg0: i32) -> (i32, i32) {
    %c0_i32 = arith.constant 0 : i32
    %c0_i32_0 = arith.constant 0 : i32
    %c0_i32_1 = arith.constant 0 : i32
    return %c0_i32, %c0_i32_0 : i32, i32
  }
  func.func @transform_24(%arg0: i32) -> (i32, i32) {
    %c0_i32 = arith.constant 0 : i32
    %c0_i32_0 = arith.constant 0 : i32
    %c0_i32_1 = arith.constant 0 : i32
    return %c0_i32, %c0_i32_0 : i32, i32
  }
}

</mosaic_0001>

<bundles_post_ra>
// kernel: forward.2
= control target key start
LH: loop header
LB: loop body
LE: loop exit
PB: predicated region body
PF: predicated region fallthrough
CT: control target
= control target key end

     0   :  { %s3363_s0 = inlined_call_operand.vmem [shape: f32[16,128], index: 0, kind: input, shape index: {}]   ;;  %s3364_s1 = inlined_call_operand.vmem [shape: bf16[2,128,384], index: 1, kind: input, shape index: {}]   ;;  %s3365_s2 = inlined_call_operand.vmem [shape: f32[2,1,384], index: 2, kind: input, shape index: {}]   ;;  %s3366_s3 = inlined_call_operand.hbm [shape: bf16[2,128,128], index: 3, kind: input, shape index: {}]   ;;  %s3367_s4 = inlined_call_operand.vmem [shape: f32[2,1,128], index: 4, kind: input, shape index: {}]   ;;  %s3368_s5 = inlined_call_operand.vmem [shape: f32[2,1,128], index: 5, kind: input, shape index: {}]   ;;  %s3369_s6 = inlined_call_operand.vmem [shape: f32[2,1,128], index: 6, kind: input, shape index: {}]   ;;  %s3370_s7 = inlined_call_operand.hbm [shape: bf16[2,128,256], index: 7, kind: input, shape index: {}]   ;;  %s3371_s8 = inlined_call_operand.vmem [shape: f32[2,1,256], index: 8, kind: input, shape index: {}]   ;;  %s3372_s9 = inlined_call_operand.hbm [shape: bf16[2,256,128], index: 9, kind: input, shape index: {}]   ;;  %s3373_s10 = inlined_call_operand.vmem [shape: f32[2,1,128], index: 10, kind: input, shape index: {}]   ;;  %s3374_s11 = inlined_call_operand.vmem [shape: f32[2,1,128], index: 11, kind: input, shape index: {}]   ;;  %s3375_s12 = inlined_call_operand.vmem [shape: f32[2,1,128], index: 12, kind: input, shape index: {}]   ;;  %s3376_s13 = inlined_call_operand.vmem [shape: f32[16,128], index: 13, kind: output, shape index: {}]  }
   0x1   :  { %3386 = sst [smem:[#allocation12_spill]] %s3363_s0 }
   0x2   :  { %3387 = sst [smem:[#allocation13_spill]] %s3364_s1 }
   0x3   :  { %3388 = sst [smem:[#allocation14_spill]] %s3366_s3 }
   0x4   :  { %3389 = sst [smem:[#allocation15_spill]] %s3370_s7 }
   0x5   :  { %3390 = sst [smem:[#allocation16_spill]] %s3372_s9 }
   0x6   :  { %3391 = sst [smem:[#allocation17_spill]] %s3375_s12 }
   0x7   :  { %3392 = sst [smem:[#allocation18_spill]] %s3376_s13 }
   0x8   :  { %18 = vsyncpa [#allocation3], 0 }
   0x9   :  { %20 = vsyncpa [#allocation3 + $0x1], 0 }
   0xa   :  { %21 = vsyncpa [#allocation5], 0 }
   0xb   :  { %23 = vsyncpa [#allocation5 + $0x1], 0  ;;  %s2845_s25 = smov 0   ;;  %s2847_s26 = smov 0  }
   0xc   :  { %s2849_s27 = smov 0   ;;  %s2851_s28 = smov 0  }
   0xd LB: > { %3393 = sst [smem:[#allocation9_spill]] %s2755_s27  ;;  %s2864_s29 = sadd.s32 4294967295, %s2759_s28   ;;  %s2759_s28 = sphi %s2851_s28, %s3417_s28   ;;  %s2755_s27 = sphi %s2849_s27, %s3419_s27   ;;  %s2751_s26 = sphi %s2847_s26, %s3421_s26   ;;  %s2747_s25 = sphi %s2845_s25, %s3420_s25  }
   0xe   : > { %s2867_s30 = sadd.s32 1, %s2759_s28   ;;  %s109_s15 = sadd.s32 1, %s2755_s27 }
   0xf   : > { %3394 = sst [smem:[#allocation10_spill]] %s2867_s30  ;;  %s106_s14 = ssub.s32 %s2759_s28, %s2867_s30 }
  0x10   : > { %p107_p0 = scmp.eq.s32.totalorder %s106_s14, 0  ;;  %p116_p1 = scmp.ne.s32.totalorder %s2755_s27, %s2751_s26 }
  0x11   : > { %p117_p2 = scmp.eq.s32.totalorder %s2759_s28, 0  ;;  %p122_p3 = scmp.ne.s32.totalorder %s2751_s26, %s2747_s25 }
  0x12   : > { %s2877_s16 = scalar_select %p107_p0, %s2755_s27, %s109_s15  }
  0x13   : > { %p118_p4 = por %p117_p2, %p116_p1  ;;  %p123_p5 = scmp.eq.s32.totalorder %s2864_s29, 0 }
  0x14   : > { %3395 = sst [smem:[#allocation11_spill]] %s2877_s16  ;;  %p2452_p6 = scmp.lt.s32.totalorder %s2759_s28, 2 }
  0x15   : > { %p2881_p7 = por %p123_p5, %p122_p3  ;;  %s2886_s18 = sand.u32 1, %s2755_s27  }
  0x16   : > { %p2888_p8 = pnand %p2452_p6, %p118_p4  ;;  %s458_s20 = sand.u32 1, %s2759_s28  }
  0x17   : > { %s3396_s17 = scalar_select %p2881_p7, 1, 0 }
  0x18   : > { %s3378_s21 = sshll.u32 %s2886_s18, 7  ;;  %s3379_s22 = sshll.u32 %s2759_s28, 11 }
  0x19   : > { %s462_s23 = scalar_lea.vmem [#allocation4], %s3378_s21  ;;  %s3398_s7 = sld [smem:[#allocation15_spill]] }
  0x1a   : > { %s469_s24 = sshll.u32 %s462_s23, 4  ;;  %s2906_s16 = scalar_lea.sflag [#allocation5], %s458_s20  ;;  %s2904_s24 = int_to_ptr.vmem [resolvable:$true] %s469_s24 }
  0x1b   : > { %p2912_p10 = pneg %p2888_p8 }
  0x1f   : > { %s2902_s15 = scalar_lea.hbm %s3398_s7, %s3379_s22  ;;  %s2636_s14 = scalar_lea.hbm %s3398_s7, 4096 }
  0x20   : > { %s2631_s27 = scalar_lea.hbm %s2902_s15, 2048  ;;  %p2637_p13 = scmp.lt.u32.totalorder %s2902_s15, %s3398_s7 }
  0x21   : > { %p2632_p9 = scmp.ne.s32.totalorder %s2902_s15, %s2631_s27  ;;  %p2638_p0 = scmp.lt.u32.totalorder %s2636_s14, %s2631_s27 }
  0x22   : > { %p2640_p2 = scmp.lt.u32.totalorder %s2631_s27, %s2902_s15 }
  0x23   : > { %p2634_p11 = pnand %p2912_p10, %p2632_p9  ;;  %p2639_p1 = por %p2638_p0, %p2637_p13 }
  0x25   : > { %p2635_p12 = pneg %p2634_p11  ;;  %p2641_p3 = por %p2640_p2, %p2639_p1 }
  0x27   : > { %p2642_p4 = pnand %p2641_p3, %p2635_p12 }
  0x29   : > { %2645 = shalt.err (!%p2642_p4)
}
  0x2a   : > { %s2646_s20 = scalar_lea.vmem %s2904_s24, 2048  ;;  %s2761_s23 = smov [#allocation4]  }
  0x2b   : > { %p2647_p5 = scmp.ne.s32.totalorder %s2904_s24, %s2646_s20  ;;  %s2651_s25 = sshll.u32 %s2761_s23, 4  ;;  %s2652_s25 = int_to_ptr.vmem [resolvable:$false] %s2651_s25 }
  0x2c   : > { %s2653_s30 = scalar_lea.vmem %s2652_s25, 4096  ;;  %p2654_p11 = scmp.lt.s32.totalorder %s2904_s24, %s2652_s25 }
  0x2d   : > { %p2649_p6 = pnand %p2647_p5, %p2912_p10  ;;  %p2655_p7 = scmp.lt.s32.totalorder %s2653_s30, %s2646_s20 }
  0x2f   : > { %p2650_p9 = pneg %p2649_p6  ;;  %p2656_p13 = por %p2655_p7, %p2654_p11 }
  0x31   : > { %p2657_p0 = pnand %p2656_p13, %p2650_p9 }
  0x33   : > { %2660 = shalt.err (!%p2657_p0)
}
  0x34   : > { %s2762_s27 = smov 128   ;;  %s2763_s22 = smov 8  }
  0x35   : > { %2448 = dma.hbm_to_vmem [thread:$0]  (!%p2888_p8), %s2902_s15, 2048, %s2904_s24, %s2906_s16, %s2762_s27, %s2762_s27, %s2763_s22  }
  0x36   : > { %s3400_s14 = sshll.u32 %s2759_s28, 11  ;;  %s3401_s9 = sld [smem:[#allocation16_spill]] }
  0x37   : > { %s3402_s30 = sshll.u32 %s2886_s18, 7  ;;  %p2200_p7 = scmp.ge.s32.totalorder %s2759_s28, 1 }
  0x38   : > { %s490_s7 = scalar_lea.vmem [#allocation6], %s3402_s30  ;;  %p523_p12 = scmp.lt.s32.totalorder %s2759_s28, 3 }
  0x39   : > { %s497_s13 = sshll.u32 %s490_s7, 4  ;;  %s2191_s0 = sshll.u32 %s2886_s18, 6  ;;  %s2946_s13 = int_to_ptr.vmem [resolvable:$true] %s497_s13 }
  0x3a   : > { %p2950_p1 = pnand %p2200_p7, %p523_p12  ;;  %s2287_s24 = sshll.u32 %s2759_s28, 10 }
  0x3b   : > { %s423_s15 = scalar_lea.vmem [#allocation2], %s2191_s0  ;;  %s3404_s3 = sld [smem:[#allocation14_spill]] }
  0x3c   : > { %s2941_s25 = scalar_lea.hbm %s3401_s9, %s3400_s14  ;;  %s430_s27 = sshll.u32 %s423_s15, 4  ;;  %s2960_s27 = int_to_ptr.vmem [resolvable:$true] %s430_s27 }
  0x3d   : > { %s3403_s12 = scalar_select %p2950_p1, 1, 0 }
  0x3e   : > { %s420_s7 = scalar_lea.sflag [#allocation3], %s2886_s18 }
  0x41   : > { %s2958_s14 = scalar_lea.hbm %s3404_s3, %s2287_s24  ;;  %s2666_s30 = scalar_lea.hbm %s3404_s3, 2048 }
  0x42   : > { %s2661_s23 = scalar_lea.hbm %s2958_s14, 1024  ;;  %p2667_p5 = scmp.lt.u32.totalorder %s2958_s14, %s3404_s3 }
  0x43   : > { %p2662_p2 = scmp.ne.s32.totalorder %s2958_s14, %s2661_s23  ;;  %p2668_p6 = scmp.lt.u32.totalorder %s2666_s30, %s2661_s23 }
  0x44   : > { %p2670_p11 = scmp.lt.u32.totalorder %s2661_s23, %s2958_s14 }
  0x45   : > { %p2664_p3 = pnand %p2662_p2, %p2912_p10  ;;  %p2669_p9 = por %p2668_p6, %p2667_p5 }
  0x47   : > { %p2665_p4 = pneg %p2664_p3  ;;  %p2671_p13 = por %p2670_p11, %p2669_p9 }
  0x49   : > { %p2672_p0 = pnand %p2671_p13, %p2665_p4 }
  0x4b   : > { %2675 = shalt.err (!%p2672_p0)
}
  0x4c   : > { %s2676_s24 = scalar_lea.vmem %s2960_s27, 1024  ;;  %s2764_s20 = smov [#allocation2]  }
  0x4d   : > { %p2677_p7 = scmp.ne.s32.totalorder %s2960_s27, %s2676_s24  ;;  %s2681_s28 = sshll.u32 %s2764_s20, 4  ;;  %s2682_s28 = int_to_ptr.vmem [resolvable:$false] %s2681_s28 }
  0x4e   : > { %s2683_s0 = scalar_lea.vmem %s2682_s28, 2048  ;;  %p2684_p3 = scmp.lt.s32.totalorder %s2960_s27, %s2682_s28 }
  0x4f   : > { %p2679_p12 = pnand %p2677_p7, %p2912_p10  ;;  %p2685_p1 = scmp.lt.s32.totalorder %s2683_s0, %s2676_s24 }
  0x51   : > { %p2680_p2 = pneg %p2679_p12  ;;  %p2686_p5 = por %p2685_p1, %p2684_p3 }
  0x53   : > { %p2687_p6 = pnand %p2686_p5, %p2680_p2 }
  0x55   : > { %2690 = shalt.err (!%p2687_p6)
}
  0x56   : > { %s2765_s23 = smov 64   ;;  %s2766_s30 = smov 4  }
  0x57   : > { %2445 = dma.hbm_to_vmem [thread:$0]  (!%p2888_p8), %s2958_s14, 1024, %s2960_s27, %s420_s7, %s2765_s23, %s2765_s23, %s2766_s30  }
  0x58   : > { %s2691_s15 = scalar_lea.hbm %s2941_s25, 2048  ;;  %s2696_s20 = scalar_lea.hbm %s3401_s9, 4096 }
  0x59   : > { %p2692_p1 = scmp.ne.s32.totalorder %s2941_s25, %s2691_s15  ;;  %p2697_p11 = scmp.lt.u32.totalorder %s2941_s25, %s3401_s9 }
  0x5a   : > { %p2698_p13 = scmp.lt.u32.totalorder %s2696_s20, %s2691_s15  ;;  %p2700_p7 = scmp.lt.u32.totalorder %s2691_s15, %s2941_s25 }
  0x5b   : > { %p2694_p4 = pnand %p2692_p1, %p2912_p10 }
  0x5c   : > { %p2699_p0 = por %p2698_p13, %p2697_p11 }
  0x5d   : > { %p2695_p9 = pneg %p2694_p4 }
  0x5e   : > { %p2701_p12 = por %p2700_p7, %p2699_p0 }
  0x60   : > { %p2702_p2 = pnand %p2701_p12, %p2695_p9 }
  0x62   : > { %2705 = shalt.err (!%p2702_p2)
}
  0x63   : > { %s2706_s18 = scalar_lea.vmem %s2946_s13, 2048  ;;  %s2767_s27 = smov [#allocation6]  }
  0x64   : > { %p2707_p3 = scmp.ne.s32.totalorder %s2946_s13, %s2706_s18  ;;  %s2711_s14 = sshll.u32 %s2767_s27, 4  ;;  %s2712_s14 = int_to_ptr.vmem [resolvable:$false] %s2711_s14 }
  0x65   : > { %s2713_s7 = scalar_lea.vmem %s2712_s14, 4096  ;;  %p2714_p1 = scmp.lt.s32.totalorder %s2946_s13, %s2712_s14 }
  0x66   : > { %p2709_p5 = pnand %p2707_p3, %p2912_p10  ;;  %p2715_p4 = scmp.lt.s32.totalorder %s2713_s7, %s2706_s18 }
  0x68   : > { %p2710_p6 = pneg %p2709_p5  ;;  %p2716_p11 = por %p2715_p4, %p2714_p1 }
  0x6a   : > { %p2717_p13 = pnand %p2716_p11, %p2710_p6 }
  0x6c   : > { %2720 = shalt.err (!%p2717_p13)
}
  0x6d   : > { %2451 = dma.hbm_to_vmem [thread:$0]  (!%p2888_p8), %s2941_s25, 2048, %s2946_s13, %s2906_s16, %s2765_s23, %s2765_s23, %s2766_s30  }
  0x6e   : > { %p3405_p10 = scmp.ne.s32.totalorder %s3403_s12, 0 }
  0x6f   : > { %s529_s21 = sand.u32 (!%p3405_p10), 1, %s2751_s26   ;;  %p3406_p9 = scmp.ne.s32.totalorder (!%p3405_p10), %s3396_s17, 0 }
  0x70   : > { %527 = sbr.rel (%p3405_p10) target bundleno = 2803 (0xaf3), region = 72  ;;  %s2201_s15 = sshll.u32 (!%p3405_p10), %s529_s21, 6 }
  0x71   : > { %s530_s22 = scalar_lea.sflag (!%p3405_p10), [#allocation3], %s529_s21  ;;  %s3017_s24 = scalar_lea.vmem (!%p3405_p10), [#allocation2], %s2201_s15 }
  0x77   : > { %2738 = dma.done.wait (%p3406_p9), %s530_s22, 1024  }
  0x78   : > { %2740 = vsyncadd (%p3406_p9), %s530_s22, 4294966272  ;;  %s538_s19 = sand.u32 1, %s2864_s29   ;;  %s2202_s20 = sshll.u32 %s529_s21, 7 }
  0x79   : > { %s539_s13 = scalar_lea.sflag [#allocation5], %s538_s19  ;;  %s3024_s16 = scalar_lea.vmem [#allocation4], %s2202_s20 }
  0x7a   : > { %2742 = dma.done.wait (%p3406_p9), %s539_s13, 4096  }
  0x7b   : > { %2744 = vsyncadd (%p3406_p9), %s539_s13, 4294963200  ;;  %p630_p8 = scmp.lt.s32.totalorder %s2864_s29, 1  ;;  %s3407_s1 = sld [smem:[#allocation13_spill]] }
  0x7c   : > { %p2206_p0 = scmp.ne.s32.totalorder %s2864_s29, 0 }
  0x7d   : > { %s3032_s12 = scalar_select %p630_p8, %s2864_s29, 1 }
  0x7e   : > { %s3410_s7 = sld [smem:[#allocation18_spill]] (!%p2206_p0) }
  0x7f   : > { %s2434_s25 = smul.u32 192, %s3032_s12  ;;  %s2205_s23 = sshll.u32 %s3032_s12, 1 }
  0x80   : > { %s2435_s28 = smul.u32 3, %s3032_s12  ;;  %s3062_s0 = scalar_lea.vmem %s3371_s8, %s2205_s23 }
  0x81   : > { %s3047_s21 = scalar_lea.vmem %s3407_s1, %s2434_s25  ;;  %s654_s25 = scalar_lea.vmem %s3373_s10, %s3032_s12 }
  0x82   : > { %s3056_s9 = scalar_lea.vmem %s3365_s2, %s2435_s28  ;;  %s3408_s1 = sld [smem:[#allocation17_spill]] }
  0x83   : > { %s3076_s28 = scalar_lea.vmem [#allocation6], %s2202_s20  ;;  %665 = sbr.rel (%p2206_p0) target bundleno = 140 (0x8c), region = 88 }
  0x84   : > { %s3409_s23 = sld [smem:[#allocation12_spill]] (!%p2206_p0) }
  0x88   : > { %s660_s3 = scalar_lea.vmem %s3408_s1, %s3032_s12 }
  0x8a   : > { %v666_v0 = vld [vmem:[%s3409_s23] sm:$0xff]  ;;  %v667_v1 = vld [vmem:[%s3409_s23 + $0x8] sm:$0xff] }
  0x8b   : > { %668 = vst [vmem:[%s3410_s7] sm:$0xff] %v666_v0  ;;  %669 = vst [vmem:[%s3410_s7 + $0x8] sm:$0xff] %v667_v1 }
  0x8c PF: > { %v2511_v2 = vld [vmem:[%s3047_s21 + $0x4] ss:$12 sps:$4 sm:$0xff]   ;;  %v2513_v3 = vld [vmem:[%s3047_s21] ss:$12 sps:$4 sm:$0xff]   ;;  %v2768_v4 = vmov 0   ;;  %v2769_v5 = vmov 0.0   ;;  %v675_v31 = vlaneseq  ;;  %s3412_s30 = scalar_lea.vmem %s3367_s4, %s3032_s12  ;;  %s3413_s18 = scalar_lea.vmem %s3368_s5, %s3032_s12 }
  0x8d   : > { %913 = vmatprep.mubr.bf16.mxu0 %v2768_v4  ;;  %2346 = vmatprep.subr.bf16.mxu1 %v2769_v5  ;;  %v2514_v6 = vld [vmem:[%s3047_s21 + $0x1c] ss:$12 sps:$4 sm:$0xff]   ;;  %v2516_v7 = vld [vmem:[%s3047_s21 + $0x18] ss:$12 sps:$4 sm:$0xff]   ;;  %v2517_v8 = vld [vmem:[%s3047_s21 + $0x34] ss:$12 sps:$4 sm:$0xff]   ;;  %s3414_s19 = scalar_lea.vmem %s3369_s6, %s3032_s12  ;;  %s3415_s29 = scalar_lea.vmem %s3374_s11, %s3032_s12 }
  0x8e   : > { %881 = vmatprep.subr.bf16.mxu0 %v2511_v2  ;;  %v2519_v9 = vld [vmem:[%s3047_s21 + $0x30] ss:$12 sps:$4 sm:$0xff]   ;;  %v2520_v10 = vld [vmem:[%s3047_s21 + $0x4c] ss:$12 sps:$4 sm:$0xff]   ;;  %v2522_v11 = vld [vmem:[%s3047_s21 + $0x48] ss:$12 sps:$4 sm:$0xff]  }
  0x8f   : > { %882 = vmatpush1.bf16.msra.mxu0 %v2513_v3  ;;  %v2523_v12 = vld [vmem:[%s3047_s21 + $0x64] ss:$12 sps:$4 sm:$0xff]   ;;  %v2535_v13 = vld [vmem:[%s3047_s21 + $0x8] ss:$12 sps:$4 sm:$0xff]   ;;  %v2536_v14 = vld [vmem:[%s3047_s21 + $0x20] ss:$12 sps:$4 sm:$0xff]  }
  0x90   : > { %883 = vmatprep.subr.bf16.mxu0 %v2514_v6  ;;  %2347 = vmatpush3.bf16.msra.mxu1 %v2535_v13  ;;  %v2525_v15 = vld [vmem:[%s3047_s21 + $0x60] ss:$12 sps:$4 sm:$0xff]   ;;  %v2526_v16 = vld [vmem:[%s3047_s21 + $0x7c] ss:$12 sps:$4 sm:$0xff]   ;;  %v2528_v17 = vld [vmem:[%s3047_s21 + $0x78] ss:$12 sps:$4 sm:$0xff]  }
  0x91   : > { %2348 = vmatprep.subr.bf16.mxu1 %v2769_v5  ;;  %v2529_v18 = vld [vmem:[%s3047_s21 + $0x94] ss:$12 sps:$4 sm:$0xff]   ;;  %v2537_v19 = vld [vmem:[%s3047_s21 + $0x38] ss:$12 sps:$4 sm:$0xff]   ;;  %v2538_v20 = vld [vmem:[%s3047_s21 + $0x50] ss:$12 sps:$4 sm:$0xff]  }
  0x92   : > { %v2531_v21 = vld [vmem:[%s3047_s21 + $0x90] ss:$12 sps:$4 sm:$0xff]   ;;  %v2532_v22 = vld [vmem:[%s3047_s21 + $0xac] ss:$12 sps:$4 sm:$0xff]   ;;  %v2539_v23 = vld [vmem:[%s3047_s21 + $0x68] ss:$12 sps:$4 sm:$0xff]  }
  0x93   : > { %884 = vmatpush1.bf16.msra.mxu0 %v2516_v7  ;;  %v2534_v24 = vld [vmem:[%s3047_s21 + $0xa8] ss:$12 sps:$4 sm:$0xff]   ;;  %s3411_s20 = sld [smem:[#allocation18_spill]]  ;;  %v2540_v27 = vld [vmem:[%s3047_s21 + $0x80] ss:$12 sps:$4 sm:$0xff]   ;;  %vm2770_vm0 = vmmov 0  }
  0x94   : > { %885 = vmatprep.subr.bf16.mxu0 %v2517_v8  ;;  %2349 = vmatpush3.bf16.msra.mxu1 %v2536_v14  ;;  %v2541_v29 = vld [vmem:[%s3047_s21 + $0x98] ss:$12 sps:$4 sm:$0xff]   ;;  %v2542_v30 = vld [vmem:[%s3047_s21 + $0xb0] ss:$12 sps:$4 sm:$0xff]   ;;  %v3144_v32 = vshrl.u32 %v675_v31, 7  ;;  %vm985_vm1 = vcmask 261120  }
  0x95   : > { %2350 = vmatprep.subr.bf16.mxu1 %v2769_v5  ;;  %2362 = vmatprep.mubr.msk.bf16.mxu1 %vm2770_vm0, %v2769_v5  ;;  %v736_v34 = vld [vmem:[%s3056_s9] sm:$0x7]  ;;  %s2771_s9 = smov 96   ;;  %s2772_s21 = smov 64   ;;  %v676_v58 = vand.u32 127, %v675_v31  ;;  %vm1033_vm6 = vcmask 130048  }
  0x96   : > { %v740_v33 = vsub.s32 0, %v3144_v32  ;;  %v744_v35 = vsub.s32 1, %v3144_v32  ;;  %s2773_s17 = smov 32   ;;  %v748_v49 = vsub.s32 2, %v3144_v32  ;;  %v2774_v59 = vmov -1e+30  }
  0x97   : > { %886 = vmatpush1.bf16.msra.mxu0 %v2519_v9  ;;  %vm694_vm2 = vcmp.ge.s32.totalorder %v676_v58, 8  ;;  %vm695_vm3 = vcmp.lt.s32.totalorder %v676_v58, 16  ;;  %vm684_vm4 = vcmp.lt.s32.totalorder %v676_v58, 8  ;;  %vm1493_vm7 = vcmask 523264   ;;  %v2266_v32 = vld [vmem:[%s654_s25] ss:$0 sm:$0xff] }
  0x98   : > { %887 = vmatprep.subr.bf16.mxu0 %v2520_v10  ;;  %2351 = vmatpush3.bf16.msra.mxu1 %v2537_v19  ;;  %v741_v36 = vrot.slane %v736_v34, %v740_v33  ;;  %v745_v38 = vrot.slane %v736_v34, %v744_v35  ;;  %v749_v50 = vrot.slane %v736_v34, %v748_v49  ;;  %vm696_vm5 = vmand %vm694_vm2, %vm695_vm3  ;;  %v3168_v60 = vsel %vm684_vm4, 0.0, %v2774_v59 }
  0x99   : > { %2352 = vmatprep.subr.bf16.mxu1 %v2769_v5  ;;  %v3120_v25 = vld [vmem:[%s3411_s20] sm:$0xff]  ;;  %v3125_v26 = vld [vmem:[%s3411_s20 + $0x8] sm:$0xff]  ;;  %v3170_v62 = vsel %vm696_vm5, 0.0, %v2774_v59  ;;  %vm1496_vm8 = vcmask 785408  }
  0x9a   : > { %v703_v28 = vpack.c.bf16 %v3125_v26, %v3120_v25 }
  0x9b   : > { %888 = vmatpush1.bf16.msra.mxu0 %v2522_v11 }
  0x9c   : > { %889 = vmatprep.subr.bf16.mxu0 %v2523_v12  ;;  %2353 = vmatpush3.bf16.msra.mxu1 %v2538_v20 }
  0x9d   : > { %2354 = vmatprep.subr.bf16.mxu1 %v2769_v5 }
  0x9f   : > { %890 = vmatpush1.bf16.msra.mxu0 %v2525_v15 }
  0xa0   : > { %891 = vmatprep.subr.bf16.mxu0 %v2526_v16  ;;  %2355 = vmatpush3.bf16.msra.mxu1 %v2539_v23 }
  0xa1   : > { %2356 = vmatprep.subr.bf16.mxu1 %v2769_v5 }
  0xa3   : > { %892 = vmatpush1.bf16.msra.mxu0 %v2528_v17 }
  0xa4   : > { %893 = vmatprep.subr.bf16.mxu0 %v2529_v18  ;;  %2357 = vmatpush3.bf16.msra.mxu1 %v2540_v27 }
  0xa5   : > { %2358 = vmatprep.subr.bf16.mxu1 %v2769_v5 }
  0xa7   : > { %894 = vmatpush1.bf16.msra.mxu0 %v2531_v21 }
  0xa8   : > { %895 = vmatprep.subr.bf16.mxu0 %v2532_v22  ;;  %2359 = vmatpush3.bf16.msra.mxu1 %v2541_v29 }
  0xa9   : > { %2360 = vmatprep.subr.bf16.mxu1 %v2769_v5 }
  0xab   : > { %896 = vmatpush1.bf16.msra.mxu0 %v2534_v24 }
  0xac   : > { %2390 = vmatprep.subr.bf16.mxu0 %v2769_v5  ;;  %2361 = vmatpush3.bf16.msra.mxu1 %v2542_v30 }
  0xad   : > { %2366 = vmatprep.subr.bf16.mxu1 %v2769_v5 }
  0xae   : > { %914 = vmatmul.mubr.bf16.vlgmr.msra.gmra.mrb[0].mxu0 %v703_v28 }
  0xaf   : > { %2392 = vmatprep.mubr.msk.bf16.mxu0 %vm2770_vm0, %v2769_v5  ;;  %2363 = vmatmul.mubr.bf16.vlgmr.msra.gmra.mrb[0].mxu1 %v703_v28 }
  0xb0   : > { %2368 = vmatprep.mubr.msk.bf16.mxu1 %vm2770_vm0, %v2769_v5 }
 0x181   : > { %v915_v37 = vpop.f32.mrb[0].mxu0 }
 0x182   : > { %v917_v39 = vpop.f32.mrb[1].mxu0  ;;  %v916_v41 = vadd.f32 %v915_v37, %v741_v36  ;;  %v958_v51 = vpop.f32.mrb[0].mxu1 }
 0x183   : > { %v919_v40 = vpop.f32.mrb[2].mxu0  ;;  %v918_v44 = vadd.f32 %v917_v39, %v745_v38  ;;  %v959_v52 = vadd.f32 %v958_v51, %v749_v50  ;;  %v2364_v53 = vpop.f32.mrb[1].mxu1 }
 0x184   : > { %v920_v42 = vadd.f32 %v919_v40, %v741_v36  ;;  %v921_v43 = vpop.f32.mrb[3].mxu0  ;;  %v961_v54 = vpop.f32.mrb[2].mxu1 }
 0x185   : > { %v922_v45 = vadd.f32 %v921_v43, %v745_v38  ;;  %v962_v55 = vadd.f32 %v961_v54, %v749_v50  ;;  %v2365_v56 = vpop.f32.mrb[3].mxu1 }
 0x186   : > { %v965_v46 = vpack.c.bf16 %v920_v42, %v916_v41 }
 0x187   : > { %v966_v47 = vpack.c.bf16 %v922_v45, %v918_v44  ;;  %v3164_v57 = vpack.c.bf16 %v962_v55, %v959_v52 }
 0x189   : > { %1105 = vrot.lane.b32.xlu1 %v966_v47, %s2771_s9  ;;  %v990_v48 = vsel %vm985_vm1, %v966_v47, 0 }
 0x18a   : > { %2367 = vmatpush3.bf16.xpose.msra.mxu1 %v990_v48 }
 0x18b   : > { %2372 = vmatprep.subr.bf16.mxu1 %v2769_v5 }
 0x18d   : > { %1102 = vrot.lane.b32.xlu1 %v965_v46, %s2771_s9 }
 0x191   : > { %1225 = vrot.lane.b32.xlu1 %v965_v46, %s2772_s21  ;;  %2369 = vmatmul.mubr.msk.bf16.vlgmr.msra.gmra.mrb[4].mxu1 %vm985_vm1, %v965_v46 }
 0x192   : > { %2374 = vmatprep.mubr.msk.bf16.mxu1 %vm2770_vm0, %v2769_v5  ;;  %2373 = vmatpush3.bf16.msra.mxu1 %v3164_v57 }
 0x193   : > { %2378 = vmatprep.subr.bf16.mxu1 %v2769_v5 }
 0x195   : > { %1348 = vrot.lane.b32.xlu1 %v966_v47, %s2773_s17 }
 0x199   : > { %1346 = vrot.lane.b32.xlu1 %v965_v46, %s2773_s17 }
 0x1fb   : > { %v1106_v8 = vpop.permute.xlu1 %1105 }
 0x1fc   : > { %v1111_v24 = vsel %vm985_vm1, %v1106_v8, 0 }
 0x1ff   : > { %v1103_v11 = vpop.permute.xlu1 %1102 }
 0x203   : > { %v1226_v16 = vpop.permute.xlu1 %1225 }
 0x207   : > { %v1349_v19 = vpop.permute.xlu1 %1348 }
 0x208   : > { %v1354_v20 = vsel %vm985_vm1, %v1349_v19, 0 }
 0x20b   : > { %v1347_v27 = vpop.permute.xlu1 %1346 }
 0x264   : > { %v1026_v61 = vpop.f32.mrb[4].mxu1 }
 0x265   : > { %v1027_v63 = vadd.f32 %v1026_v61, %v3168_v60  ;;  %v2370_v0 = vpop.f32.mrb[5].mxu1 }
 0x266   : > { %v1029_v1 = vpop.f32.mrb[6].mxu1 }
 0x267   : > { %v1030_v2 = vadd.f32 %v1029_v1, %v3170_v62  ;;  %v2371_v3 = vpop.f32.mrb[7].mxu1  ;;  %v1034_v6 = vsel %vm1033_vm6, %v1027_v63, -inf }
 0x268   : > { %1035 = vmax.xlane.f32.xlu0 %v1034_v6 }
 0x269   : > { %v1037_v7 = vsel %vm1033_vm6, %v1030_v2, -inf }
 0x26c   : > { %1038 = vmax.xlane.f32.xlu0 %v1037_v7 }
 0x282   : > { %1227 = vrot.lane.b32.xlu0 %v966_v47, %s2772_s21 }
 0x2f5   : > { %v1036_v9 = vpop.xlane.xlu0 %1035 }
 0x2f6   : > { %v1040_v10 = vsub.f32 %v1027_v63, %v1036_v9 }
 0x2f8   : > { %v1042_v12 = vmul.f32 1.442695, %v1040_v10 }
 0x2f9   : > { %v1039_v13 = vpop.xlane.xlu0 %1038 }
 0x2fa   : > { %v1041_v14 = vsub.f32 %v1030_v2, %v1039_v13  ;;  %2591 = vpow2.f32 %v1042_v12 }
 0x2fc   : > { %v1044_v15 = vmul.f32 1.442695, %v1041_v14 }
 0x2fd   : > { %v1228_v17 = vpop.permute.xlu0 %1227 }
 0x2fe   : > { %2593 = vpow2.f32 %v1044_v15  ;;  %v1233_v18 = vsel %vm985_vm1, %v1228_v17, 0 }
 0x2ff   : > { %2391 = vmatpush3.bf16.xpose.msra.mxu0 %v1233_v18 }
 0x300   : > { %2402 = vmatprep.subr.bf16.mxu0 %v2769_v5 }
 0x304   : > { %v3181_v21 = vpop.eup %2591 }
 0x306   : > { %2393 = vmatmul.mubr.msk.bf16.vlgmr.msra.gmra.mrb[4].mxu0 %vm985_vm1, %v1226_v16 }
 0x307   : > { %2403 = vmatpush3.bf16.xpose.msra.mxu0 %v1354_v20  ;;  %2404 = vmatprep.mubr.msk.bf16.mxu0 %vm2770_vm0, %v2769_v5 }
 0x308   : > { %v3185_v22 = vpop.eup %2593  ;;  %2414 = vmatprep.subr.bf16.mxu0 %v2769_v5 }
 0x309   : > { %v1052_v23 = vpack.c.bf16 %v3185_v22, %v3181_v21 }
 0x30b   : > { %2375 = vmatmul.mubr.msk.bf16.vlgmr.msra.gmra.mrb[8].mxu1 %vm1033_vm6, %v1052_v23 }
 0x30c   : > { %2379 = vmatpush3.bf16.xpose.msra.mxu1 %v1111_v24  ;;  %2380 = vmatprep.mubr.msk.bf16.mxu1 %vm2770_vm0, %v2769_v5 }
 0x30d   : > { %2384 = vmatprep.subr.bf16.mxu1 %v2769_v5 }
 0x30e   : > { %2405 = vmatmul.mubr.msk.bf16.vlgmr.msra.gmra.mrb[8].mxu0 %vm985_vm1, %v1347_v27 }
 0x30f   : > { %2430 = vmatprep.mubr.msk.bf16.mxu0 %vm2770_vm0, %v2769_v5 }
 0x313   : > { %2381 = vmatmul.mubr.msk.bf16.vlgmr.msra.gmra.mrb[12].mxu1 %vm985_vm1, %v1103_v11 }
 0x314   : > { %2386 = vmatprep.mubr.msk.bf16.mxu1 %vm2770_vm0, %v2769_v5 }
 0x3d9   : > { %v1269_v28 = vpop.f32.mrb[4].mxu0 }
 0x3da   : > { %v1270_v29 = vadd.f32 %v1269_v28, %v3168_v60  ;;  %v2394_v30 = vpop.f32.mrb[5].mxu0 }
 0x3db   : > { %v1272_v31 = vpop.f32.mrb[6].mxu0 }
 0x3dc   : > { %v1273_v34 = vadd.f32 %v1272_v31, %v3170_v62  ;;  %v2395_v36 = vpop.f32.mrb[7].mxu0  ;;  %v1276_v37 = vsel %vm1033_vm6, %v1270_v29, -inf }
 0x3dd   : > { %1277 = vmax.xlane.f32.xlu1 %v1276_v37  ;;  %v1049_v37 = vsel %vm1033_vm6, %v3185_v22, 0.0  ;;  %v2543_v22 = vld [vmem:[%s3017_s24] sm:$0xff]  }
 0x3de   : > { %v3204_v38 = vpop.f32.mrb[8].mxu1  ;;  %v1279_v41 = vsel %vm1033_vm6, %v1273_v34, -inf  ;;  %2415 = vmatpush3.bf16.msra.mxu0 %v2543_v22 }
 0x3df   : > { %v2376_v39 = vpop.f32.mrb[9].mxu1  ;;  %2416 = vmatprep.subr.bf16.mxu0 %v2769_v5 }
 0x3e0   : > { %v3206_v40 = vpop.f32.mrb[10].mxu1  ;;  %v1046_v39 = vsel %vm1033_vm6, %v3181_v21, 0.0  ;;  %v2545_v21 = vld [vmem:[%s3017_s24 + $0x10] sm:$0xff]  }
 0x3e1   : > { %1280 = vmax.xlane.f32.xlu1 %v1279_v41  ;;  %v2377_v42 = vpop.f32.mrb[11].mxu1  ;;  %v1390_v43 = vpop.f32.mrb[8].mxu0 }
 0x3e2   : > { %v1391_v44 = vadd.f32 %v1390_v43, %v3168_v60  ;;  %v2406_v45 = vpop.f32.mrb[9].mxu0 }
 0x3e3   : > { %v1393_v46 = vpop.f32.mrb[10].mxu0 }
 0x3e4   : > { %v1394_v47 = vadd.f32 %v1393_v46, %v3170_v62  ;;  %v2407_v48 = vpop.f32.mrb[11].mxu0  ;;  %v1397_v49 = vsel %vm1033_vm6, %v1391_v44, -inf }
 0x3e5   : > { %1398 = vmax.xlane.f32.xlu0 %v1397_v49  ;;  %v2547_v49 = vld [vmem:[%s3017_s24 + $0x20] sm:$0xff]  }
 0x3e6   : > { %v1147_v50 = vpop.f32.mrb[12].mxu1  ;;  %v1400_v51 = vsel %vm1033_vm6, %v1394_v47, -inf }
 0x3e7   : > { %v1148_v52 = vadd.f32 %v1147_v50, %v3168_v60  ;;  %1401 = vmax.xlane.f32.xlu1 %v1400_v51  ;;  %v2382_v53 = vpop.f32.mrb[13].mxu1 }
 0x3e8   : > { %v1150_v54 = vpop.f32.mrb[14].mxu1 }
 0x3e9   : > { %v1151_v55 = vadd.f32 %v1150_v54, %v3170_v62  ;;  %v2383_v56 = vpop.f32.mrb[15].mxu1  ;;  %v1154_v58 = vsel %vm1033_vm6, %v1148_v52, -inf }
 0x3eb   : > { %1155 = vmax.xlane.f32.xlu1 %v1154_v58  ;;  %v1157_v59 = vsel %vm1033_vm6, %v1151_v55, -inf }
 0x3ec   : > { %1158 = vmax.xlane.f32.xlu0 %v1157_v59  ;;  %v2548_v59 = vld [vmem:[%s3017_s24 + $0x28] sm:$0xff]  }
 0x3fc   : > { %1295 = vrot.lane.b32.xlu1 %v3164_v57, %s2772_s21 }
 0x400   : > { %1416 = vrot.lane.b32.xlu1 %v3164_v57, %s2773_s17 }
 0x402   : > { %1174 = vrot.lane.b32.xlu0 %v3164_v57, %s2771_s9 }
 0x46a   : > { %v1278_v60 = vpop.xlane.xlu1 %1277 }
 0x46b   : > { %v1282_v61 = vsub.f32 %v1270_v29, %v1278_v60 }
 0x46d   : > { %v1284_v63 = vmul.f32 1.442695, %v1282_v61 }
 0x46e   : > { %v1281_v62 = vpop.xlane.xlu1 %1280 }
 0x46f   : > { %2595 = vpow2.f32 %v1284_v63  ;;  %v1283_v0 = vsub.f32 %v1273_v34, %v1281_v62  ;;  %v2549_v62 = vld [vmem:[%s3017_s24 + $0x30] sm:$0xff]  }
 0x471   : > { %v1286_v1 = vmul.f32 1.442695, %v1283_v0 }
 0x472   : > { %v1399_v3 = vpop.xlane.xlu0 %1398 }
 0x473   : > { %2597 = vpow2.f32 %v1286_v1  ;;  %v1403_v7 = vsub.f32 %v1391_v44, %v1399_v3  ;;  %v2544_v44 = vld [vmem:[%s3017_s24 + $0x8] sm:$0xff]  }
 0x474   : > { %v1402_v2 = vpop.xlane.xlu1 %1401  ;;  %2417 = vmatpush3.bf16.msra.mxu0 %v2544_v44 }
 0x475   : > { %v1404_v6 = vsub.f32 %v1394_v47, %v1402_v2  ;;  %v1405_v15 = vmul.f32 1.442695, %v1403_v7  ;;  %2418 = vmatprep.subr.bf16.mxu0 %v2769_v5 }
 0x477   : > { %v1407_v57 = vmul.f32 1.442695, %v1404_v6 }
 0x478   : > { %v1156_v8 = vpop.xlane.xlu1 %1155  ;;  %2419 = vmatpush3.bf16.msra.mxu0 %v2545_v21 }
 0x479   : > { %v2596_v9 = vpop.eup %2595  ;;  %v1160_v10 = vsub.f32 %v1148_v52, %v1156_v8  ;;  %v1159_v11 = vpop.xlane.xlu0 %1158  ;;  %2420 = vmatprep.subr.bf16.mxu0 %v2769_v5 }
 0x47a   : > { %v1161_v12 = vsub.f32 %v1151_v55, %v1159_v11  ;;  %v1288_v13 = vsel %vm1033_vm6, %v2596_v9, 0.0 }
 0x47b   : > { %v1162_v14 = vmul.f32 1.442695, %v1160_v10  ;;  %1289 = vadd.xlane.f32.xlu0 %v1288_v13  ;;  %v2550_v10 = vld [vmem:[%s3017_s24 + $0x38] sm:$0xff]  }
 0x47c   : > { %v1164_v16 = vmul.f32 1.442695, %v1161_v12  ;;  %v1296_v31 = vpop.permute.xlu1 %1295 }
 0x47d   : > { %v2598_v17 = vpop.eup %2597  ;;  %2599 = vpow2.f32 %v1162_v14  ;;  %v1175_v18 = vpop.permute.xlu0 %1174 }
 0x47e   : > { %2601 = vpow2.f32 %v1164_v16  ;;  %2385 = vmatpush3.bf16.msra.mxu1 %v1175_v18  ;;  %v1291_v19 = vsel %vm1033_vm6, %v2598_v17, 0.0  ;;  %v1294_v41 = vpack.c.bf16 %v2598_v17, %v2596_v9 }
 0x47f   : > { %2603 = vpow2.f32 %v1407_v57  ;;  %1292 = vadd.xlane.f32.xlu0 %v1291_v19  ;;  %2396 = vmatprep.subr.bf16.mxu1 %v2769_v5 }
 0x480   : > { %2605 = vpow2.f32 %v1405_v15  ;;  %v1417_v42 = vpop.permute.xlu1 %1416 }
 0x487   : > { %v2600_v20 = vpop.eup %2599 }
 0x488   : > { %v2602_v23 = vpop.eup %2601  ;;  %v1166_v24 = vsel %vm1033_vm6, %v2600_v20, 0.0 }
 0x489   : > { %v2604_v27 = vpop.eup %2603  ;;  %1167 = vadd.xlane.f32.xlu0 %v1166_v24  ;;  %v1169_v28 = vsel %vm1033_vm6, %v2602_v23, 0.0  ;;  %v1172_v29 = vpack.c.bf16 %v2602_v23, %v2600_v20 }
 0x48a   : > { %v2606_v30 = vpop.eup %2605  ;;  %1170 = vadd.xlane.f32.xlu1 %v1169_v28  ;;  %v1412_v34 = vsel %vm1033_vm6, %v2604_v27, 0.0 }
 0x48b   : > { %2387 = vmatmul.mubr.msk.bf16.vlgmr.msra.gmra.mrb[16].mxu1 %vm1033_vm6, %v1172_v29  ;;  %v1409_v36 = vsel %vm1033_vm6, %v2606_v30, 0.0  ;;  %v1415_v43 = vpack.c.bf16 %v2604_v27, %v2606_v30 }
 0x48c   : > { %2397 = vmatpush3.bf16.msra.mxu1 %v1296_v31  ;;  %2398 = vmatprep.mubr.msk.bf16.mxu1 %vm2770_vm0, %v2769_v5 }
 0x48d   : > { %1413 = vadd.xlane.f32.xlu0 %v1412_v34  ;;  %2408 = vmatprep.subr.bf16.mxu1 %v2769_v5 }
 0x48e   : > { %1410 = vadd.xlane.f32.xlu1 %v1409_v36 }
 0x491   : > { %1050 = vadd.xlane.f32.xlu0 %v1049_v37 }
 0x492   : > { %1047 = vadd.xlane.f32.xlu1 %v1046_v39 }
 0x493   : > { %2399 = vmatmul.mubr.msk.bf16.vlgmr.msra.gmra.mrb[20].mxu1 %vm1033_vm6, %v1294_v41 }
 0x494   : > { %2409 = vmatpush3.bf16.msra.mxu1 %v1417_v42  ;;  %2410 = vmatprep.mubr.msk.bf16.mxu1 %vm2770_vm0, %v2769_v5 }
 0x49b   : > { %2411 = vmatmul.mubr.msk.bf16.vlgmr.msra.gmra.mrb[24].mxu1 %vm1033_vm6, %v1415_v43 }
 0x49c   : > { %1779 = vmatprep.mubr.bf16.mxu1 %v2768_v4  ;;  %v2546_v4 = vld [vmem:[%s3017_s24 + $0x18] sm:$0xff]  }
 0x49d   : > { %2421 = vmatpush3.bf16.msra.mxu0 %v2546_v4 }
 0x49e   : > { %2422 = vmatprep.subr.bf16.mxu0 %v2769_v5 }
 0x4a1   : > { %2423 = vmatpush3.bf16.msra.mxu0 %v2547_v49 }
 0x4a2   : > { %2424 = vmatprep.subr.bf16.mxu0 %v2769_v5 }
 0x4a5   : > { %2425 = vmatpush3.bf16.msra.mxu0 %v2548_v59 }
 0x4a6   : > { %2426 = vmatprep.subr.bf16.mxu0 %v2769_v5 }
 0x4a9   : > { %2427 = vmatpush3.bf16.msra.mxu0 %v2549_v62 }
 0x4aa   : > { %2428 = vmatprep.subr.bf16.mxu0 %v2769_v5 }
 0x4ad   : > { %2429 = vmatpush3.bf16.msra.mxu0 %v2550_v10  ;;  %v2566_v10 = vld [vmem:[%s3024_s16 + $0x50] ss:$8 sps:$4 sm:$0xff]  }
 0x508   : > { %v1290_v45 = vpop.xlane.xlu0 %1289 }
 0x50c   : > { %v1293_v46 = vpop.xlane.xlu0 %1292 }
 0x516   : > { %v1168_v47 = vpop.xlane.xlu0 %1167 }
 0x517   : > { %v1171_v48 = vpop.xlane.xlu1 %1170  ;;  %2607 = vrcp.f32 %v1168_v47 }
 0x518   : > { %2609 = vrcp.f32 %v1171_v48 }
 0x519   : > { %2611 = vrcp.f32 %v1290_v45 }
 0x51a   : > { %2613 = vrcp.f32 %v1293_v46  ;;  %v1414_v60 = vpop.xlane.xlu0 %1413 }
 0x51b   : > { %v1411_v61 = vpop.xlane.xlu1 %1410  ;;  %2615 = vrcp.f32 %v1414_v60 }
 0x51c   : > { %2617 = vrcp.f32 %v1411_v61 }
 0x51e   : > { %v1051_v5 = vpop.xlane.xlu0 %1050 }
 0x51f   : > { %v1048_v20 = vpop.xlane.xlu1 %1047  ;;  %2619 = vrcp.f32 %v1051_v5  ;;  %v2581_v5 = vld [vmem:[%s3076_s28 + $0x58] sm:$0xff]  }
 0x520   : > { %2621 = vrcp.f32 %v1048_v20  ;;  %v2582_v20 = vld [vmem:[%s3076_s28 + $0x18] sm:$0xff]  }
 0x521   : > { %v2608_v51 = vpop.eup %2607 }
 0x522   : > { %v2610_v53 = vpop.eup %2609 }
 0x523   : > { %v2612_v1 = vpop.eup %2611 }
 0x524   : > { %v2614_v3 = vpop.eup %2613 }
 0x525   : > { %v2616_v13 = vpop.eup %2615 }
 0x526   : > { %v2618_v14 = vpop.eup %2617 }
 0x529   : > { %v2620_v24 = vpop.eup %2619 }
 0x52a   : > { %v2622_v28 = vpop.eup %2621  ;;  %v1100_v37 = vmul.f32 %v2620_v24, %v3206_v40  ;;  %v2584_v24 = vld [vmem:[%s3076_s28 + $0x20] sm:$0xff]  }
 0x52b   : > { %v1099_v36 = vmul.f32 %v2622_v28, %v3204_v38  ;;  %v2239_v38 = vld [vmem:[%s3412_s30] ss:$0 sm:$0xff] }
 0x55e   : > { %v1214_v50 = vpop.f32.mrb[16].mxu1 }
 0x55f   : > { %v2388_v52 = vpop.f32.mrb[17].mxu1  ;;  %v1223_v55 = vmul.f32 %v2608_v51, %v1214_v50 }
 0x560   : > { %v1217_v54 = vpop.f32.mrb[18].mxu1 }
 0x561   : > { %v1224_v56 = vmul.f32 %v2610_v53, %v1217_v54  ;;  %v2389_v58 = vpop.f32.mrb[19].mxu1  ;;  %v2551_v54 = vld [vmem:[%s3024_s16] ss:$8 sps:$4 sm:$0xff]  }
 0x562   : > { %v2554_v58 = vld [vmem:[%s3024_s16 + $0x10] ss:$8 sps:$4 sm:$0xff]  }
 0x563   : > { %v2496_v63 = vpack.i.bf16 %v1224_v56, %v1223_v55  ;;  %v2553_v55 = vld [vmem:[%s3024_s16 + $0x4] ss:$8 sps:$4 sm:$0xff]   ;;  %v2556_v56 = vld [vmem:[%s3024_s16 + $0x14] ss:$8 sps:$4 sm:$0xff]  }
 0x564   : > { %1747 = vmatprep.subr.bf16.mxu1 %v2553_v55 }
 0x565   : > { %2497 = vrot.lane.b32.xlu1 %v2496_v63, %s2773_s17  ;;  %1748 = vmatpush1.bf16.msra.mxu1 %v2551_v54 }
 0x566   : > { %v1335_v0 = vpop.f32.mrb[20].mxu1  ;;  %1749 = vmatprep.subr.bf16.mxu1 %v2556_v56 }
 0x567   : > { %v2400_v2 = vpop.f32.mrb[21].mxu1  ;;  %v1344_v7 = vmul.f32 %v2612_v1, %v1335_v0  ;;  %v2559_v1 = vld [vmem:[%s3024_s16 + $0x24] ss:$8 sps:$4 sm:$0xff]  }
 0x568   : > { %v1338_v6 = vpop.f32.mrb[22].mxu1  ;;  %v2557_v2 = vld [vmem:[%s3024_s16 + $0x20] ss:$8 sps:$4 sm:$0xff]  }
 0x569   : > { %v1345_v8 = vmul.f32 %v2614_v3, %v1338_v6  ;;  %v2401_v9 = vpop.f32.mrb[23].mxu1  ;;  %1750 = vmatpush1.bf16.msra.mxu1 %v2554_v58  ;;  %v2562_v3 = vld [vmem:[%s3024_s16 + $0x34] ss:$8 sps:$4 sm:$0xff]   ;;  %v2560_v6 = vld [vmem:[%s3024_s16 + $0x30] ss:$8 sps:$4 sm:$0xff]  }
 0x56a   : > { %1751 = vmatprep.subr.bf16.mxu1 %v2559_v1  ;;  %v2568_v9 = vld [vmem:[%s3024_s16 + $0x54] ss:$8 sps:$4 sm:$0xff]  }
 0x56b   : > { %v2501_v11 = vpack.i.bf16 %v1345_v8, %v1344_v7  ;;  %v2565_v7 = vld [vmem:[%s3024_s16 + $0x44] ss:$8 sps:$4 sm:$0xff]   ;;  %v2563_v8 = vld [vmem:[%s3024_s16 + $0x40] ss:$8 sps:$4 sm:$0xff]  }
 0x56d   : > { %2502 = vrot.lane.b32.xlu0 %v2501_v11, %s2772_s21  ;;  %1752 = vmatpush1.bf16.msra.mxu1 %v2557_v2  ;;  %v2571_v11 = vld [vmem:[%s3024_s16 + $0x64] ss:$8 sps:$4 sm:$0xff]  }
 0x56e   : > { %v1456_v12 = vpop.f32.mrb[24].mxu1  ;;  %1753 = vmatprep.subr.bf16.mxu1 %v2562_v3 }
 0x56f   : > { %v2412_v57 = vpop.f32.mrb[25].mxu1  ;;  %v1465_v16 = vmul.f32 %v2618_v14, %v1456_v12  ;;  %v2569_v12 = vld [vmem:[%s3024_s16 + $0x60] ss:$8 sps:$4 sm:$0xff]  }
 0x570   : > { %v1459_v15 = vpop.f32.mrb[26].mxu1  ;;  %v2572_v57 = vld [vmem:[%s3024_s16 + $0x70] ss:$8 sps:$4 sm:$0xff]   ;;  %v2575_v14 = vld [vmem:[%s3076_s28 + $0x40] sm:$0xff]  }
 0x571   : > { %v1466_v17 = vmul.f32 %v2616_v13, %v1459_v15  ;;  %v2413_v18 = vpop.f32.mrb[27].mxu1  ;;  %1754 = vmatpush1.bf16.msra.mxu1 %v2560_v6  ;;  %v2574_v13 = vld [vmem:[%s3024_s16 + $0x74] ss:$8 sps:$4 sm:$0xff]   ;;  %v2576_v15 = vld [vmem:[%s3076_s28] sm:$0xff]   ;;  %2324 = vmatprep.subr.bf16.mxu0 %v2575_v14 }
 0x572   : > { %1755 = vmatprep.subr.bf16.mxu1 %v2565_v7  ;;  %v2579_v18 = vld [vmem:[%s3076_s28 + $0x50] sm:$0xff]  }
 0x573   : > { %v2506_v19 = vpack.i.bf16 %v1466_v17, %v1465_v16  ;;  %v2577_v16 = vld [vmem:[%s3076_s28 + $0x48] sm:$0xff]  }
 0x574   : > { %v2578_v17 = vld [vmem:[%s3076_s28 + $0x8] sm:$0xff]  }
 0x575   : > { %2507 = vrot.lane.b32.xlu1 %v2506_v19, %s2771_s9  ;;  %1756 = vmatpush1.bf16.msra.mxu1 %v2563_v8  ;;  %v2580_v19 = vld [vmem:[%s3076_s28 + $0x10] sm:$0xff]  }
 0x576   : > { %1757 = vmatprep.subr.bf16.mxu1 %v2568_v9 }
 0x579   : > { %1758 = vmatpush1.bf16.msra.mxu1 %v2566_v10 }
 0x57a   : > { %1759 = vmatprep.subr.bf16.mxu1 %v2571_v11 }
 0x57d   : > { %1760 = vmatpush1.bf16.msra.mxu1 %v2569_v12 }
 0x57e   : > { %1761 = vmatprep.subr.bf16.mxu1 %v2574_v13 }
 0x581   : > { %1762 = vmatpush1.bf16.msra.mxu1 %v2572_v57 }
 0x5d7   : > { %v2498_v23 = vpop.permute.xlu1 %2497 }
 0x5d8   : > { %v2500_v29 = vunpack.i.h.bf16 %v2498_v23  ;;  %v2499_v30 = vunpack.i.l.bf16 %v2498_v23  ;;  %v2583_v23 = vld [vmem:[%s3076_s28 + $0x60] sm:$0xff]  }
 0x5da   : > { %v1492_v41 = vsel %vm985_vm1, %v1100_v37, %v2500_v29  ;;  %v1491_v42 = vsel %vm985_vm1, %v1099_v36, %v2499_v30 }
 0x5df   : > { %v2503_v27 = vpop.permute.xlu0 %2502 }
 0x5e0   : > { %v2505_v31 = vunpack.i.h.bf16 %v2503_v27  ;;  %v2504_v34 = vunpack.i.l.bf16 %v2503_v27  ;;  %v2585_v27 = vld [vmem:[%s3076_s28 + $0x68] sm:$0xff]  }
 0x5e2   : > { %v1495_v44 = vsel %vm1493_vm7, %v1492_v41, %v2505_v31  ;;  %v1494_v21 = vsel %vm1493_vm7, %v1491_v42, %v2504_v34 }
 0x5e7   : > { %v2508_v39 = vpop.permute.xlu1 %2507 }
 0x5e8   : > { %v2510_v43 = vunpack.i.h.bf16 %v2508_v39  ;;  %v2509_v22 = vunpack.i.l.bf16 %v2508_v39  ;;  %v2248_v39 = vld [vmem:[%s3413_s18] ss:$0 sm:$0xff] }
 0x5ea   : > { %v1498_v45 = vsel %vm1496_vm8, %v1495_v44, %v2510_v43  ;;  %v1497_v46 = vsel %vm1496_vm8, %v1494_v21, %v2509_v22  ;;  %v2249_v44 = vld [vmem:[%s3414_s19] ss:$0 sm:$0xff] }
 0x5eb   : > { %v1499_v47 = vpack.c.bf16 %v1498_v45, %v1497_v46 }
 0x5ed   : > { %2431 = vmatmul.mubr.bf16.vlgmr.msra.gmra.mrb[12].mxu0 %v1499_v47 }
 0x5ee   : > { %2325 = vmatpush3.bf16.msra.mxu0 %v2576_v15 }
 0x5ef   : > { %2326 = vmatprep.subr.bf16.mxu0 %v2577_v16 }
 0x5f2   : > { %2327 = vmatpush3.bf16.msra.mxu0 %v2578_v17 }
 0x5f3   : > { %2328 = vmatprep.subr.bf16.mxu0 %v2579_v18 }
 0x5f6   : > { %2329 = vmatpush3.bf16.msra.mxu0 %v2580_v19 }
 0x5f7   : > { %2330 = vmatprep.subr.bf16.mxu0 %v2581_v5 }
 0x5fa   : > { %2331 = vmatpush3.bf16.msra.mxu0 %v2582_v20 }
 0x5fb   : > { %2332 = vmatprep.subr.bf16.mxu0 %v2583_v23 }
 0x5fe   : > { %2333 = vmatpush3.bf16.msra.mxu0 %v2584_v24 }
 0x5ff   : > { %2334 = vmatprep.subr.bf16.mxu0 %v2585_v27 }
 0x6c0   : > { %v1588_v40 = vpop.f32.mrb[12].mxu0 }
 0x6c1   : > { %v1589_v48 = vadd.f32 %v2239_v38, %v1588_v40  ;;  %v2432_v4 = vpop.f32.mrb[13].mxu0  ;;  %v2587_v40 = vld [vmem:[%s3076_s28 + $0x70] sm:$0xff]  }
 0x6c2   : > { %v1591_v49 = vpop.f32.mrb[14].mxu0  ;;  %v2589_v4 = vld [vmem:[%s3076_s28 + $0x78] sm:$0xff]  }
 0x6c3   : > { %v1592_v50 = vadd.f32 %v2239_v38, %v1591_v49  ;;  %v2433_v51 = vpop.f32.mrb[15].mxu0  ;;  %v1595_v52 = vadd.f32 %v1589_v48, %v3120_v25  ;;  %v2586_v38 = vld [vmem:[%s3076_s28 + $0x28] sm:$0xff]   ;;  %v2588_v48 = vld [vmem:[%s3076_s28 + $0x30] sm:$0xff]   ;;  %v2590_v49 = vld [vmem:[%s3076_s28 + $0x38] sm:$0xff]  }
 0x6c4   : > { %2335 = vmatpush3.bf16.msra.mxu0 %v2586_v38 }
 0x6c5   : > { %1599 = vadd.xlane.f32.xlu1 %v1595_v52  ;;  %v1596_v53 = vadd.f32 %v1592_v50, %v3125_v26  ;;  %2336 = vmatprep.subr.bf16.mxu0 %v2587_v40  ;;  %v1655_v50 = vld [vmem:[%s3062_s0] sm:$0x3] }
 0x6c6   : > { %v1660_v51 = vrot.slane %v1655_v50, %v740_v33 }
 0x6c7   : > { %1601 = vadd.xlane.f32.xlu0 %v1596_v53 }
 0x6c8   : > { %2337 = vmatpush3.bf16.msra.mxu0 %v2588_v48 }
 0x6c9   : > { %2338 = vmatprep.subr.bf16.mxu0 %v2589_v4 }
 0x6cc   : > { %2339 = vmatpush3.bf16.msra.mxu0 %v2590_v49 }
 0x752   : > { %v1600_v59 = vpop.xlane.xlu1 %1599 }
 0x753   : > { %v1604_v60 = vmul.f32 0.0078125, %v1600_v59 }
 0x754   : > { %v1602_v61 = vpop.xlane.xlu0 %1601 }
 0x755   : > { %v3276_v25 = vsub.f32 %v1595_v52, %v1604_v60  ;;  %v1605_v26 = vmul.f32 0.0078125, %v1602_v61  ;;  %v1664_v52 = vrot.slane %v1655_v50, %v744_v35 }
 0x757   : > { %v3278_v63 = vsub.f32 %v1596_v53, %v1605_v26  ;;  %v1608_v62 = vmul.f32 %v3276_v25, %v3276_v25 }
 0x759   : > { %1610 = vadd.xlane.f32.xlu0 %v1608_v62  ;;  %v1609_v0 = vmul.f32 %v3278_v63, %v3278_v63 }
 0x75b   : > { %1612 = vadd.xlane.f32.xlu1 %v1609_v0 }
 0x7e6   : > { %v1611_v28 = vpop.xlane.xlu0 %1610 }
 0x7e7   : > { %v1614_v29 = vmul.f32 0.0078125, %v1611_v28 }
 0x7e8   : > { %v1613_v30 = vpop.xlane.xlu1 %1612 }
 0x7e9   : > { %v1616_v31 = vadd.f32 1e-05, %v1614_v29  ;;  %v1615_v34 = vmul.f32 0.0078125, %v1613_v30  ;;  %v2283_v29 = vld [vmem:[%s3415_s29] ss:$0 sm:$0xff] }
 0x7eb   : > { %2623 = vrsqrt.f32 %v1616_v31  ;;  %v1617_v36 = vadd.f32 1e-05, %v1615_v34  ;;  %v2284_v34 = vld [vmem:[%s660_s3] ss:$0 sm:$0xff] }
 0x7ed   : > { %2625 = vrsqrt.f32 %v1617_v36 }
 0x7f5   : > { %v2624_v37 = vpop.eup %2623 }
 0x7f6   : > { %v1620_v41 = vmul.f32 %v2624_v37, %v3276_v25 }
 0x7f7   : > { %v2626_v42 = vpop.eup %2625 }
 0x7f8   : > { %v1621_v43 = vmul.f32 %v2626_v42, %v3278_v63  ;;  %v1628_v22 = vmul.f32 %v2248_v39, %v1620_v41 }
 0x7fa   : > { %v1629_v21 = vmul.f32 %v2248_v39, %v1621_v43  ;;  %v1636_v45 = vadd.f32 %v2249_v44, %v1628_v22 }
 0x7fc   : > { %v1637_v46 = vadd.f32 %v2249_v44, %v1629_v21 }
 0x7fe   : > { %v1638_v47 = vpack.c.bf16 %v1637_v46, %v1636_v45 }
 0x800   : > { %1780 = vmatmul.mubr.bf16.vlgmr.msra.gmra.mrb[28].mxu1 %v1638_v47 }
 0x8d3   : > { %v1781_v53 = vpop.f32.mrb[28].mxu1 }
 0x8d4   : > { %v1782_v54 = vadd.f32 %v1781_v53, %v1660_v51  ;;  %v1783_v55 = vpop.f32.mrb[29].mxu1 }
 0x8d5   : > { %v1784_v56 = vadd.f32 %v1783_v55, %v1664_v52  ;;  %v1785_v58 = vpop.f32.mrb[30].mxu1 }
 0x8d6   : > { %v1786_v59 = vadd.f32 %v1785_v58, %v1660_v51  ;;  %v1787_v60 = vpop.f32.mrb[31].mxu1  ;;  %v1790_v25 = vmax.f32 %v1782_v54, 0.0 }
 0x8d7   : > { %v1788_v61 = vadd.f32 %v1787_v60, %v1664_v52  ;;  %v1791_v63 = vmax.f32 %v1784_v56, 0.0 }
 0x8d8   : > { %v1792_v26 = vmax.f32 %v1786_v59, 0.0 }
 0x8d9   : > { %v1793_v62 = vmax.f32 %v1788_v61, 0.0 }
 0x8da   : > { %v1794_v0 = vpack.c.bf16 %v1792_v26, %v1790_v25 }
 0x8db   : > { %v1795_v1 = vpack.c.bf16 %v1793_v62, %v1791_v63 }
 0x8dd   : > { %1963 = vmatprep.mubr.bf16.mxu0 %v1795_v1 }
 0x8de   : > { %1964 = vmatmul.mubr.bf16.vlgmr.msra.gmra.mrb[16].mxu0 %v1794_v0 }
 0x9b1   : > { %v2340_v33 = vpop.f32.mrb[16].mxu0 }
 0x9b2   : > { %v2341_v35 = vpop.f32.mrb[17].mxu0 }
 0x9b3   : > { %v2342_v2 = vadd.f32 %v2341_v35, %v2340_v33  ;;  %v2343_v3 = vpop.f32.mrb[18].mxu0 }
 0x9b4   : > { %v2344_v6 = vpop.f32.mrb[19].mxu0 }
 0x9b5   : > { %v1966_v7 = vadd.f32 %v2342_v2, %v2266_v32  ;;  %v2345_v8 = vadd.f32 %v2344_v6, %v2343_v3 }
 0x9b7   : > { %v1969_v9 = vadd.f32 %v2345_v8, %v2266_v32  ;;  %v1972_v10 = vadd.f32 %v1966_v7, %v1636_v45 }
 0x9b9   : > { %1976 = vadd.xlane.f32.xlu0 %v1972_v10  ;;  %v1973_v11 = vadd.f32 %v1969_v9, %v1637_v46 }
 0x9bb   : > { %1978 = vadd.xlane.f32.xlu1 %v1973_v11 }
 0xa46   : > { %v1977_v12 = vpop.xlane.xlu0 %1976 }
 0xa47   : > { %v1980_v13 = vmul.f32 0.0078125, %v1977_v12 }
 0xa48   : > { %v1979_v57 = vpop.xlane.xlu1 %1978 }
 0xa49   : > { %v1982_v14 = vsub.f32 %v1972_v10, %v1980_v13  ;;  %v1981_v15 = vmul.f32 0.0078125, %v1979_v57 }
 0xa4b   : > { %v1983_v16 = vsub.f32 %v1973_v11, %v1981_v15  ;;  %v1984_v17 = vmul.f32 %v1982_v14, %v1982_v14 }
 0xa4d   : > { %1986 = vadd.xlane.f32.xlu0 %v1984_v17  ;;  %v1985_v18 = vmul.f32 %v1983_v16, %v1983_v16 }
 0xa4f   : > { %1988 = vadd.xlane.f32.xlu1 %v1985_v18 }
 0xada   : > { %v1987_v19 = vpop.xlane.xlu0 %1986 }
 0xadb   : > { %v1990_v5 = vmul.f32 0.0078125, %v1987_v19 }
 0xadc   : > { %v1989_v20 = vpop.xlane.xlu1 %1988 }
 0xadd   : > { %v1992_v23 = vadd.f32 1e-05, %v1990_v5  ;;  %v1991_v24 = vmul.f32 0.0078125, %v1989_v20 }
 0xadf   : > { %2627 = vrsqrt.f32 %v1992_v23  ;;  %v1993_v27 = vadd.f32 1e-05, %v1991_v24 }
 0xae1   : > { %2629 = vrsqrt.f32 %v1993_v27 }
 0xae9   : > { %v2628_v28 = vpop.eup %2627 }
 0xaea   : > { %v1996_v30 = vmul.f32 %v2628_v28, %v1982_v14 }
 0xaeb   : > { %v2630_v31 = vpop.eup %2629 }
 0xaec   : > { %v2004_v36 = vmul.f32 %v2283_v29, %v1996_v30  ;;  %v1997_v37 = vmul.f32 %v2630_v31, %v1983_v16 }
 0xaee   : > { %v2012_v39 = vadd.f32 %v2284_v34, %v2004_v36  ;;  %v2005_v41 = vmul.f32 %v2283_v29, %v1997_v37 }
 0xaf0   : > { %2014 = vst [vmem:[%s3411_s20] sm:$0xff] %v2012_v39  ;;  %v2013_v42 = vadd.f32 %v2284_v34, %v2005_v41 }
 0xaf2   : > { %2015 = vst [vmem:[%s3411_s20 + $0x8] sm:$0xff] %v2013_v42 }
 0xaf3 PF: > { %s3417_s28 = sld [smem:[#allocation10_spill]]  ;;  %s3418_s30 = sld [smem:[#allocation9_spill]] }
 0xaf4   : > { %s3419_s27 = sld [smem:[#allocation11_spill]]  ;;  %s3420_s25 = smov %s2751_s26 }
 0xaf9   : > { %p26_p7 = scmp.ge.s32.totalorder %s3417_s28, 4   ;;  %s3421_s26 = smov %s3418_s30 }
 0xafb   :  { %28 = sbr.rel (!%p26_p7) target bundleno = 13 (0xd), region = 163 }
 0xb02   :  { %2027 = vsyncpa [#allocation3], 1 }
 0xb03   :  { %2029 = vsyncpa [#allocation3 + $0x1], 1 }
 0xb04   :  { %2030 = vsyncpa [#allocation5], 1 }
 0xb05   :  { %2032 = vsyncpa [#allocation5 + $0x1], 1 }

// kernel: forward.3
= control target key start
LH: loop header
LB: loop body
LE: loop exit
PB: predicated region body
PF: predicated region fallthrough
CT: control target
= control target key end

     0   :  { %s5787_s0 = inlined_call_operand.vmem [shape: f32[16,128], index: 0, kind: input, shape index: {}]   ;;  %s5788_s1 = inlined_call_operand.vmem [shape: f32[16,128], index: 1, kind: input, shape index: {}]   ;;  %s5789_s2 = inlined_call_operand.vmem [shape: bf16[2,128,384], index: 2, kind: input, shape index: {}]   ;;  %s5790_s3 = inlined_call_operand.vmem [shape: f32[2,1,384], index: 3, kind: input, shape index: {}]   ;;  %s5791_s4 = inlined_call_operand.hbm [shape: bf16[2,128,128], index: 4, kind: input, shape index: {}]   ;;  %s5792_s5 = inlined_call_operand.vmem [shape: f32[2,1,128], index: 5, kind: input, shape index: {}]   ;;  %s5793_s6 = inlined_call_operand.vmem [shape: f32[2,1,128], index: 6, kind: input, shape index: {}]   ;;  %s5794_s7 = inlined_call_operand.vmem [shape: f32[2,1,128], index: 7, kind: input, shape index: {}]   ;;  %s5795_s8 = inlined_call_operand.hbm [shape: bf16[2,128,128], index: 8, kind: input, shape index: {}]   ;;  %s5796_s9 = inlined_call_operand.vmem [shape: f32[2,1,128], index: 9, kind: input, shape index: {}]   ;;  %s5797_s10 = inlined_call_operand.vmem [shape: bf16[2,128,256], index: 10, kind: input, shape index: {}]   ;;  %s5798_s11 = inlined_call_operand.vmem [shape: f32[2,1,256], index: 11, kind: input, shape index: {}]   ;;  %s5799_s12 = inlined_call_operand.hbm [shape: bf16[2,128,128], index: 12, kind: input, shape index: {}]   ;;  %s5800_s13 = inlined_call_operand.vmem [shape: f32[2,1,128], index: 13, kind: input, shape index: {}]   ;;  %s5801_s14 = inlined_call_operand.vmem [shape: f32[2,1,128], index: 14, kind: input, shape index: {}]   ;;  %s5802_s15 = inlined_call_operand.vmem [shape: f32[2,1,128], index: 15, kind: input, shape index: {}]   ;;  %s5803_s16 = inlined_call_operand.vmem [shape: bf16[2,128,256], index: 16, kind: input, shape index: {}]   ;;  %s5804_s17 = inlined_call_operand.vmem [shape: f32[2,1,256], index: 17, kind: input, shape index: {}]   ;;  %s5805_s18 = inlined_call_operand.vmem [shape: bf16[2,256,128], index: 18, kind: input, shape index: {}]   ;;  %s5806_s19 = inlined_call_operand.vmem [shape: f32[2,1,128], index: 19, kind: input, shape index: {}]   ;;  %s5807_s20 = inlined_call_operand.vmem [shape: f32[2,1,128], index: 20, kind: input, shape index: {}]   ;;  %s5808_s21 = inlined_call_operand.vmem [shape: f32[2,1,128], index: 21, kind: input, shape index: {}]   ;;  %s5809_s22 = inlined_call_operand.hbm [shape: bf16[128,256], index: 22, kind: input, shape index: {}]   ;;  %s5810_s23 = inlined_call_operand.vmem [shape: f32[1,256], index: 23, kind: input, shape index: {}]   ;;  %s5811_s24 = inlined_call_operand.hbm [shape: f32[16,256], index: 24, kind: output, shape index: {}]  }
   0x1   :  { %5837 = sst [smem:[#allocation22_spill]] %s5787_s0 }
   0x2   :  { %5838 = sst [smem:[#allocation23_spill]] %s5788_s1 }
   0x3   :  { %5839 = sst [smem:[#allocation24_spill]] %s5789_s2 }
   0x4   :  { %5840 = sst [smem:[#allocation25_spill]] %s5790_s3 }
   0x5   :  { %5841 = sst [smem:[#allocation26_spill]] %s5791_s4 }
   0x6   :  { %5842 = sst [smem:[#allocation27_spill]] %s5792_s5 }
   0x7   :  { %5843 = sst [smem:[#allocation28_spill]] %s5793_s6 }
   0x8   :  { %5844 = sst [smem:[#allocation29_spill]] %s5794_s7 }
   0x9   :  { %5845 = sst [smem:[#allocation30_spill]] %s5795_s8 }
   0xa   :  { %5846 = sst [smem:[#allocation31_spill]] %s5797_s10 }
   0xb   :  { %5847 = sst [smem:[#allocation32_spill]] %s5798_s11 }
   0xc   :  { %5848 = sst [smem:[#allocation33_spill]] %s5799_s12 }
   0xd   :  { %5849 = sst [smem:[#allocation34_spill]] %s5800_s13 }
   0xe   :  { %5850 = sst [smem:[#allocation35_spill]] %s5801_s14 }
   0xf   :  { %5851 = sst [smem:[#allocation36_spill]] %s5802_s15 }
  0x10   :  { %5852 = sst [smem:[#allocation37_spill]] %s5803_s16 }
  0x11   :  { %5853 = sst [smem:[#allocation38_spill]] %s5804_s17 }
  0x12   :  { %5854 = sst [smem:[#allocation39_spill]] %s5805_s18 }
  0x13   :  { %5855 = sst [smem:[#allocation40_spill]] %s5806_s19 }
  0x14   :  { %5856 = sst [smem:[#allocation41_spill]] %s5807_s20 }
  0x15   :  { %5857 = sst [smem:[#allocation42_spill]] %s5808_s21 }
  0x16   :  { %5858 = sst [smem:[#allocation43_spill]] %s5809_s22 }
  0x17   :  { %5859 = sst [smem:[#allocation44_spill]] %s5810_s23 }
  0x18   :  { %5860 = sst [smem:[#allocation45_spill]] %s5811_s24 }
  0x19   :  { %29 = vsyncpa [#allocation4], 0 }
  0x1a   :  { %31 = vsyncpa [#allocation4 + $0x1], 0 }
  0x1b   :  { %32 = vsyncpa [#allocation7], 0 }
  0x1c   :  { %34 = vsyncpa [#allocation7 + $0x1], 0 }
  0x1d   :  { %35 = vsyncpa [#allocation10], 0 }
  0x1e   :  { %36 = vsyncpa [#allocation5], 0  ;;  %s4961_s5 = smov 0   ;;  %s4963_s26 = smov 0  }
  0x1f   :  { %s4965_s27 = smov 0   ;;  %s4967_s28 = smov 0  }
  0x20 LB: > { %5861 = sst [smem:[#allocation16_spill]] %s4807_s26  ;;  %s4982_s6 = sadd.s32 1, %s4815_s28   ;;  %s4815_s28 = sphi %s4967_s28, %s5926_s28   ;;  %s4811_s27 = sphi %s4965_s27, %s5929_s27   ;;  %s4807_s26 = sphi %s4963_s26, %s5928_s26   ;;  %s4803_s5 = sphi %s4961_s5, %s5927_s5  }
  0x21   : > { %5862 = sst [smem:[#allocation17_spill]] %s4811_s27  ;;  %s143_s2 = sadd.s32 1, %s4811_s27 }
  0x22   : > { %5863 = sst [smem:[#allocation18_spill]] %s4982_s6  ;;  %s140_s29 = ssub.s32 %s4815_s28, %s4982_s6 }
  0x23   : > { %p150_p0 = scmp.ne.s32.totalorder %s4811_s27, %s4807_s26  ;;  %p141_p1 = scmp.eq.s32.totalorder %s140_s29, 0 }
  0x24   : > { %p151_p2 = scmp.eq.s32.totalorder %s4815_s28, 0  ;;  %p4323_p3 = scmp.lt.s32.totalorder %s4815_s28, 2 }
  0x25   : > { %s4992_s0 = scalar_select %p141_p1, %s4811_s27, %s143_s2  }
  0x26   : > { %p152_p4 = por %p151_p2, %p150_p0  ;;  %s5816_s7 = sand.u32 1, %s4811_s27  }
  0x27   : > { %5864 = sst [smem:[#allocation19_spill]] %s4992_s0  ;;  %s4997_s30 = sshll.u32 %s5816_s7, 6 }
  0x28   : > { %s5000_s3 = sshll.u32 %s4815_s28, 10  ;;  %p5002_p5 = pnand %p4323_p3, %p152_p4 }
  0x29   : > { %s761_s8 = sand.u32 1, %s4815_s28   ;;  %s5866_s29 = sld [smem:[#allocation30_spill]] }
  0x2a   : > { %s5865_s25 = scalar_select %p5002_p5, 1, 0 }
  0x2b   : > { %s765_s7 = scalar_lea.vmem [#allocation6], %s4997_s30  ;;  %s5016_s6 = scalar_lea.sflag [#allocation7], %s761_s8 }
  0x2c   : > { %s772_s0 = sshll.u32 %s765_s7, 4  ;;  %p5022_p7 = pneg %p5002_p5  ;;  %s5014_s0 = int_to_ptr.vmem [resolvable:$true] %s772_s0 }
  0x2e   : > { %s5867_s23 = scalar_select %p5022_p7, 1, 0 }
  0x2f   : > { %s5011_s2 = scalar_lea.hbm %s5866_s29, %s5000_s3  ;;  %s4630_s21 = scalar_lea.hbm %s5866_s29, 2048 }
  0x30   : > { %s4625_s24 = scalar_lea.hbm %s5011_s2, 1024  ;;  %p4631_p10 = scmp.lt.u32.totalorder %s5011_s2, %s5866_s29 }
  0x31   : > { %p4626_p6 = scmp.ne.s32.totalorder %s5011_s2, %s4625_s24  ;;  %p4632_p11 = scmp.lt.u32.totalorder %s4630_s21, %s4625_s24 }
  0x32   : > { %p4634_p13 = scmp.lt.u32.totalorder %s4625_s24, %s5011_s2 }
  0x33   : > { %p4628_p8 = pnand %p5022_p7, %p4626_p6  ;;  %p4633_p12 = por %p4632_p11, %p4631_p10 }
  0x35   : > { %p4629_p9 = pneg %p4628_p8  ;;  %p4635_p0 = por %p4634_p13, %p4633_p12 }
  0x37   : > { %p4636_p1 = pnand %p4635_p0, %p4629_p9 }
  0x39   : > { %4639 = shalt.err (!%p4636_p1)
}
  0x3a   : > { %s4640_s8 = scalar_lea.vmem %s5014_s0, 1024  ;;  %s4817_s4 = smov [#allocation6]  }
  0x3b   : > { %p4641_p2 = scmp.ne.s32.totalorder %s5014_s0, %s4640_s8  ;;  %s4645_s1 = sshll.u32 %s4817_s4, 4  ;;  %s4646_s1 = int_to_ptr.vmem [resolvable:$false] %s4645_s1 }
  0x3c   : > { %s4647_s20 = scalar_lea.vmem %s4646_s1, 2048  ;;  %p4648_p6 = scmp.lt.s32.totalorder %s5014_s0, %s4646_s1 }
  0x3d   : > { %p4643_p3 = pnand %p4641_p2, %p5022_p7  ;;  %p4649_p8 = scmp.lt.s32.totalorder %s4647_s20, %s4640_s8 }
  0x3f   : > { %p4644_p4 = pneg %p4643_p3  ;;  %p4650_p10 = por %p4649_p8, %p4648_p6 }
  0x41   : > { %p4651_p11 = pnand %p4650_p10, %p4644_p4 }
  0x43   : > { %4654 = shalt.err (!%p4651_p11)
}
  0x44   : > { %s5820_s21 = smov 64   ;;  %s5822_s24 = smov 4  }
  0x45   : > { %4318 = dma.hbm_to_vmem [thread:$0]  (!%p5002_p5), %s5011_s2, 1024, %s5014_s0, %s5016_s6, %s5820_s21, %s5820_s21, %s5822_s24  }
  0x46   : > { %s5050_s7 = sadd.s32 4294967295, %s4815_s28   ;;  %p156_p9 = scmp.ne.s32.totalorder %s4807_s26, %s4803_s5 }
  0x47   : > { %p5825_p12 = scmp.eq.s32.totalorder %s5050_s7, 0  ;;  %p3850_p13 = scmp.ge.s32.totalorder %s4815_s28, 1 }
  0x48   : > { %p672_p0 = scmp.lt.s32.totalorder %s4815_s28, 3  ;;  %s4820_s0 = smov [#allocation9]  }
  0x49   : > { %p5060_p2 = por %p5825_p12, %p156_p9  ;;  %s690_s2 = sshll.u32 %s4820_s0, 4  ;;  %s5068_s2 = int_to_ptr.vmem [resolvable:$true] %s690_s2 }
  0x4a   : > { %p5064_p3 = pnand %p3850_p13, %p672_p0  ;;  %s5871_s20 = sld [smem:[#allocation26_spill]] }
  0x4b   : > { %s5868_s8 = scalar_select %p5060_p2, 1, 0 }
  0x4c   : > { %s5869_s4 = scalar_select %p5064_p3, 1, 0 }
  0x4d   : > { %p4308_p4 = pneg %p5064_p3  ;;  %s726_s24 = scalar_lea.vmem [#allocation3], %s4997_s30 }
  0x4e   : > { %s733_s29 = sshll.u32 %s726_s24, 4  ;;  %s5872_s22 = sld [smem:[#allocation43_spill]]  ;;  %s5085_s29 = int_to_ptr.vmem [resolvable:$true] %s733_s29 }
  0x4f   : > { %p5074_p6 = pnand %p4308_p4, %p5825_p12 }
  0x50   : > { %s5082_s21 = scalar_lea.hbm %s5871_s20, %s5000_s3 }
  0x51   : > { %p4657_p10 = pneg %p5074_p6 }
  0x54   : > { %s4655_s18 = scalar_lea.hbm %s5872_s22, 2048 }
  0x55   : > { %p4656_p8 = scmp.ne.s32.totalorder %s5872_s22, %s4655_s18  ;;  %p4662_p13 = scmp.lt.u32.totalorder %s4655_s18, %s5872_s22 }
  0x57   : > { %p4658_p11 = pnand %p4657_p10, %p4656_p8 }
  0x59   : > { %p4659_p9 = pneg %p4658_p11 }
  0x5b   : > { %p4664_p0 = pnand %p4662_p13, %p4659_p9 }
  0x5d   : > { %4667 = shalt.err (!%p4664_p0)
}
  0x5e   : > { %s4668_s24 = scalar_lea.vmem %s5068_s2, 2048  ;;  %p4676_p2 = scmp.lt.s32.totalorder %s5068_s2, %s5068_s2 }
  0x5f   : > { %p4669_p4 = scmp.ne.s32.totalorder %s5068_s2, %s4668_s24  ;;  %p4677_p3 = scmp.lt.s32.totalorder %s4668_s24, %s4668_s24 }
  0x61   : > { %p4671_p1 = pnand %p4669_p4, %p4657_p10  ;;  %p4678_p5 = por %p4677_p3, %p4676_p2 }
  0x63   : > { %p4672_p12 = pneg %p4671_p1 }
  0x65   : > { %p4679_p7 = pnand %p4678_p5, %p4672_p12 }
  0x67   : > { %4682 = shalt.err (!%p4679_p7)
}
  0x68   : > { %s4821_s16 = smov 128   ;;  %s4822_s17 = smov 8  }
  0x69   : > { %4311 = dma.hbm_to_vmem [thread:$0]  (!%p5074_p6), %s5872_s22, 2048, %s5068_s2, [#allocation10], %s4821_s16, %s4821_s16, %s4822_s17  }
  0x6a   : > { %s5873_s0 = sand.u32 1, %s4811_s27   ;;  %s4683_s1 = scalar_lea.hbm %s5082_s21, 1024 }
  0x6b   : > { %s5110_s28 = scalar_lea.sflag [#allocation4], %s5873_s0  ;;  %p4684_p5 = scmp.ne.s32.totalorder %s5082_s21, %s4683_s1 }
  0x6c   : > { %p5874_p7 = scmp.ne.s32.totalorder %s5867_s23, 0  ;;  %s4688_s14 = scalar_lea.hbm %s5871_s20, 2048 }
  0x6d   : > { %p4689_p2 = scmp.lt.u32.totalorder %s5082_s21, %s5871_s20  ;;  %p4690_p3 = scmp.lt.u32.totalorder %s4688_s14, %s4683_s1 }
  0x6e   : > { %p4686_p12 = pnand %p4684_p5, %p5874_p7  ;;  %p4692_p10 = scmp.lt.u32.totalorder %s4683_s1, %s5082_s21 }
  0x6f   : > { %p4691_p8 = por %p4690_p3, %p4689_p2 }
  0x70   : > { %p4687_p1 = pneg %p4686_p12 }
  0x71   : > { %p4693_p6 = por %p4692_p10, %p4691_p8 }
  0x73   : > { %p4694_p11 = pnand %p4693_p6, %p4687_p1 }
  0x75   : > { %4697 = shalt.err (!%p4694_p11)
}
  0x76   : > { %s4698_s2 = scalar_lea.vmem %s5085_s29, 1024  ;;  %s4823_s15 = smov [#allocation3]  }
  0x77   : > { %p4699_p9 = scmp.ne.s32.totalorder %s5085_s29, %s4698_s2  ;;  %s4703_s5 = sshll.u32 %s4823_s15, 4  ;;  %s4704_s5 = int_to_ptr.vmem [resolvable:$false] %s4703_s5 }
  0x78   : > { %s4705_s11 = scalar_lea.vmem %s4704_s5, 2048  ;;  %p4706_p4 = scmp.lt.s32.totalorder %s5085_s29, %s4704_s5 }
  0x79   : > { %p4701_p13 = pnand %p4699_p9, %p5874_p7  ;;  %p4707_p5 = scmp.lt.s32.totalorder %s4705_s11, %s4698_s2 }
  0x7b   : > { %p4702_p0 = pneg %p4701_p13  ;;  %p4708_p12 = por %p4707_p5, %p4706_p4 }
  0x7d   : > { %p4709_p2 = pnand %p4708_p12, %p4702_p0 }
  0x7f   : > { %4712 = shalt.err (!%p4709_p2)
}
  0x80   : > { %p5875_p1 = scmp.ne.s32.totalorder %s5865_s25, 0  ;;  %s5876_s13 = smov 4  }
  0x81   : > { %s5877_s14 = smov 64   ;;  %s5878_s12 = sld [smem:[#allocation33_spill]] }
  0x82   : > { %4315 = dma.hbm_to_vmem [thread:$0]  (!%p5875_p1), %s5082_s21, 1024, %s5085_s29, %s5110_s28, %s5877_s14, %s5877_s14, %s5876_s13  }
  0x83   : > { %s807_s19 = scalar_lea.vmem [#allocation8], %s4997_s30 }
  0x84   : > { %s814_s0 = sshll.u32 %s807_s19, 4  ;;  %s5144_s0 = int_to_ptr.vmem [resolvable:$true] %s814_s0 }
  0x87   : > { %s5141_s18 = scalar_lea.hbm %s5878_s12, %s5000_s3  ;;  %s4718_s21 = scalar_lea.hbm %s5878_s12, 2048 }
  0x88   : > { %s4713_s1 = scalar_lea.hbm %s5141_s18, 1024  ;;  %p4719_p6 = scmp.lt.u32.totalorder %s5141_s18, %s5878_s12 }
  0x89   : > { %p4714_p3 = scmp.ne.s32.totalorder %s5141_s18, %s4713_s1  ;;  %p4720_p11 = scmp.lt.u32.totalorder %s4718_s21, %s4713_s1 }
  0x8a   : > { %p4722_p13 = scmp.lt.u32.totalorder %s4713_s1, %s5141_s18 }
  0x8b   : > { %p4716_p8 = pnand %p4714_p3, %p5874_p7  ;;  %p4721_p9 = por %p4720_p11, %p4719_p6 }
  0x8d   : > { %p4717_p10 = pneg %p4716_p8  ;;  %p4723_p0 = por %p4722_p13, %p4721_p9 }
  0x8f   : > { %p4724_p4 = pnand %p4723_p0, %p4717_p10 }
  0x91   : > { %4727 = shalt.err (!%p4724_p4)
}
  0x92   : > { %s4728_s30 = scalar_lea.vmem %s5144_s0, 1024  ;;  %s4824_s2 = smov [#allocation8]  }
  0x93   : > { %p4729_p5 = scmp.ne.s32.totalorder %s5144_s0, %s4728_s30  ;;  %s4733_s15 = sshll.u32 %s4824_s2, 4  ;;  %s4734_s15 = int_to_ptr.vmem [resolvable:$false] %s4733_s15 }
  0x94   : > { %s4735_s5 = scalar_lea.vmem %s4734_s15, 2048  ;;  %p4736_p3 = scmp.lt.s32.totalorder %s5144_s0, %s4734_s15 }
  0x95   : > { %p4731_p12 = pnand %p4729_p5, %p5874_p7  ;;  %p4737_p8 = scmp.lt.s32.totalorder %s4735_s5, %s4728_s30 }
  0x97   : > { %p4732_p2 = pneg %p4731_p12  ;;  %p4738_p6 = por %p4737_p8, %p4736_p3 }
  0x99   : > { %p4739_p11 = pnand %p4738_p6, %p4732_p2 }
  0x9b   : > { %4742 = shalt.err (!%p4739_p11)
}
  0x9c   : > { %4321 = dma.hbm_to_vmem [thread:$0]  (!%p5875_p1), %s5141_s18, 1024, %s5144_s0, %s5016_s6, %s5877_s14, %s5877_s14, %s5876_s13  }
  0x9d   : > { %p5879_p7 = scmp.ne.s32.totalorder %s5869_s4, 0 }
  0x9f   : > { %885 = sbr.rel (%p5879_p7) target bundleno = 4976 (0x1370), region = 116 }
  0xa6   : > { %s887_s23 = sand.u32 1, %s4807_s26   ;;  %p5880_p10 = scmp.ne.s32.totalorder %s5868_s8, 0 }
  0xa7   : > { %s3863_s11 = sshll.u32 %s887_s23, 6  ;;  %s888_s16 = scalar_lea.sflag [#allocation4], %s887_s23 }
  0xa8   : > { %s5174_s17 = scalar_lea.vmem [#allocation3], %s3863_s11 }
  0xa9   : > { %4786 = dma.done.wait (%p5880_p10), %s888_s16, 1024  }
  0xaa   : > { %4788 = vsyncadd (%p5880_p10), %s888_s16, 4294966272  ;;  %s896_s25 = sand.u32 1, %s5050_s7   ;;  %s5181_s6 = scalar_lea.vmem [#allocation6], %s3863_s11 }
  0xab   : > { %s897_s19 = scalar_lea.sflag [#allocation7], %s896_s25 }
  0xac   : > { %4790 = dma.done.wait (%p5880_p10), %s897_s19, 2048  }
  0xad   : > { %4792 = vsyncadd (%p5880_p10), %s897_s19, 4294965248  ;;  %s5187_s4 = scalar_lea.vmem [#allocation8], %s3863_s11  ;;  %p5882_p1 = scmp.eq.s32.totalorder %s5050_s7, 0 }
  0xae   : > { %5881 = sst [smem:[#allocation20_spill]] %s5187_s4 }
  0xaf   : > { %4794 = dma.done.wait (%p5882_p1), [#allocation10], 2048   ;;  %p5883_p9 = pmov %p5882_p1 }
  0xb0   : > { %p1045_p13 = scmp.lt.s32.totalorder %s5050_s7, 1  ;;  %s5886_s15 = sld [smem:[#allocation24_spill]] }
  0xb1   : > { %4796 = vsyncadd (%p5883_p9), [#allocation10], 4294965248  ;;  %s5888_s18 = sld [smem:[#allocation25_spill]]  ;;  %s5889_s10 = sld [smem:[#allocation31_spill]] }
  0xb2   : > { %s5195_s13 = scalar_select %p1045_p13, %s5050_s7, 1 }
  0xb3   : > { %s5890_s11 = sld [smem:[#allocation32_spill]]  ;;  %s5899_s27 = sld [smem:[#allocation41_spill]] }
  0xb4   : > { %s4292_s8 = smul.u32 192, %s5195_s13  ;;  %s4023_s28 = sshll.u32 %s5195_s13, 7 }
  0xb5   : > { %s4293_s24 = smul.u32 3, %s5195_s13  ;;  %s3870_s3 = sshll.u32 %s5195_s13, 1 }
  0xb6   : > { %s5210_s5 = scalar_lea.vmem %s5886_s15, %s4292_s8  ;;  %s5898_s1 = sld [smem:[#allocation40_spill]] }
  0xb7   : > { %s5219_s0 = scalar_lea.vmem %s5888_s18, %s4293_s24  ;;  %s5230_s8 = scalar_lea.vmem %s5889_s10, %s4023_s28 }
  0xb8   : > { %s5894_s10 = sld [smem:[#allocation37_spill]]  ;;  %s5897_s24 = sld [smem:[#allocation39_spill]] }
  0xb9   : > { %s5235_s16 = scalar_lea.vmem %s5890_s11, %s3870_s3  ;;  %s5896_s11 = sld [smem:[#allocation38_spill]] }
  0xba   : > { %s1103_s30 = scalar_lea.vmem %s5899_s27, %s5195_s13  ;;  %s5900_s29 = sld [smem:[#allocation42_spill]] }
  0xbb   : > { %p5901_p0 = scmp.ne.s32.totalorder %s5050_s7, 0 }
  0xbc   : > { %s1100_s20 = scalar_lea.vmem %s5898_s1, %s5195_s13  ;;  %s5902_s23 = sld [smem:[#allocation22_spill]] (!%p5901_p0) }
  0xbd   : > { %1111 = sbr.rel (%p5901_p0) target bundleno = 196 (0xc4), region = 136 }
  0xbe   : > { %s5252_s26 = scalar_lea.vmem %s5894_s10, %s4023_s28  ;;  %s5262_s14 = scalar_lea.vmem %s5897_s24, %s4023_s28 }
  0xbf   : > { %5895 = sst [smem:[#allocation21_spill]] %s5252_s26  ;;  %s5257_s4 = scalar_lea.vmem %s5896_s11, %s3870_s3 }
  0xc0   : > { %s1106_s26 = scalar_lea.vmem %s5900_s29, %s5195_s13 }
  0xc2   : > { %v1112_v0 = vld [vmem:[%s5902_s23] sm:$0xff] (!%p5901_p0)  ;;  %v1113_v1 = vld [vmem:[%s5902_s23 + $0x8] sm:$0xff] (!%p5901_p0) }
  0xc3   : > { %1114 = vst [vmem:[#allocation2] sm:$0xff] (!%p5901_p0), %v1112_v0  ;;  %1115 = vst [vmem:[#allocation2 + $0x8] sm:$0xff] (!%p5901_p0), %v1113_v1 }
  0xc4 PF: > { %v4405_v2 = vld [vmem:[%s5210_s5 + $0x4] ss:$12 sps:$4 sm:$0xff]   ;;  %v4407_v3 = vld [vmem:[%s5210_s5] ss:$12 sps:$4 sm:$0xff]   ;;  %v4825_v4 = vmov 0   ;;  %v4826_v5 = vmov 0.0   ;;  %v1118_v31 = vlaneseq }
  0xc5   : > { %1363 = vmatprep.mubr.bf16.mxu0 %v4825_v4  ;;  %4116 = vmatprep.subr.bf16.mxu1 %v4826_v5  ;;  %v4408_v6 = vld [vmem:[%s5210_s5 + $0x1c] ss:$12 sps:$4 sm:$0xff]   ;;  %v4410_v7 = vld [vmem:[%s5210_s5 + $0x18] ss:$12 sps:$4 sm:$0xff]   ;;  %v4411_v8 = vld [vmem:[%s5210_s5 + $0x34] ss:$12 sps:$4 sm:$0xff]  }
  0xc6   : > { %1331 = vmatprep.subr.bf16.mxu0 %v4405_v2  ;;  %v4413_v9 = vld [vmem:[%s5210_s5 + $0x30] ss:$12 sps:$4 sm:$0xff]   ;;  %v4414_v10 = vld [vmem:[%s5210_s5 + $0x4c] ss:$12 sps:$4 sm:$0xff]   ;;  %v4416_v11 = vld [vmem:[%s5210_s5 + $0x48] ss:$12 sps:$4 sm:$0xff]  }
  0xc7   : > { %1332 = vmatpush1.bf16.msra.mxu0 %v4407_v3  ;;  %v4417_v12 = vld [vmem:[%s5210_s5 + $0x64] ss:$12 sps:$4 sm:$0xff]   ;;  %v4429_v13 = vld [vmem:[%s5210_s5 + $0x8] ss:$12 sps:$4 sm:$0xff]   ;;  %v4430_v14 = vld [vmem:[%s5210_s5 + $0x20] ss:$12 sps:$4 sm:$0xff]  }
  0xc8   : > { %1333 = vmatprep.subr.bf16.mxu0 %v4408_v6  ;;  %4117 = vmatpush3.bf16.msra.mxu1 %v4429_v13  ;;  %v4419_v15 = vld [vmem:[%s5210_s5 + $0x60] ss:$12 sps:$4 sm:$0xff]   ;;  %v4420_v16 = vld [vmem:[%s5210_s5 + $0x7c] ss:$12 sps:$4 sm:$0xff]   ;;  %v4422_v17 = vld [vmem:[%s5210_s5 + $0x78] ss:$12 sps:$4 sm:$0xff]  }
  0xc9   : > { %4118 = vmatprep.subr.bf16.mxu1 %v4826_v5  ;;  %v4423_v18 = vld [vmem:[%s5210_s5 + $0x94] ss:$12 sps:$4 sm:$0xff]   ;;  %v4431_v19 = vld [vmem:[%s5210_s5 + $0x38] ss:$12 sps:$4 sm:$0xff]   ;;  %v4432_v20 = vld [vmem:[%s5210_s5 + $0x50] ss:$12 sps:$4 sm:$0xff]  }
  0xca   : > { %v4425_v21 = vld [vmem:[%s5210_s5 + $0x90] ss:$12 sps:$4 sm:$0xff]   ;;  %v4426_v22 = vld [vmem:[%s5210_s5 + $0xac] ss:$12 sps:$4 sm:$0xff]   ;;  %v4433_v23 = vld [vmem:[%s5210_s5 + $0x68] ss:$12 sps:$4 sm:$0xff]  }
  0xcb   : > { %1334 = vmatpush1.bf16.msra.mxu0 %v4410_v7  ;;  %v4428_v24 = vld [vmem:[%s5210_s5 + $0xa8] ss:$12 sps:$4 sm:$0xff]   ;;  %v5310_v25 = vld [vmem:[#allocation2] sm:$0xff]  ;;  %v4436_v30 = vld [vmem:[%s5210_s5 + $0xb0] ss:$12 sps:$4 sm:$0xff]   ;;  %vm4827_vm0 = vmmov 0  }
  0xcc   : > { %1335 = vmatprep.subr.bf16.mxu0 %v4411_v8  ;;  %4119 = vmatpush3.bf16.msra.mxu1 %v4430_v14  ;;  %v5312_v26 = vld [vmem:[#allocation2 + $0x8] sm:$0xff]  ;;  %v4435_v29 = vld [vmem:[%s5210_s5 + $0x98] ss:$12 sps:$4 sm:$0xff]   ;;  %v1119_v32 = vshrl.u32 %v1118_v31, 7  ;;  %v1186_v34 = vld [vmem:[%s5219_s0] sm:$0x7] }
  0xcd   : > { %4120 = vmatprep.subr.bf16.mxu1 %v4826_v5  ;;  %v4434_v27 = vld [vmem:[%s5210_s5 + $0x80] ss:$12 sps:$4 sm:$0xff]   ;;  %v1153_v28 = vpack.c.bf16 %v5312_v26, %v5310_v25  ;;  %4132 = vmatprep.mubr.msk.bf16.mxu1 %vm4827_vm0, %v4826_v5  ;;  %vm1435_vm1 = vcmask 261120   ;;  %s4828_s27 = smov 96   ;;  %s4829_s5 = smov 64   ;;  %v5352_v58 = vand.u32 127, %v1118_v31 }
  0xce   : > { %v5331_v33 = vsub.s32 0, %v1119_v32  ;;  %v5334_v35 = vsub.s32 1, %v1119_v32  ;;  %s4830_s0 = smov 32   ;;  %v1198_v49 = vsub.s32 2, %v1119_v32  ;;  %v1120_v59 = vadd.s32 8, %v1119_v32  ;;  %s5905_s25 = sld [smem:[#allocation27_spill]] }
  0xcf   : > { %1336 = vmatpush1.bf16.msra.mxu0 %v4413_v9  ;;  %vm1140_vm2 = vcmp.ge.s32.totalorder %v5352_v58, 8  ;;  %vm1141_vm3 = vcmp.lt.s32.totalorder %v5352_v58, 16  ;;  %vm1130_vm4 = vcmp.lt.s32.totalorder %v5352_v58, 8  ;;  %vm1147_vm5 = vcmp.le.s32.totalorder %v5352_v58, %v1119_v32  ;;  %s5907_s18 = sld [smem:[#allocation23_spill]]  ;;  %s5908_s10 = sld [smem:[#allocation28_spill]] }
  0xd0   : > { %1337 = vmatprep.subr.bf16.mxu0 %v4414_v10  ;;  %4121 = vmatpush3.bf16.msra.mxu1 %v4431_v19  ;;  %v1191_v36 = vrot.slane %v1186_v34, %v5331_v33  ;;  %v1195_v38 = vrot.slane %v1186_v34, %v5334_v35  ;;  %v1199_v50 = vrot.slane %v1186_v34, %v1198_v49  ;;  %vm5358_vm6 = vmand %vm1140_vm2, %vm1141_vm3  ;;  %v4831_v61 = vmov -1e+30   ;;  %s5910_s15 = sld [smem:[#allocation29_spill]]  ;;  %s5913_s29 = sld [smem:[#allocation20_spill]] }
  0xd1   : > { %4122 = vmatprep.subr.bf16.mxu1 %v4826_v5  ;;  %vm1148_vm7 = vcmp.le.s32.totalorder %v5352_v58, %v1120_v59  ;;  %vm1149_vm8 = vmand %vm1130_vm4, %vm1147_vm5  ;;  %vm1483_vm10 = vcmask 130048   ;;  %vm1943_vm11 = vcmask 523264   ;;  %vm1946_vm12 = vcmask 785408   ;;  %s5917_s1 = sld [smem:[#allocation35_spill]]  ;;  %p3999_p4 = scmp.ne.s32.totalorder %s5050_s7, 1 }
  0xd2   : > { %vm1150_vm9 = vmand %vm5358_vm6, %vm1148_vm7  ;;  %v5368_v62 = vsel %vm1149_vm8, 0.0, %v4831_v61 }
  0xd3   : > { %1338 = vmatpush1.bf16.msra.mxu0 %v4416_v11  ;;  %v5371_v0 = vsel %vm1150_vm9, 0.0, %v4831_v61 }
  0xd4   : > { %1339 = vmatprep.subr.bf16.mxu0 %v4417_v12  ;;  %4123 = vmatpush3.bf16.msra.mxu1 %v4432_v20  ;;  %s5906_s19 = scalar_lea.vmem %s5905_s25, %s5195_s13  ;;  %s5915_s25 = sld [smem:[#allocation34_spill]] }
  0xd5   : > { %4124 = vmatprep.subr.bf16.mxu1 %v4826_v5 }
  0xd6   : > { %s5911_s28 = scalar_lea.vmem %s5910_s15, %s5195_s13 }
  0xd7   : > { %1340 = vmatpush1.bf16.msra.mxu0 %v4419_v15  ;;  %s5918_s22 = scalar_lea.vmem %s5917_s1, %s5195_s13 }
  0xd8   : > { %1341 = vmatprep.subr.bf16.mxu0 %v4420_v16  ;;  %4125 = vmatpush3.bf16.msra.mxu1 %v4433_v23 }
  0xd9   : > { %4126 = vmatprep.subr.bf16.mxu1 %v4826_v5 }
  0xdb   : > { %1342 = vmatpush1.bf16.msra.mxu0 %v4422_v17 }
  0xdc   : > { %1343 = vmatprep.subr.bf16.mxu0 %v4423_v18  ;;  %4127 = vmatpush3.bf16.msra.mxu1 %v4434_v27 }
  0xdd   : > { %4128 = vmatprep.subr.bf16.mxu1 %v4826_v5 }
  0xdf   : > { %1344 = vmatpush1.bf16.msra.mxu0 %v4425_v21 }
  0xe0   : > { %1345 = vmatprep.subr.bf16.mxu0 %v4426_v22  ;;  %4129 = vmatpush3.bf16.msra.mxu1 %v4435_v29 }
  0xe1   : > { %4130 = vmatprep.subr.bf16.mxu1 %v4826_v5 }
  0xe3   : > { %1346 = vmatpush1.bf16.msra.mxu0 %v4428_v24 }
  0xe4   : > { %4160 = vmatprep.subr.bf16.mxu0 %v4826_v5  ;;  %4131 = vmatpush3.bf16.msra.mxu1 %v4436_v30 }
  0xe5   : > { %4136 = vmatprep.subr.bf16.mxu1 %v4826_v5 }
  0xe6   : > { %1364 = vmatmul.mubr.bf16.vlgmr.msra.gmra.mrb[0].mxu0 %v1153_v28 }
  0xe7   : > { %4162 = vmatprep.mubr.msk.bf16.mxu0 %vm4827_vm0, %v4826_v5  ;;  %4133 = vmatmul.mubr.bf16.vlgmr.msra.gmra.mrb[0].mxu1 %v1153_v28 }
  0xe8   : > { %4138 = vmatprep.mubr.msk.bf16.mxu1 %vm4827_vm0, %v4826_v5 }
 0x1b9   : > { %v1365_v37 = vpop.f32.mrb[0].mxu0 }
 0x1ba   : > { %v1367_v39 = vpop.f32.mrb[1].mxu0  ;;  %v1366_v41 = vadd.f32 %v1365_v37, %v1191_v36  ;;  %v1408_v51 = vpop.f32.mrb[0].mxu1 }
 0x1bb   : > { %v1369_v40 = vpop.f32.mrb[2].mxu0  ;;  %v1368_v44 = vadd.f32 %v1367_v39, %v1195_v38  ;;  %v1409_v52 = vadd.f32 %v1408_v51, %v1199_v50  ;;  %v4134_v53 = vpop.f32.mrb[1].mxu1 }
 0x1bc   : > { %v1370_v42 = vadd.f32 %v1369_v40, %v1191_v36  ;;  %v1371_v43 = vpop.f32.mrb[3].mxu0  ;;  %v1411_v54 = vpop.f32.mrb[2].mxu1 }
 0x1bd   : > { %v1372_v45 = vadd.f32 %v1371_v43, %v1195_v38  ;;  %v1412_v55 = vadd.f32 %v1411_v54, %v1199_v50  ;;  %v4135_v56 = vpop.f32.mrb[3].mxu1 }
 0x1be   : > { %v1415_v46 = vpack.c.bf16 %v1370_v42, %v1366_v41 }
 0x1bf   : > { %v1416_v47 = vpack.c.bf16 %v1372_v45, %v1368_v44  ;;  %v5348_v57 = vpack.c.bf16 %v1412_v55, %v1409_v52 }
 0x1c1   : > { %1555 = vrot.lane.b32.xlu1 %v1416_v47, %s4828_s27  ;;  %v1440_v48 = vsel %vm1435_vm1, %v1416_v47, 0 }
 0x1c2   : > { %4137 = vmatpush3.bf16.xpose.msra.mxu1 %v1440_v48 }
 0x1c3   : > { %4142 = vmatprep.subr.bf16.mxu1 %v4826_v5 }
 0x1c5   : > { %1552 = vrot.lane.b32.xlu1 %v1415_v46, %s4828_s27 }
 0x1c9   : > { %1675 = vrot.lane.b32.xlu1 %v1415_v46, %s4829_s5  ;;  %4139 = vmatmul.mubr.msk.bf16.vlgmr.msra.gmra.mrb[4].mxu1 %vm1435_vm1, %v1415_v46 }
 0x1ca   : > { %4144 = vmatprep.mubr.msk.bf16.mxu1 %vm4827_vm0, %v4826_v5  ;;  %4143 = vmatpush3.bf16.msra.mxu1 %v5348_v57 }
 0x1cb   : > { %4148 = vmatprep.subr.bf16.mxu1 %v4826_v5 }
 0x1cd   : > { %1798 = vrot.lane.b32.xlu1 %v1416_v47, %s4830_s0 }
 0x1d1   : > { %1796 = vrot.lane.b32.xlu1 %v1415_v46, %s4830_s0 }
 0x233   : > { %v1556_v10 = vpop.permute.xlu1 %1555 }
 0x234   : > { %v1561_v28 = vsel %vm1435_vm1, %v1556_v10, 0 }
 0x237   : > { %v1553_v13 = vpop.permute.xlu1 %1552 }
 0x23b   : > { %v1676_v18 = vpop.permute.xlu1 %1675 }
 0x23f   : > { %v1799_v21 = vpop.permute.xlu1 %1798 }
 0x240   : > { %v1804_v22 = vsel %vm1435_vm1, %v1799_v21, 0 }
 0x243   : > { %v1797_v29 = vpop.permute.xlu1 %1796 }
 0x29c   : > { %v1476_v63 = vpop.f32.mrb[4].mxu1 }
 0x29d   : > { %v1477_v1 = vadd.f32 %v1476_v63, %v5368_v62  ;;  %v4140_v2 = vpop.f32.mrb[5].mxu1 }
 0x29e   : > { %v1479_v3 = vpop.f32.mrb[6].mxu1 }
 0x29f   : > { %v1480_v6 = vadd.f32 %v1479_v3, %v5371_v0  ;;  %v4141_v7 = vpop.f32.mrb[7].mxu1  ;;  %v1484_v8 = vsel %vm1483_vm10, %v1477_v1, -inf }
 0x2a0   : > { %1485 = vmax.xlane.f32.xlu0 %v1484_v8 }
 0x2a1   : > { %v1487_v9 = vsel %vm1483_vm10, %v1480_v6, -inf }
 0x2a4   : > { %1488 = vmax.xlane.f32.xlu0 %v1487_v9 }
 0x2ba   : > { %1677 = vrot.lane.b32.xlu0 %v1416_v47, %s4829_s5 }
 0x32d   : > { %v1486_v11 = vpop.xlane.xlu0 %1485 }
 0x32e   : > { %v1490_v12 = vsub.f32 %v1477_v1, %v1486_v11 }
 0x330   : > { %v1492_v14 = vmul.f32 1.442695, %v1490_v12 }
 0x331   : > { %v1489_v15 = vpop.xlane.xlu0 %1488 }
 0x332   : > { %v1491_v16 = vsub.f32 %v1480_v6, %v1489_v15  ;;  %4525 = vpow2.f32 %v1492_v14 }
 0x334   : > { %v1494_v17 = vmul.f32 1.442695, %v1491_v16 }
 0x335   : > { %v1678_v19 = vpop.permute.xlu0 %1677 }
 0x336   : > { %4527 = vpow2.f32 %v1494_v17  ;;  %v1683_v20 = vsel %vm1435_vm1, %v1678_v19, 0 }
 0x337   : > { %4161 = vmatpush3.bf16.xpose.msra.mxu0 %v1683_v20 }
 0x338   : > { %4172 = vmatprep.subr.bf16.mxu0 %v4826_v5 }
 0x33c   : > { %v5382_v23 = vpop.eup %4525 }
 0x33e   : > { %4163 = vmatmul.mubr.msk.bf16.vlgmr.msra.gmra.mrb[4].mxu0 %vm1435_vm1, %v1676_v18 }
 0x33f   : > { %4173 = vmatpush3.bf16.xpose.msra.mxu0 %v1804_v22  ;;  %4174 = vmatprep.mubr.msk.bf16.mxu0 %vm4827_vm0, %v4826_v5 }
 0x340   : > { %v5386_v24 = vpop.eup %4527  ;;  %4184 = vmatprep.subr.bf16.mxu0 %v4826_v5 }
 0x341   : > { %v1502_v27 = vpack.c.bf16 %v5386_v24, %v5382_v23 }
 0x343   : > { %4145 = vmatmul.mubr.msk.bf16.vlgmr.msra.gmra.mrb[8].mxu1 %vm1483_vm10, %v1502_v27 }
 0x344   : > { %4149 = vmatpush3.bf16.xpose.msra.mxu1 %v1561_v28  ;;  %4150 = vmatprep.mubr.msk.bf16.mxu1 %vm4827_vm0, %v4826_v5 }
 0x345   : > { %4154 = vmatprep.subr.bf16.mxu1 %v4826_v5 }
 0x346   : > { %4175 = vmatmul.mubr.msk.bf16.vlgmr.msra.gmra.mrb[8].mxu0 %vm1435_vm1, %v1797_v29 }
 0x347   : > { %4200 = vmatprep.mubr.msk.bf16.mxu0 %vm4827_vm0, %v4826_v5 }
 0x34b   : > { %4151 = vmatmul.mubr.msk.bf16.vlgmr.msra.gmra.mrb[12].mxu1 %vm1435_vm1, %v1553_v13 }
 0x34c   : > { %4156 = vmatprep.mubr.msk.bf16.mxu1 %vm4827_vm0, %v4826_v5 }
 0x411   : > { %v1719_v30 = vpop.f32.mrb[4].mxu0 }
 0x412   : > { %v1720_v31 = vadd.f32 %v1719_v30, %v5368_v62  ;;  %v4164_v32 = vpop.f32.mrb[5].mxu0 }
 0x413   : > { %v1722_v34 = vpop.f32.mrb[6].mxu0 }
 0x414   : > { %v1723_v36 = vadd.f32 %v1722_v34, %v5371_v0  ;;  %v4165_v37 = vpop.f32.mrb[7].mxu0  ;;  %v1726_v38 = vsel %vm1483_vm10, %v1720_v31, -inf }
 0x415   : > { %1727 = vmax.xlane.f32.xlu1 %v1726_v38 }
 0x416   : > { %v5405_v39 = vpop.f32.mrb[8].mxu1  ;;  %v1729_v42 = vsel %vm1483_vm10, %v1723_v36, -inf }
 0x417   : > { %v4146_v40 = vpop.f32.mrb[9].mxu1 }
 0x418   : > { %v5407_v41 = vpop.f32.mrb[10].mxu1 }
 0x419   : > { %1730 = vmax.xlane.f32.xlu1 %v1729_v42  ;;  %v4147_v43 = vpop.f32.mrb[11].mxu1  ;;  %v1840_v44 = vpop.f32.mrb[8].mxu0  ;;  %v1499_v42 = vsel %vm1483_vm10, %v5386_v24, 0.0  ;;  %v4438_v24 = vld [vmem:[%s5174_s17 + $0x8] sm:$0xff]  }
 0x41a   : > { %v1841_v45 = vadd.f32 %v1840_v44, %v5368_v62  ;;  %v4176_v46 = vpop.f32.mrb[9].mxu0  ;;  %v1496_v43 = vsel %vm1483_vm10, %v5382_v23, 0.0  ;;  %v4437_v23 = vld [vmem:[%s5174_s17] sm:$0xff]  }
 0x41b   : > { %v1843_v47 = vpop.f32.mrb[10].mxu0  ;;  %4185 = vmatpush3.bf16.msra.mxu0 %v4437_v23 }
 0x41c   : > { %v1844_v48 = vadd.f32 %v1843_v47, %v5371_v0  ;;  %v4177_v49 = vpop.f32.mrb[11].mxu0  ;;  %v1847_v50 = vsel %vm1483_vm10, %v1841_v45, -inf  ;;  %4186 = vmatprep.subr.bf16.mxu0 %v4826_v5  ;;  %v4439_v47 = vld [vmem:[%s5174_s17 + $0x10] sm:$0xff]  }
 0x41d   : > { %1848 = vmax.xlane.f32.xlu0 %v1847_v50 }
 0x41e   : > { %v1597_v51 = vpop.f32.mrb[12].mxu1  ;;  %v1850_v52 = vsel %vm1483_vm10, %v1844_v48, -inf }
 0x41f   : > { %v1598_v53 = vadd.f32 %v1597_v51, %v5368_v62  ;;  %1851 = vmax.xlane.f32.xlu1 %v1850_v52  ;;  %v4152_v54 = vpop.f32.mrb[13].mxu1  ;;  %4187 = vmatpush3.bf16.msra.mxu0 %v4438_v24  ;;  %v4440_v52 = vld [vmem:[%s5174_s17 + $0x18] sm:$0xff]  }
 0x420   : > { %v1600_v55 = vpop.f32.mrb[14].mxu1  ;;  %4188 = vmatprep.subr.bf16.mxu0 %v4826_v5 }
 0x421   : > { %v1601_v56 = vadd.f32 %v1600_v55, %v5371_v0  ;;  %v4153_v59 = vpop.f32.mrb[15].mxu1  ;;  %v1604_v63 = vsel %vm1483_vm10, %v1598_v53, -inf }
 0x423   : > { %1605 = vmax.xlane.f32.xlu1 %v1604_v63  ;;  %v1607_v1 = vsel %vm1483_vm10, %v1601_v56, -inf  ;;  %4189 = vmatpush3.bf16.msra.mxu0 %v4439_v47 }
 0x424   : > { %1608 = vmax.xlane.f32.xlu0 %v1607_v1  ;;  %4190 = vmatprep.subr.bf16.mxu0 %v4826_v5 }
 0x427   : > { %4191 = vmatpush3.bf16.msra.mxu0 %v4440_v52 }
 0x428   : > { %4192 = vmatprep.subr.bf16.mxu0 %v4826_v5 }
 0x434   : > { %1745 = vrot.lane.b32.xlu1 %v5348_v57, %s4829_s5 }
 0x438   : > { %1866 = vrot.lane.b32.xlu1 %v5348_v57, %s4830_s0 }
 0x43a   : > { %1624 = vrot.lane.b32.xlu0 %v5348_v57, %s4828_s27 }
 0x4a2   : > { %v1728_v62 = vpop.xlane.xlu1 %1727 }
 0x4a3   : > { %v1732_v2 = vsub.f32 %v1720_v31, %v1728_v62 }
 0x4a5   : > { %v1734_v3 = vmul.f32 1.442695, %v1732_v2 }
 0x4a6   : > { %v1731_v0 = vpop.xlane.xlu1 %1730 }
 0x4a7   : > { %4529 = vpow2.f32 %v1734_v3  ;;  %v1733_v6 = vsub.f32 %v1723_v36, %v1731_v0  ;;  %v4442_v3 = vld [vmem:[%s5174_s17 + $0x28] sm:$0xff]  }
 0x4a9   : > { %v1736_v7 = vmul.f32 1.442695, %v1733_v6 }
 0x4aa   : > { %v1849_v9 = vpop.xlane.xlu0 %1848 }
 0x4ab   : > { %4531 = vpow2.f32 %v1736_v7  ;;  %v1853_v11 = vsub.f32 %v1841_v45, %v1849_v9 }
 0x4ac   : > { %v1852_v8 = vpop.xlane.xlu1 %1851 }
 0x4ad   : > { %v1854_v10 = vsub.f32 %v1844_v48, %v1852_v8  ;;  %v1855_v19 = vmul.f32 1.442695, %v1853_v11  ;;  %v4443_v8 = vld [vmem:[%s5174_s17 + $0x30] sm:$0xff]  }
 0x4af   : > { %v1857_v57 = vmul.f32 1.442695, %v1854_v10 }
 0x4b0   : > { %v1606_v12 = vpop.xlane.xlu1 %1605 }
 0x4b1   : > { %v4530_v13 = vpop.eup %4529  ;;  %v1610_v14 = vsub.f32 %v1598_v53, %v1606_v12  ;;  %v1609_v15 = vpop.xlane.xlu0 %1608  ;;  %v4441_v53 = vld [vmem:[%s5174_s17 + $0x20] sm:$0xff]  }
 0x4b2   : > { %v1611_v16 = vsub.f32 %v1601_v56, %v1609_v15  ;;  %v1738_v17 = vsel %vm1483_vm10, %v4530_v13, 0.0  ;;  %4193 = vmatpush3.bf16.msra.mxu0 %v4441_v53  ;;  %v3909_v53 = vld [vmem:[%s5906_s19] ss:$0 sm:$0xff]  ;;  %s5916_s19 = scalar_lea.vmem %s5915_s25, %s5195_s13 }
 0x4b3   : > { %v1612_v18 = vmul.f32 1.442695, %v1610_v14  ;;  %1739 = vadd.xlane.f32.xlu0 %v1738_v17  ;;  %4194 = vmatprep.subr.bf16.mxu0 %v4826_v5  ;;  %v4444_v17 = vld [vmem:[%s5174_s17 + $0x38] sm:$0xff]   ;;  %s5912_s17 = scalar_lea.vmem %s5796_s9, %s5195_s13 }
 0x4b4   : > { %v1614_v20 = vmul.f32 1.442695, %v1611_v16  ;;  %v1746_v37 = vpop.permute.xlu1 %1745 }
 0x4b5   : > { %v4532_v21 = vpop.eup %4531  ;;  %4533 = vpow2.f32 %v1612_v18  ;;  %v1625_v22 = vpop.permute.xlu0 %1624 }
 0x4b6   : > { %4535 = vpow2.f32 %v1614_v20  ;;  %4155 = vmatpush3.bf16.msra.mxu1 %v1625_v22  ;;  %v1741_v27 = vsel %vm1483_vm10, %v4532_v21, 0.0  ;;  %v1744_v44 = vpack.c.bf16 %v4532_v21, %v4530_v13  ;;  %4195 = vmatpush3.bf16.msra.mxu0 %v4442_v3  ;;  %v4445_v3 = vld [vmem:[%s5230_s8] ss:$8 sps:$4 sm:$0xff]  }
 0x4b7   : > { %4537 = vpow2.f32 %v1857_v57  ;;  %1742 = vadd.xlane.f32.xlu0 %v1741_v27  ;;  %4166 = vmatprep.subr.bf16.mxu1 %v4826_v5 }
 0x4b8   : > { %4539 = vpow2.f32 %v1855_v19  ;;  %v1867_v45 = vpop.permute.xlu1 %1866  ;;  %4196 = vmatprep.subr.bf16.mxu0 %v4826_v5 }
 0x4ba   : > { %4197 = vmatpush3.bf16.msra.mxu0 %v4443_v8  ;;  %v4448_v8 = vld [vmem:[%s5230_s8 + $0x10] ss:$8 sps:$4 sm:$0xff]  }
 0x4bb   : > { %4198 = vmatprep.subr.bf16.mxu0 %v4826_v5 }
 0x4be   : > { %4199 = vmatpush3.bf16.msra.mxu0 %v4444_v17 }
 0x4bf   : > { %v4534_v28 = vpop.eup %4533 }
 0x4c0   : > { %v4536_v29 = vpop.eup %4535  ;;  %v1616_v30 = vsel %vm1483_vm10, %v4534_v28, 0.0 }
 0x4c1   : > { %v4538_v31 = vpop.eup %4537  ;;  %1617 = vadd.xlane.f32.xlu0 %v1616_v30  ;;  %v1619_v32 = vsel %vm1483_vm10, %v4536_v29, 0.0  ;;  %v1622_v34 = vpack.c.bf16 %v4536_v29, %v4534_v28 }
 0x4c2   : > { %v4540_v36 = vpop.eup %4539  ;;  %1620 = vadd.xlane.f32.xlu1 %v1619_v32  ;;  %v1862_v38 = vsel %vm1483_vm10, %v4538_v31, 0.0 }
 0x4c3   : > { %4157 = vmatmul.mubr.msk.bf16.vlgmr.msra.gmra.mrb[16].mxu1 %vm1483_vm10, %v1622_v34  ;;  %v1859_v40 = vsel %vm1483_vm10, %v4540_v36, 0.0  ;;  %v1865_v46 = vpack.c.bf16 %v4538_v31, %v4540_v36 }
 0x4c4   : > { %4167 = vmatpush3.bf16.msra.mxu1 %v1746_v37  ;;  %4168 = vmatprep.mubr.msk.bf16.mxu1 %vm4827_vm0, %v4826_v5 }
 0x4c5   : > { %1863 = vadd.xlane.f32.xlu0 %v1862_v38  ;;  %4178 = vmatprep.subr.bf16.mxu1 %v4826_v5 }
 0x4c6   : > { %1860 = vadd.xlane.f32.xlu1 %v1859_v40 }
 0x4c9   : > { %1500 = vadd.xlane.f32.xlu0 %v1499_v42 }
 0x4ca   : > { %1497 = vadd.xlane.f32.xlu1 %v1496_v43 }
 0x4cb   : > { %4169 = vmatmul.mubr.msk.bf16.vlgmr.msra.gmra.mrb[20].mxu1 %vm1483_vm10, %v1744_v44 }
 0x4cc   : > { %4179 = vmatpush3.bf16.msra.mxu1 %v1867_v45  ;;  %4180 = vmatprep.mubr.msk.bf16.mxu1 %vm4827_vm0, %v4826_v5 }
 0x4cd   : > { %4204 = vmatprep.subr.bf16.mxu1 %v4826_v5 }
 0x4d3   : > { %4181 = vmatmul.mubr.msk.bf16.vlgmr.msra.gmra.mrb[24].mxu1 %vm1483_vm10, %v1865_v46 }
 0x4d4   : > { %4220 = vmatprep.mubr.msk.bf16.mxu1 %vm4827_vm0, %v4826_v5 }
 0x540   : > { %v1740_v48 = vpop.xlane.xlu0 %1739 }
 0x544   : > { %v1743_v49 = vpop.xlane.xlu0 %1742 }
 0x54e   : > { %v1618_v50 = vpop.xlane.xlu0 %1617 }
 0x54f   : > { %v1621_v51 = vpop.xlane.xlu1 %1620  ;;  %4541 = vrcp.f32 %v1618_v50 }
 0x550   : > { %4543 = vrcp.f32 %v1621_v51 }
 0x551   : > { %4545 = vrcp.f32 %v1740_v48 }
 0x552   : > { %4547 = vrcp.f32 %v1743_v49  ;;  %v1864_v0 = vpop.xlane.xlu0 %1863 }
 0x553   : > { %v1861_v6 = vpop.xlane.xlu1 %1860  ;;  %4549 = vrcp.f32 %v1864_v0  ;;  %v4447_v0 = vld [vmem:[%s5230_s8 + $0x4] ss:$8 sps:$4 sm:$0xff]  }
 0x554   : > { %4551 = vrcp.f32 %v1861_v6  ;;  %v4450_v6 = vld [vmem:[%s5230_s8 + $0x14] ss:$8 sps:$4 sm:$0xff]   ;;  %2315 = vmatprep.subr.bf16.mxu0 %v4447_v0 }
 0x556   : > { %v1501_v31 = vpop.xlane.xlu0 %1500 }
 0x557   : > { %v1498_v32 = vpop.xlane.xlu1 %1497  ;;  %4553 = vrcp.f32 %v1501_v31  ;;  %v4470_v31 = vld [vmem:[%s5181_s6 + $0x20] sm:$0xff]  }
 0x558   : > { %4555 = vrcp.f32 %v1498_v32  ;;  %v4473_v32 = vld [vmem:[%s5230_s8 + $0x74] ss:$8 sps:$4 sm:$0xff]  }
 0x559   : > { %v4542_v55 = vpop.eup %4541 }
 0x55a   : > { %v4544_v59 = vpop.eup %4543 }
 0x55b   : > { %v4546_v10 = vpop.eup %4545 }
 0x55c   : > { %v4548_v12 = vpop.eup %4547 }
 0x55d   : > { %v4550_v19 = vpop.eup %4549 }
 0x55e   : > { %v4552_v21 = vpop.eup %4551 }
 0x561   : > { %v4554_v36 = vpop.eup %4553 }
 0x562   : > { %v4556_v38 = vpop.eup %4555  ;;  %v1550_v46 = vmul.f32 %v4554_v36, %v5407_v41  ;;  %v2204_v36 = vld [vmem:[%s5907_s18] sm:$0xff] }
 0x563   : > { %v1549_v45 = vmul.f32 %v4556_v38, %v5405_v39  ;;  %v4474_v38 = vld [vmem:[%s5181_s6 + $0x28] sm:$0xff]  }
 0x596   : > { %v1664_v54 = vpop.f32.mrb[16].mxu1 }
 0x597   : > { %v4158_v56 = vpop.f32.mrb[17].mxu1  ;;  %v1673_v1 = vmul.f32 %v4542_v55, %v1664_v54 }
 0x598   : > { %v1667_v63 = vpop.f32.mrb[18].mxu1 }
 0x599   : > { %v1674_v62 = vmul.f32 %v4544_v59, %v1667_v63  ;;  %v4159_v2 = vpop.f32.mrb[19].mxu1 }
 0x59b   : > { %v4375_v7 = vpack.i.bf16 %v1674_v62, %v1673_v1 }
 0x59d   : > { %4376 = vrot.lane.b32.xlu1 %v4375_v7, %s4830_s0  ;;  %v4454_v7 = vld [vmem:[%s5181_s6] sm:$0xff]  }
 0x59e   : > { %v1785_v9 = vpop.f32.mrb[20].mxu1  ;;  %4205 = vmatpush3.bf16.msra.mxu1 %v4454_v7 }
 0x59f   : > { %v4170_v11 = vpop.f32.mrb[21].mxu1  ;;  %v1794_v14 = vmul.f32 %v4546_v10, %v1785_v9  ;;  %v4453_v9 = vld [vmem:[%s5230_s8 + $0x24] ss:$8 sps:$4 sm:$0xff]   ;;  %4206 = vmatprep.subr.bf16.mxu1 %v4826_v5  ;;  %v4457_v10 = vld [vmem:[%s5230_s8 + $0x34] ss:$8 sps:$4 sm:$0xff]  }
 0x5a0   : > { %v1788_v13 = vpop.f32.mrb[22].mxu1  ;;  %v4455_v11 = vld [vmem:[%s5230_s8 + $0x30] ss:$8 sps:$4 sm:$0xff]  }
 0x5a1   : > { %v1795_v15 = vmul.f32 %v4548_v12, %v1788_v13  ;;  %v4171_v16 = vpop.f32.mrb[23].mxu1  ;;  %v4461_v12 = vld [vmem:[%s5230_s8 + $0x44] ss:$8 sps:$4 sm:$0xff]   ;;  %v4459_v13 = vld [vmem:[%s5230_s8 + $0x40] ss:$8 sps:$4 sm:$0xff]  }
 0x5a3   : > { %v4380_v57 = vpack.i.bf16 %v1795_v15, %v1794_v14 }
 0x5a5   : > { %4381 = vrot.lane.b32.xlu0 %v4380_v57, %s4829_s5 }
 0x5a6   : > { %v1906_v18 = vpop.f32.mrb[24].mxu1 }
 0x5a7   : > { %v4182_v20 = vpop.f32.mrb[25].mxu1  ;;  %v1915_v27 = vmul.f32 %v4552_v21, %v1906_v18  ;;  %v4462_v21 = vld [vmem:[%s5181_s6 + $0x10] sm:$0xff]  }
 0x5a8   : > { %v1909_v22 = vpop.f32.mrb[26].mxu1 }
 0x5a9   : > { %v1916_v28 = vmul.f32 %v4550_v19, %v1909_v22  ;;  %v4183_v29 = vpop.f32.mrb[27].mxu1  ;;  %v4465_v22 = vld [vmem:[%s5230_s8 + $0x54] ss:$8 sps:$4 sm:$0xff]  }
 0x5aa   : > { %v4469_v29 = vld [vmem:[%s5230_s8 + $0x64] ss:$8 sps:$4 sm:$0xff]  }
 0x5ab   : > { %v4385_v30 = vpack.i.bf16 %v1916_v28, %v1915_v27  ;;  %v4463_v27 = vld [vmem:[%s5230_s8 + $0x50] ss:$8 sps:$4 sm:$0xff]   ;;  %v4466_v28 = vld [vmem:[%s5181_s6 + $0x18] sm:$0xff]  }
 0x5ad   : > { %4386 = vrot.lane.b32.xlu1 %v4385_v30, %s4828_s27  ;;  %v4467_v30 = vld [vmem:[%s5230_s8 + $0x60] ss:$8 sps:$4 sm:$0xff]  }
 0x60f   : > { %v4377_v34 = vpop.permute.xlu1 %4376 }
 0x610   : > { %v4379_v40 = vunpack.i.h.bf16 %v4377_v34  ;;  %v4378_v42 = vunpack.i.l.bf16 %v4377_v34  ;;  %v4471_v34 = vld [vmem:[%s5230_s8 + $0x70] ss:$8 sps:$4 sm:$0xff]  }
 0x612   : > { %v1942_v24 = vsel %vm1435_vm1, %v1550_v46, %v4379_v40  ;;  %v1941_v47 = vsel %vm1435_vm1, %v1549_v45, %v4378_v42  ;;  %v4475_v42 = vld [vmem:[%s5181_s6 + $0x30] sm:$0xff]  }
 0x617   : > { %v4382_v37 = vpop.permute.xlu0 %4381 }
 0x618   : > { %v4384_v43 = vunpack.i.h.bf16 %v4382_v37  ;;  %v4383_v44 = vunpack.i.l.bf16 %v4382_v37  ;;  %v2205_v37 = vld [vmem:[%s5907_s18 + $0x8] sm:$0xff] }
 0x619   : > { %v2206_v40 = vpack.c.bf16 %v2205_v37, %v2204_v36 }
 0x61a   : > { %v1945_v50 = vsel %vm1943_vm11, %v1942_v24, %v4384_v43  ;;  %v1944_v51 = vsel %vm1943_vm11, %v1941_v47, %v4383_v44  ;;  %v4476_v43 = vld [vmem:[%s5181_s6 + $0x38] sm:$0xff]  }
 0x61f   : > { %v4387_v23 = vpop.permute.xlu1 %4386 }
 0x620   : > { %v4389_v48 = vunpack.i.h.bf16 %v4387_v23  ;;  %v4388_v49 = vunpack.i.l.bf16 %v4387_v23 }
 0x622   : > { %v1948_v52 = vsel %vm1946_vm12, %v1945_v50, %v4389_v48  ;;  %v1947_v39 = vsel %vm1946_vm12, %v1944_v51, %v4388_v49 }
 0x623   : > { %v1949_v41 = vpack.c.bf16 %v1948_v52, %v1947_v39 }
 0x625   : > { %4201 = vmatmul.mubr.bf16.vlgmr.msra.gmra.mrb[12].mxu0 %v1949_v41  ;;  %v3919_v41 = vld [vmem:[%s5911_s28] ss:$0 sm:$0xff] }
 0x626   : > { %2347 = vmatprep.mubr.bf16.mxu0 %v4825_v4  ;;  %2316 = vmatpush1.bf16.msra.mxu0 %v4445_v3 }
 0x627   : > { %2317 = vmatprep.subr.bf16.mxu0 %v4450_v6 }
 0x62a   : > { %2318 = vmatpush1.bf16.msra.mxu0 %v4448_v8 }
 0x62b   : > { %2319 = vmatprep.subr.bf16.mxu0 %v4453_v9 }
 0x6f8   : > { %v2038_v54 = vpop.f32.mrb[12].mxu0 }
 0x6f9   : > { %v2039_v55 = vadd.f32 %v3909_v53, %v2038_v54  ;;  %v4202_v56 = vpop.f32.mrb[13].mxu0 }
 0x6fa   : > { %v2041_v59 = vpop.f32.mrb[14].mxu0 }
 0x6fb   : > { %v2042_v63 = vadd.f32 %v3909_v53, %v2041_v59  ;;  %v4203_v1 = vpop.f32.mrb[15].mxu0  ;;  %v2045_v62 = vadd.f32 %v2039_v55, %v5310_v25  ;;  %v4458_v25 = vld [vmem:[%s5181_s6 + $0x8] sm:$0xff]   ;;  %s5909_s6 = scalar_lea.vmem %s5908_s10, %s5195_s13  ;;  %v2223_v59 = vld [vmem:[%s5235_s16] sm:$0x3]  ;;  %s5919_s10 = sld [smem:[#allocation36_spill]] }
 0x6fc   : > { %4207 = vmatpush3.bf16.msra.mxu1 %v4458_v25  ;;  %v3918_v49 = vld [vmem:[%s5909_s6] ss:$0 sm:$0xff]  ;;  %v2232_v1 = vrot.slane %v2223_v59, %v5334_v35 }
 0x6fd   : > { %2049 = vadd.xlane.f32.xlu1 %v2045_v62  ;;  %v2046_v2 = vadd.f32 %v2042_v63, %v5312_v26  ;;  %v4451_v26 = vld [vmem:[%s5230_s8 + $0x20] ss:$8 sps:$4 sm:$0xff]   ;;  %4208 = vmatprep.subr.bf16.mxu1 %v4826_v5  ;;  %v2228_v63 = vrot.slane %v2223_v59, %v5331_v33 }
 0x6fe   : > { %2320 = vmatpush1.bf16.msra.mxu0 %v4451_v26 }
 0x6ff   : > { %2051 = vadd.xlane.f32.xlu0 %v2046_v2  ;;  %2321 = vmatprep.subr.bf16.mxu0 %v4457_v10 }
 0x700   : > { %4209 = vmatpush3.bf16.msra.mxu1 %v4462_v21 }
 0x701   : > { %4210 = vmatprep.subr.bf16.mxu1 %v4826_v5  ;;  %s5920_s6 = scalar_lea.vmem %s5919_s10, %s5195_s13 }
 0x702   : > { %2322 = vmatpush1.bf16.msra.mxu0 %v4455_v11  ;;  %v3920_v11 = vld [vmem:[%s5912_s17] ss:$0 sm:$0xff] }
 0x703   : > { %2323 = vmatprep.subr.bf16.mxu0 %v4461_v12 }
 0x704   : > { %4211 = vmatpush3.bf16.msra.mxu1 %v4466_v28 }
 0x705   : > { %4212 = vmatprep.subr.bf16.mxu1 %v4826_v5 }
 0x706   : > { %2324 = vmatpush1.bf16.msra.mxu0 %v4459_v13 }
 0x707   : > { %2325 = vmatprep.subr.bf16.mxu0 %v4465_v22 }
 0x708   : > { %4213 = vmatpush3.bf16.msra.mxu1 %v4470_v31 }
 0x709   : > { %4214 = vmatprep.subr.bf16.mxu1 %v4826_v5 }
 0x70a   : > { %2326 = vmatpush1.bf16.msra.mxu0 %v4463_v27 }
 0x70b   : > { %2327 = vmatprep.subr.bf16.mxu0 %v4469_v29 }
 0x70c   : > { %4215 = vmatpush3.bf16.msra.mxu1 %v4474_v38 }
 0x70d   : > { %4216 = vmatprep.subr.bf16.mxu1 %v4826_v5 }
 0x70e   : > { %2328 = vmatpush1.bf16.msra.mxu0 %v4467_v30 }
 0x70f   : > { %2329 = vmatprep.subr.bf16.mxu0 %v4473_v32 }
 0x710   : > { %4217 = vmatpush3.bf16.msra.mxu1 %v4475_v42 }
 0x711   : > { %4218 = vmatprep.subr.bf16.mxu1 %v4826_v5 }
 0x712   : > { %2330 = vmatpush1.bf16.msra.mxu0 %v4471_v34 }
 0x713   : > { %4248 = vmatprep.subr.bf16.mxu0 %v4826_v5 }
 0x714   : > { %4219 = vmatpush3.bf16.msra.mxu1 %v4476_v43 }
 0x715   : > { %2348 = vmatmul.mubr.bf16.vlgmr.msra.gmra.mrb[16].mxu0 %v2206_v40  ;;  %4224 = vmatprep.subr.bf16.mxu1 %v4826_v5 }
 0x716   : > { %4250 = vmatprep.mubr.msk.bf16.mxu0 %vm4827_vm0, %v4826_v5 }
 0x78a   : > { %v2050_v14 = vpop.xlane.xlu1 %2049 }
 0x78b   : > { %v2054_v15 = vmul.f32 0.0078125, %v2050_v14 }
 0x78c   : > { %v2052_v16 = vpop.xlane.xlu0 %2051 }
 0x78d   : > { %v2056_v17 = vsub.f32 %v2045_v62, %v2054_v15  ;;  %v2055_v57 = vmul.f32 0.0078125, %v2052_v16 }
 0x78f   : > { %v2057_v18 = vsub.f32 %v2046_v2, %v2055_v57  ;;  %v2058_v19 = vmul.f32 %v2056_v17, %v2056_v17 }
 0x791   : > { %2060 = vadd.xlane.f32.xlu0 %v2058_v19  ;;  %v2059_v20 = vmul.f32 %v2057_v18, %v2057_v18 }
 0x793   : > { %2062 = vadd.xlane.f32.xlu1 %v2059_v20  ;;  %v5564_v20 = vsel %vm5358_vm6, 0.0, %v4831_v61 }
 0x7e8   : > { %v2349_v62 = vpop.f32.mrb[16].mxu0 }
 0x7e9   : > { %v2350_v2 = vadd.f32 %v2349_v62, %v2228_v63  ;;  %v2351_v3 = vpop.f32.mrb[17].mxu0 }
 0x7ea   : > { %v2352_v0 = vadd.f32 %v2351_v3, %v2232_v1  ;;  %v2353_v6 = vpop.f32.mrb[18].mxu0 }
 0x7eb   : > { %v2354_v7 = vadd.f32 %v2353_v6, %v2228_v63  ;;  %v2355_v8 = vpop.f32.mrb[19].mxu0 }
 0x7ec   : > { %v2356_v9 = vadd.f32 %v2355_v8, %v2232_v1 }
 0x7ed   : > { %v2358_v25 = vpack.c.bf16 %v2354_v7, %v2350_v2 }
 0x7ee   : > { %v5542_v26 = vpack.c.bf16 %v2356_v9, %v2352_v0 }
 0x7ef   : > { %v2381_v10 = vsel %vm1435_vm1, %v2358_v25, 0 }
 0x81e   : > { %v2061_v44 = vpop.xlane.xlu0 %2060 }
 0x81f   : > { %v2064_v45 = vmul.f32 0.0078125, %v2061_v44 }
 0x820   : > { %v2063_v46 = vpop.xlane.xlu1 %2062 }
 0x821   : > { %v2066_v23 = vadd.f32 1e-05, %v2064_v45  ;;  %v2065_v24 = vmul.f32 0.0078125, %v2063_v46 }
 0x823   : > { %4557 = vrsqrt.f32 %v2066_v23  ;;  %v2067_v47 = vadd.f32 1e-05, %v2065_v24 }
 0x825   : > { %4559 = vrsqrt.f32 %v2067_v47 }
 0x82d   : > { %v4558_v48 = vpop.eup %4557 }
 0x82e   : > { %v2070_v50 = vmul.f32 %v4558_v48, %v2056_v17 }
 0x82f   : > { %v4560_v51 = vpop.eup %4559 }
 0x830   : > { %v2071_v52 = vmul.f32 %v4560_v51, %v2057_v18  ;;  %v2078_v39 = vmul.f32 %v3918_v49, %v2070_v50  ;;  %v5559_v18 = vsel %vm1130_vm4, 0.0, %v4831_v61 }
 0x832   : > { %v2079_v53 = vmul.f32 %v3918_v49, %v2071_v52  ;;  %v5531_v54 = vadd.f32 %v3919_v41, %v2078_v39 }
 0x834   : > { %v5533_v55 = vadd.f32 %v3919_v41, %v2079_v53 }
 0x836   : > { %v2090_v56 = vpack.c.bf16 %v5533_v55, %v5531_v54 }
 0x838   : > { %4221 = vmatmul.mubr.bf16.vlgmr.msra.gmra.mrb[28].mxu1 %v2090_v56 }
 0x839   : > { %4226 = vmatprep.mubr.msk.bf16.mxu1 %vm4827_vm0, %v4826_v5  ;;  %4225 = vmatpush3.bf16.xpose.msra.mxu1 %v2381_v10 }
 0x83a   : > { %4230 = vmatprep.subr.bf16.mxu1 %v4826_v5 }
 0x90b   : > { %v2196_v12 = vpop.f32.mrb[28].mxu1 }
 0x90c   : > { %v4222_v13 = vpop.f32.mrb[29].mxu1  ;;  %v2197_v15 = vadd.f32 %v3920_v11, %v2196_v12 }
 0x90d   : > { %v2199_v14 = vpop.f32.mrb[30].mxu1 }
 0x90e   : > { %v2200_v16 = vadd.f32 %v3920_v11, %v2199_v14  ;;  %v4223_v17 = vpop.f32.mrb[31].mxu1 }
 0x910   : > { %v2203_v57 = vpack.c.bf16 %v2200_v16, %v2197_v15 }
 0x912   : > { %4227 = vmatmul.mubr.msk.bf16.vlgmr.msra.gmra.mrb[32].mxu1 %vm1435_vm1, %v2203_v57 }
 0x913   : > { %4231 = vmatpush3.bf16.msra.mxu1 %v5542_v26  ;;  %4232 = vmatprep.mubr.msk.bf16.mxu1 %vm4827_vm0, %v4826_v5 }
 0x914   : > { %4236 = vmatprep.subr.bf16.mxu1 %v4826_v5 }
 0x9e5   : > { %v2417_v19 = vpop.f32.mrb[32].mxu1 }
 0x9e6   : > { %v2418_v21 = vadd.f32 %v2417_v19, %v5559_v18  ;;  %v4228_v22 = vpop.f32.mrb[33].mxu1 }
 0x9e7   : > { %v2420_v27 = vpop.f32.mrb[34].mxu1 }
 0x9e8   : > { %v2421_v28 = vadd.f32 %v2420_v27, %v5564_v20  ;;  %v4229_v29 = vpop.f32.mrb[35].mxu1  ;;  %v2424_v30 = vsel %vm1483_vm10, %v2418_v21, -inf }
 0x9e9   : > { %2425 = vmax.xlane.f32.xlu0 %v2424_v30 }
 0x9ea   : > { %v2427_v58 = vsel %vm1483_vm10, %v2421_v28, -inf }
 0x9eb   : > { %2428 = vmax.xlane.f32.xlu1 %v2427_v58 }
 0x9fc   : > { %2492 = vrot.lane.b32.xlu1 %v2203_v57, %s4828_s27 }
 0x9ff   : > { %2495 = vrot.lane.b32.xlu0 %v2358_v25, %s4828_s27 }
 0xa00   : > { %2617 = vrot.lane.b32.xlu1 %v2358_v25, %s4829_s5 }
 0xa03   : > { %2615 = vrot.lane.b32.xlu0 %v2203_v57, %s4829_s5 }
 0xa04   : > { %2738 = vrot.lane.b32.xlu1 %v2358_v25, %s4830_s0 }
 0xa07   : > { %2736 = vrot.lane.b32.xlu0 %v2203_v57, %s4830_s0 }
 0xa76   : > { %v2426_v60 = vpop.xlane.xlu0 %2425 }
 0xa77   : > { %v2430_v61 = vsub.f32 %v2418_v21, %v2426_v60 }
 0xa78   : > { %v2429_v31 = vpop.xlane.xlu1 %2428 }
 0xa79   : > { %v2432_v32 = vmul.f32 1.442695, %v2430_v61  ;;  %v2431_v34 = vsub.f32 %v2421_v28, %v2429_v31 }
 0xa7a   : > { %v2496_v42 = vpop.permute.xlu0 %2495 }
 0xa7b   : > { %v2434_v36 = vmul.f32 1.442695, %v2431_v34  ;;  %4561 = vpow2.f32 %v2432_v32  ;;  %v2501_v47 = vsel %vm1435_vm1, %v2496_v42, 0 }
 0xa7c   : > { %v2493_v37 = vpop.permute.xlu1 %2492 }
 0xa7d   : > { %4563 = vpow2.f32 %v2434_v36 }
 0xa7e   : > { %v2616_v46 = vpop.permute.xlu0 %2615 }
 0xa80   : > { %v2618_v38 = vpop.permute.xlu1 %2617 }
 0xa81   : > { %v2623_v40 = vsel %vm1435_vm1, %v2618_v38, 0 }
 0xa82   : > { %4249 = vmatpush3.bf16.xpose.msra.mxu0 %v2623_v40  ;;  %v2737_v48 = vpop.permute.xlu0 %2736 }
 0xa83   : > { %4260 = vmatprep.subr.bf16.mxu0 %v4826_v5 }
 0xa84   : > { %v2739_v44 = vpop.permute.xlu1 %2738 }
 0xa85   : > { %v5578_v43 = vpop.eup %4561  ;;  %v2744_v24 = vsel %vm1435_vm1, %v2739_v44, 0 }
 0xa87   : > { %v5580_v45 = vpop.eup %4563 }
 0xa88   : > { %v2442_v23 = vpack.c.bf16 %v5580_v45, %v5578_v43 }
 0xa89   : > { %4251 = vmatmul.mubr.msk.bf16.vlgmr.msra.gmra.mrb[20].mxu0 %vm1435_vm1, %v2616_v46 }
 0xa8a   : > { %4233 = vmatmul.mubr.msk.bf16.vlgmr.msra.gmra.mrb[36].mxu1 %vm1483_vm10, %v2442_v23  ;;  %4261 = vmatpush3.bf16.xpose.msra.mxu0 %v2744_v24 }
 0xa8b   : > { %4237 = vmatpush3.bf16.xpose.msra.mxu1 %v2501_v47  ;;  %4262 = vmatprep.mubr.msk.bf16.mxu0 %vm4827_vm0, %v4826_v5 }
 0xa8c   : > { %4238 = vmatprep.mubr.msk.bf16.mxu1 %vm4827_vm0, %v4826_v5  ;;  %4242 = vmatprep.subr.bf16.mxu1 %v4826_v5 }
 0xa8d   : > { %4272 = vmatprep.subr.bf16.mxu0 %v4826_v5 }
 0xa91   : > { %4263 = vmatmul.mubr.msk.bf16.vlgmr.msra.gmra.mrb[24].mxu0 %vm1435_vm1, %v2737_v48 }
 0xa92   : > { %4239 = vmatmul.mubr.msk.bf16.vlgmr.msra.gmra.mrb[40].mxu1 %vm1435_vm1, %v2493_v37  ;;  %4288 = vmatprep.mubr.msk.bf16.mxu0 %vm4827_vm0, %v4826_v5 }
 0xa93   : > { %4244 = vmatprep.mubr.msk.bf16.mxu1 %vm4827_vm0, %v4826_v5 }
 0xb5c   : > { %v2659_v49 = vpop.f32.mrb[20].mxu0 }
 0xb5d   : > { %v2660_v50 = vadd.f32 %v2659_v49, %v5559_v18  ;;  %v5601_v51 = vpop.f32.mrb[36].mxu1  ;;  %v4252_v52 = vpop.f32.mrb[21].mxu0 }
 0xb5e   : > { %v4234_v39 = vpop.f32.mrb[37].mxu1  ;;  %v2662_v41 = vpop.f32.mrb[22].mxu0 }
 0xb5f   : > { %v2663_v53 = vadd.f32 %v2662_v41, %v5564_v20  ;;  %v5604_v56 = vpop.f32.mrb[38].mxu1  ;;  %v4253_v59 = vpop.f32.mrb[23].mxu0  ;;  %v2666_v63 = vsel %vm1483_vm10, %v2660_v50, -inf }
 0xb60   : > { %2667 = vmax.xlane.f32.xlu0 %v2666_v63  ;;  %v4235_v1 = vpop.f32.mrb[39].mxu1  ;;  %v2439_v59 = vsel %vm1483_vm10, %v5580_v45, 0.0  ;;  %v4479_v45 = vld [vmem:[%s5913_s29 + $0x10] sm:$0xff]  }
 0xb61   : > { %v2669_v62 = vsel %vm1483_vm10, %v2663_v53, -inf }
 0xb62   : > { %2670 = vmax.xlane.f32.xlu1 %v2669_v62 }
 0xb64   : > { %v2780_v2 = vpop.f32.mrb[24].mxu0 }
 0xb65   : > { %v2781_v3 = vadd.f32 %v2780_v2, %v5559_v18  ;;  %v2537_v0 = vpop.f32.mrb[40].mxu1  ;;  %v4264_v6 = vpop.f32.mrb[25].mxu0  ;;  %v4478_v2 = vld [vmem:[%s5913_s29 + $0x8] sm:$0xff]  }
 0xb66   : > { %v4240_v7 = vpop.f32.mrb[41].mxu1  ;;  %v2783_v8 = vpop.f32.mrb[26].mxu0  ;;  %v2538_v14 = vadd.f32 %v2537_v0, %v5559_v18 }
 0xb67   : > { %v2784_v9 = vadd.f32 %v2783_v8, %v5564_v20  ;;  %v2540_v25 = vpop.f32.mrb[42].mxu1  ;;  %v4265_v10 = vpop.f32.mrb[27].mxu0  ;;  %v2787_v11 = vsel %vm1483_vm10, %v2781_v3, -inf  ;;  %v4481_v8 = vld [vmem:[%s5913_s29 + $0x20] sm:$0xff]  }
 0xb68   : > { %v2541_v12 = vadd.f32 %v2540_v25, %v5564_v20  ;;  %2788 = vmax.xlane.f32.xlu0 %v2787_v11  ;;  %v4241_v13 = vpop.f32.mrb[43].mxu1  ;;  %v2544_v17 = vsel %vm1483_vm10, %v2538_v14, -inf }
 0xb69   : > { %v2790_v15 = vsel %vm1483_vm10, %v2784_v9, -inf }
 0xb6a   : > { %2791 = vmax.xlane.f32.xlu1 %v2790_v15  ;;  %v2547_v16 = vsel %vm1483_vm10, %v2541_v12, -inf }
 0xb6c   : > { %2548 = vmax.xlane.f32.xlu0 %v2547_v16  ;;  %v4482_v16 = vld [vmem:[%s5913_s29 + $0x28] sm:$0xff]  }
 0xb6e   : > { %2545 = vmax.xlane.f32.xlu1 %v2544_v17 }
 0xb7f   : > { %2685 = vrot.lane.b32.xlu1 %v5542_v26, %s4829_s5 }
 0xb82   : > { %2564 = vrot.lane.b32.xlu0 %v5542_v26, %s4828_s27 }
 0xb83   : > { %2806 = vrot.lane.b32.xlu1 %v5542_v26, %s4830_s0 }
 0xbed   : > { %v2668_v57 = vpop.xlane.xlu0 %2667 }
 0xbee   : > { %v2672_v18 = vsub.f32 %v2660_v50, %v2668_v57 }
 0xbef   : > { %v2671_v19 = vpop.xlane.xlu1 %2670 }
 0xbf0   : > { %v2674_v20 = vmul.f32 1.442695, %v2672_v18  ;;  %v2673_v21 = vsub.f32 %v2663_v53, %v2671_v19  ;;  %v2436_v53 = vsel %vm1483_vm10, %v5578_v43, 0.0  ;;  %v4477_v43 = vld [vmem:[%s5913_s29] sm:$0xff]   ;;  %v4483_v19 = vld [vmem:[%s5913_s29 + $0x30] sm:$0xff]  }
 0xbf1   : > { %4273 = vmatpush3.bf16.msra.mxu0 %v4477_v43 }
 0xbf2   : > { %4565 = vpow2.f32 %v2674_v20  ;;  %v2676_v22 = vmul.f32 1.442695, %v2673_v21  ;;  %4274 = vmatprep.subr.bf16.mxu0 %v4826_v5 }
 0xbf4   : > { %4567 = vpow2.f32 %v2676_v22 }
 0xbf5   : > { %v2789_v27 = vpop.xlane.xlu0 %2788  ;;  %4275 = vmatpush3.bf16.msra.mxu0 %v4478_v2 }
 0xbf6   : > { %v2793_v28 = vsub.f32 %v2781_v3, %v2789_v27  ;;  %4276 = vmatprep.subr.bf16.mxu0 %v4826_v5 }
 0xbf7   : > { %v2792_v29 = vpop.xlane.xlu1 %2791 }
 0xbf8   : > { %v2794_v58 = vsub.f32 %v2784_v9, %v2792_v29  ;;  %v2795_v61 = vmul.f32 1.442695, %v2793_v28 }
 0xbf9   : > { %v2549_v30 = vpop.xlane.xlu0 %2548  ;;  %4277 = vmatpush3.bf16.msra.mxu0 %v4479_v45 }
 0xbfa   : > { %v2551_v60 = vsub.f32 %v2541_v12, %v2549_v30  ;;  %v2797_v40 = vmul.f32 1.442695, %v2794_v58  ;;  %4278 = vmatprep.subr.bf16.mxu0 %v4826_v5 }
 0xbfb   : > { %v2546_v31 = vpop.xlane.xlu1 %2545 }
 0xbfc   : > { %v4566_v32 = vpop.eup %4565  ;;  %v2554_v34 = vmul.f32 1.442695, %v2551_v60  ;;  %v2550_v36 = vsub.f32 %v2538_v14, %v2546_v31  ;;  %v4484_v60 = vld [vmem:[%s5913_s29 + $0x38] sm:$0xff]  }
 0xbfd   : > { %v2565_v26 = vpop.permute.xlu0 %2564  ;;  %v2678_v37 = vsel %vm1483_vm10, %v4566_v32, 0.0 }
 0xbfe   : > { %v4568_v38 = vpop.eup %4567  ;;  %4569 = vpow2.f32 %v2554_v34  ;;  %v2552_v42 = vmul.f32 1.442695, %v2550_v36  ;;  %2679 = vadd.xlane.f32.xlu0 %v2678_v37  ;;  %4243 = vmatpush3.bf16.msra.mxu1 %v2565_v26 }
 0xbff   : > { %4571 = vpow2.f32 %v2795_v61  ;;  %4254 = vmatprep.subr.bf16.mxu1 %v4826_v5  ;;  %v2681_v44 = vsel %vm1483_vm10, %v4568_v38, 0.0  ;;  %v2686_v52 = vpop.permute.xlu1 %2685  ;;  %v2684_v63 = vpack.c.bf16 %v4568_v38, %v4566_v32 }
 0xc00   : > { %4573 = vpow2.f32 %v2552_v42 }
 0xc01   : > { %4575 = vpow2.f32 %v2797_v40 }
 0xc02   : > { %2682 = vadd.xlane.f32.xlu0 %v2681_v44 }
 0xc03   : > { %v2807_v1 = vpop.permute.xlu1 %2806 }
 0xc08   : > { %v4570_v46 = vpop.eup %4569 }
 0xc09   : > { %v4572_v23 = vpop.eup %4571  ;;  %v2559_v24 = vsel %vm1483_vm10, %v4570_v46, 0.0 }
 0xc0a   : > { %v4574_v47 = vpop.eup %4573  ;;  %2560 = vadd.xlane.f32.xlu1 %v2559_v24  ;;  %v2799_v39 = vsel %vm1483_vm10, %v4572_v23, 0.0 }
 0xc0b   : > { %v2556_v48 = vsel %vm1483_vm10, %v4574_v47, 0.0  ;;  %v2562_v49 = vpack.c.bf16 %v4570_v46, %v4574_v47  ;;  %v4576_v50 = vpop.eup %4575 }
 0xc0c   : > { %2557 = vadd.xlane.f32.xlu0 %v2556_v48  ;;  %v2802_v41 = vsel %vm1483_vm10, %v4576_v50, 0.0  ;;  %v2805_v62 = vpack.c.bf16 %v4576_v50, %v4572_v23 }
 0xc0d   : > { %4245 = vmatmul.mubr.msk.bf16.vlgmr.msra.gmra.mrb[44].mxu1 %vm1483_vm10, %v2562_v49 }
 0xc0e   : > { %4255 = vmatpush3.bf16.msra.mxu1 %v2686_v52  ;;  %2800 = vadd.xlane.f32.xlu1 %v2799_v39 }
 0xc0f   : > { %4256 = vmatprep.mubr.msk.bf16.mxu1 %vm4827_vm0, %v4826_v5  ;;  %4266 = vmatprep.subr.bf16.mxu1 %v4826_v5 }
 0xc10   : > { %2803 = vadd.xlane.f32.xlu0 %v2802_v41 }
 0xc12   : > { %2437 = vadd.xlane.f32.xlu1 %v2436_v53 }
 0xc14   : > { %2440 = vadd.xlane.f32.xlu0 %v2439_v59 }
 0xc15   : > { %4257 = vmatmul.mubr.msk.bf16.vlgmr.msra.gmra.mrb[48].mxu1 %vm1483_vm10, %v2684_v63 }
 0xc16   : > { %4267 = vmatpush3.bf16.msra.mxu1 %v2807_v1  ;;  %4268 = vmatprep.mubr.msk.bf16.mxu1 %vm4827_vm0, %v4826_v5 }
 0xc1d   : > { %4269 = vmatmul.mubr.msk.bf16.vlgmr.msra.gmra.mrb[52].mxu1 %vm1483_vm10, %v2805_v62 }
 0xc1e   : > { %3166 = vmatprep.mubr.bf16.mxu1 %v4825_v4  ;;  %v4480_v4 = vld [vmem:[%s5913_s29 + $0x18] sm:$0xff]  }
 0xc1f   : > { %4279 = vmatpush3.bf16.msra.mxu0 %v4480_v4 }
 0xc20   : > { %4280 = vmatprep.subr.bf16.mxu0 %v4826_v5 }
 0xc23   : > { %4281 = vmatpush3.bf16.msra.mxu0 %v4481_v8 }
 0xc24   : > { %4282 = vmatprep.subr.bf16.mxu0 %v4826_v5 }
 0xc27   : > { %4283 = vmatpush3.bf16.msra.mxu0 %v4482_v16 }
 0xc28   : > { %4284 = vmatprep.subr.bf16.mxu0 %v4826_v5 }
 0xc2b   : > { %4285 = vmatpush3.bf16.msra.mxu0 %v4483_v19 }
 0xc2c   : > { %4286 = vmatprep.subr.bf16.mxu0 %v4826_v5 }
 0xc2f   : > { %4287 = vmatpush3.bf16.msra.mxu0 %v4484_v60 }
 0xc8b   : > { %v2680_v3 = vpop.xlane.xlu0 %2679 }
 0xc8f   : > { %v2683_v0 = vpop.xlane.xlu0 %2682 }
 0xc97   : > { %v2561_v6 = vpop.xlane.xlu1 %2560 }
 0xc98   : > { %4577 = vrcp.f32 %v2561_v6 }
 0xc99   : > { %v2558_v7 = vpop.xlane.xlu0 %2557 }
 0xc9a   : > { %4579 = vrcp.f32 %v2558_v7 }
 0xc9b   : > { %4581 = vrcp.f32 %v2680_v3  ;;  %v2801_v17 = vpop.xlane.xlu1 %2800 }
 0xc9c   : > { %4583 = vrcp.f32 %v2683_v0 }
 0xc9d   : > { %v2804_v57 = vpop.xlane.xlu0 %2803  ;;  %4585 = vrcp.f32 %v2801_v17 }
 0xc9e   : > { %4587 = vrcp.f32 %v2804_v57 }
 0xc9f   : > { %v2438_v5 = vpop.xlane.xlu1 %2437 }
 0xca0   : > { %4589 = vrcp.f32 %v2438_v5  ;;  %v4516_v5 = vld [vmem:[%s5262_s14 + $0x18] sm:$0xff]  }
 0xca1   : > { %v2441_v44 = vpop.xlane.xlu0 %2440 }
 0xca2   : > { %v4578_v25 = vpop.eup %4577  ;;  %4591 = vrcp.f32 %v2441_v44  ;;  %v4517_v44 = vld [vmem:[%s5262_s14 + $0x60] sm:$0xff]  }
 0xca4   : > { %v4580_v11 = vpop.eup %4579 }
 0xca5   : > { %v4582_v21 = vpop.eup %4581 }
 0xca6   : > { %v4584_v27 = vpop.eup %4583 }
 0xca7   : > { %v4586_v32 = vpop.eup %4585 }
 0xca8   : > { %v4588_v36 = vpop.eup %4587 }
 0xcaa   : > { %v4590_v23 = vpop.eup %4589 }
 0xcab   : > { %v2489_v39 = vmul.f32 %v4590_v23, %v5601_v51  ;;  %v4519_v23 = vld [vmem:[%s5262_s14 + $0x68] sm:$0xff]  }
 0xcac   : > { %v4592_v47 = vpop.eup %4591 }
 0xcad   : > { %v2490_v41 = vmul.f32 %v4592_v47, %v5604_v56  ;;  %v3953_v56 = vld [vmem:[%s5916_s19] ss:$0 sm:$0xff] }
 0xce0   : > { %v2604_v9 = vpop.f32.mrb[44].mxu1 }
 0xce1   : > { %v4246_v10 = vpop.f32.mrb[45].mxu1  ;;  %v2613_v13 = vmul.f32 %v4580_v11, %v2604_v9 }
 0xce2   : > { %v2607_v12 = vpop.f32.mrb[46].mxu1 }
 0xce3   : > { %v2614_v14 = vmul.f32 %v4578_v25, %v2607_v12  ;;  %v4247_v15 = vpop.f32.mrb[47].mxu1 }
 0xce5   : > { %v4390_v18 = vpack.i.bf16 %v2614_v14, %v2613_v13 }
 0xce7   : > { %4391 = vrot.lane.b32.xlu1 %v4390_v18, %s4830_s0 }
 0xce8   : > { %v2725_v20 = vpop.f32.mrb[48].mxu1 }
 0xce9   : > { %v4258_v22 = vpop.f32.mrb[49].mxu1  ;;  %v2734_v29 = vmul.f32 %v4582_v21, %v2725_v20 }
 0xcea   : > { %v2728_v28 = vpop.f32.mrb[50].mxu1 }
 0xceb   : > { %v2735_v30 = vmul.f32 %v4584_v27, %v2728_v28  ;;  %v4259_v58 = vpop.f32.mrb[51].mxu1 }
 0xced   : > { %v4395_v61 = vpack.i.bf16 %v2735_v30, %v2734_v29 }
 0xcef   : > { %4396 = vrot.lane.b32.xlu0 %v4395_v61, %s4829_s5 }
 0xcf0   : > { %v2846_v31 = vpop.f32.mrb[52].mxu1 }
 0xcf1   : > { %v4270_v34 = vpop.f32.mrb[53].mxu1  ;;  %v2855_v37 = vmul.f32 %v4586_v32, %v2846_v31 }
 0xcf2   : > { %v2849_v26 = vpop.f32.mrb[54].mxu1  ;;  %v4509_v34 = vld [vmem:[%s5262_s14 + $0x40] sm:$0xff]  }
 0xcf3   : > { %v2856_v38 = vmul.f32 %v4588_v36, %v2849_v26  ;;  %v4271_v40 = vpop.f32.mrb[55].mxu1  ;;  %v4510_v36 = vld [vmem:[%s5262_s14] sm:$0xff]   ;;  %v4511_v26 = vld [vmem:[%s5262_s14 + $0x48] sm:$0xff]   ;;  %4094 = vmatprep.subr.bf16.mxu0 %v4509_v34 }
 0xcf4   : > { %v4514_v40 = vld [vmem:[%s5262_s14 + $0x10] sm:$0xff]  }
 0xcf5   : > { %v4400_v42 = vpack.i.bf16 %v2856_v38, %v2855_v37  ;;  %v4512_v37 = vld [vmem:[%s5262_s14 + $0x8] sm:$0xff]   ;;  %v4513_v38 = vld [vmem:[%s5262_s14 + $0x50] sm:$0xff]  }
 0xcf7   : > { %4401 = vrot.lane.b32.xlu1 %v4400_v42, %s4828_s27  ;;  %s5914_s27 = sld [smem:[#allocation21_spill]]  ;;  %v4515_v42 = vld [vmem:[%s5262_s14 + $0x58] sm:$0xff]  }
 0xcfd   : > { %v4485_v11 = vld [vmem:[%s5914_s27] ss:$8 sps:$4 sm:$0xff]   ;;  %v4487_v12 = vld [vmem:[%s5914_s27 + $0x4] ss:$8 sps:$4 sm:$0xff]   ;;  %v4490_v13 = vld [vmem:[%s5914_s27 + $0x14] ss:$8 sps:$4 sm:$0xff]  }
 0xcfe   : > { %3134 = vmatprep.subr.bf16.mxu1 %v4487_v12  ;;  %v4488_v14 = vld [vmem:[%s5914_s27 + $0x10] ss:$8 sps:$4 sm:$0xff]   ;;  %v4493_v20 = vld [vmem:[%s5914_s27 + $0x24] ss:$8 sps:$4 sm:$0xff]   ;;  %v4491_v21 = vld [vmem:[%s5914_s27 + $0x20] ss:$8 sps:$4 sm:$0xff]  }
 0xcff   : > { %3135 = vmatpush1.bf16.msra.mxu1 %v4485_v11  ;;  %v4496_v22 = vld [vmem:[%s5914_s27 + $0x34] ss:$8 sps:$4 sm:$0xff]   ;;  %v4494_v27 = vld [vmem:[%s5914_s27 + $0x30] ss:$8 sps:$4 sm:$0xff]   ;;  %v4499_v28 = vld [vmem:[%s5914_s27 + $0x44] ss:$8 sps:$4 sm:$0xff]  }
 0xd00   : > { %3136 = vmatprep.subr.bf16.mxu1 %v4490_v13  ;;  %v4497_v29 = vld [vmem:[%s5914_s27 + $0x40] ss:$8 sps:$4 sm:$0xff]   ;;  %v4502_v30 = vld [vmem:[%s5914_s27 + $0x54] ss:$8 sps:$4 sm:$0xff]   ;;  %v4500_v58 = vld [vmem:[%s5914_s27 + $0x50] ss:$8 sps:$4 sm:$0xff]  }
 0xd01   : > { %v4505_v60 = vld [vmem:[%s5914_s27 + $0x64] ss:$8 sps:$4 sm:$0xff]   ;;  %v4503_v61 = vld [vmem:[%s5914_s27 + $0x60] ss:$8 sps:$4 sm:$0xff]   ;;  %v4508_v31 = vld [vmem:[%s5914_s27 + $0x74] ss:$8 sps:$4 sm:$0xff]  }
 0xd02   : > { %v4506_v32 = vld [vmem:[%s5914_s27 + $0x70] ss:$8 sps:$4 sm:$0xff]  }
 0xd03   : > { %3137 = vmatpush1.bf16.msra.mxu1 %v4488_v14 }
 0xd04   : > { %3138 = vmatprep.subr.bf16.mxu1 %v4493_v20 }
 0xd07   : > { %3139 = vmatpush1.bf16.msra.mxu1 %v4491_v21  ;;  %v3980_v21 = vld [vmem:[%s1100_s20] ss:$0 sm:$0xff] }
 0xd08   : > { %3140 = vmatprep.subr.bf16.mxu1 %v4496_v22 }
 0xd0b   : > { %3141 = vmatpush1.bf16.msra.mxu1 %v4494_v27 }
 0xd0c   : > { %3142 = vmatprep.subr.bf16.mxu1 %v4499_v28 }
 0xd0f   : > { %3143 = vmatpush1.bf16.msra.mxu1 %v4497_v29 }
 0xd10   : > { %3144 = vmatprep.subr.bf16.mxu1 %v4502_v30 }
 0xd13   : > { %3145 = vmatpush1.bf16.msra.mxu1 %v4500_v58 }
 0xd14   : > { %3146 = vmatprep.subr.bf16.mxu1 %v4505_v60 }
 0xd17   : > { %3147 = vmatpush1.bf16.msra.mxu1 %v4503_v61 }
 0xd18   : > { %3148 = vmatprep.subr.bf16.mxu1 %v4508_v31 }
 0xd1b   : > { %3149 = vmatpush1.bf16.msra.mxu1 %v4506_v32 }
 0xd59   : > { %v4392_v46 = vpop.permute.xlu1 %4391 }
 0xd5a   : > { %v4394_v48 = vunpack.i.h.bf16 %v4392_v46  ;;  %v4393_v49 = vunpack.i.l.bf16 %v4392_v46  ;;  %v4518_v46 = vld [vmem:[%s5262_s14 + $0x20] sm:$0xff]  }
 0xd5c   : > { %v2882_v59 = vsel %vm1435_vm1, %v2490_v41, %v4394_v48  ;;  %v2881_v63 = vsel %vm1435_vm1, %v2489_v39, %v4393_v49  ;;  %v3962_v41 = vld [vmem:[%s5918_s22] ss:$0 sm:$0xff] }
 0xd61   : > { %v4397_v24 = vpop.permute.xlu0 %4396 }
 0xd62   : > { %v4399_v50 = vunpack.i.h.bf16 %v4397_v24  ;;  %v4398_v52 = vunpack.i.l.bf16 %v4397_v24 }
 0xd64   : > { %v2884_v43 = vsel %vm1943_vm11, %v2882_v59, %v4399_v50  ;;  %v2883_v2 = vsel %vm1943_vm11, %v2881_v63, %v4398_v52 }
 0xd69   : > { %v4402_v53 = vpop.permute.xlu1 %4401 }
 0xd6a   : > { %v4404_v1 = vunpack.i.h.bf16 %v4402_v53  ;;  %v4403_v62 = vunpack.i.l.bf16 %v4402_v53 }
 0xd6c   : > { %v2886_v45 = vsel %vm1946_vm12, %v2884_v43, %v4404_v1  ;;  %v2885_v3 = vsel %vm1946_vm12, %v2883_v2, %v4403_v62  ;;  %v3963_v62 = vld [vmem:[%s5920_s6] ss:$0 sm:$0xff] }
 0xd6d   : > { %v2887_v51 = vpack.c.bf16 %v2886_v45, %v2885_v3 }
 0xd6f   : > { %4289 = vmatmul.mubr.bf16.vlgmr.msra.gmra.mrb[28].mxu0 %v2887_v51  ;;  %v4520_v51 = vld [vmem:[%s5262_s14 + $0x28] sm:$0xff]  }
 0xd70   : > { %4095 = vmatpush3.bf16.msra.mxu0 %v4510_v36 }
 0xd71   : > { %4096 = vmatprep.subr.bf16.mxu0 %v4511_v26 }
 0xd74   : > { %4097 = vmatpush3.bf16.msra.mxu0 %v4512_v37 }
 0xd75   : > { %4098 = vmatprep.subr.bf16.mxu0 %v4513_v38 }
 0xd78   : > { %4099 = vmatpush3.bf16.msra.mxu0 %v4514_v40 }
 0xd79   : > { %4100 = vmatprep.subr.bf16.mxu0 %v4515_v42 }
 0xd7c   : > { %4101 = vmatpush3.bf16.msra.mxu0 %v4516_v5 }
 0xd7d   : > { %4102 = vmatprep.subr.bf16.mxu0 %v4517_v44 }
 0xd80   : > { %4103 = vmatpush3.bf16.msra.mxu0 %v4518_v46 }
 0xd81   : > { %4104 = vmatprep.subr.bf16.mxu0 %v4519_v23 }
 0xd84   : > { %4105 = vmatpush3.bf16.msra.mxu0 %v4520_v51  ;;  %v4607_v51 = vld [vmem:[#allocation9 + $0x24] ss:$8 sps:$4 sm:$0xff] (!%p3999_p4)  }
 0xe42   : > { %v2976_v0 = vpop.f32.mrb[28].mxu0 }
 0xe43   : > { %v2977_v6 = vadd.f32 %v3953_v56, %v2976_v0  ;;  %v4290_v7 = vpop.f32.mrb[29].mxu0  ;;  %v4522_v0 = vld [vmem:[%s5262_s14 + $0x30] sm:$0xff]  }
 0xe44   : > { %v2979_v4 = vpop.f32.mrb[30].mxu0  ;;  %v4524_v7 = vld [vmem:[%s5262_s14 + $0x38] sm:$0xff]  }
 0xe45   : > { %v2980_v8 = vadd.f32 %v3953_v56, %v2979_v4  ;;  %v4291_v9 = vpop.f32.mrb[31].mxu0  ;;  %v2983_v25 = vadd.f32 %v2977_v6, %v5531_v54  ;;  %v4521_v56 = vld [vmem:[%s5262_s14 + $0x70] sm:$0xff]   ;;  %v4523_v6 = vld [vmem:[%s5262_s14 + $0x78] sm:$0xff]   ;;  %v3042_v4 = vld [vmem:[%s5257_s4] sm:$0x3] }
 0xe46   : > { %4106 = vmatprep.subr.bf16.mxu0 %v4521_v56  ;;  %v3051_v9 = vrot.slane %v3042_v4, %v5334_v35  ;;  %v4609_v56 = vld [vmem:[#allocation9 + $0x20] ss:$8 sps:$4 sm:$0xff] (!%p3999_p4)  }
 0xe47   : > { %2987 = vadd.xlane.f32.xlu1 %v2983_v25  ;;  %v2984_v10 = vadd.f32 %v2980_v8, %v5533_v55  ;;  %4107 = vmatpush3.bf16.msra.mxu0 %v4522_v0  ;;  %v3047_v8 = vrot.slane %v3042_v4, %v5331_v33  ;;  %v4610_v0 = vld [vmem:[#allocation9 + $0x34] ss:$8 sps:$4 sm:$0xff] (!%p3999_p4)   ;;  %v4615_v4 = vld [vmem:[#allocation9 + $0x40] ss:$8 sps:$4 sm:$0xff] (!%p3999_p4)  }
 0xe48   : > { %4108 = vmatprep.subr.bf16.mxu0 %v4523_v6  ;;  %v4612_v6 = vld [vmem:[#allocation9 + $0x30] ss:$8 sps:$4 sm:$0xff] (!%p3999_p4)  }
 0xe49   : > { %2989 = vadd.xlane.f32.xlu0 %v2984_v10 }
 0xe4b   : > { %4109 = vmatpush3.bf16.msra.mxu0 %v4524_v7  ;;  %v4613_v7 = vld [vmem:[#allocation9 + $0x44] ss:$8 sps:$4 sm:$0xff] (!%p3999_p4)  }
 0xed4   : > { %v2988_v15 = vpop.xlane.xlu1 %2987 }
 0xed5   : > { %v2991_v16 = vmul.f32 0.0078125, %v2988_v15 }
 0xed6   : > { %v2990_v17 = vpop.xlane.xlu0 %2989 }
 0xed7   : > { %v5679_v54 = vsub.f32 %v2983_v25, %v2991_v16  ;;  %v2992_v55 = vmul.f32 0.0078125, %v2990_v17 }
 0xed9   : > { %v5681_v57 = vsub.f32 %v2984_v10, %v2992_v55  ;;  %v2995_v18 = vmul.f32 %v5679_v54, %v5679_v54 }
 0xedb   : > { %2997 = vadd.xlane.f32.xlu0 %v2995_v18  ;;  %v2996_v19 = vmul.f32 %v5681_v57, %v5681_v57 }
 0xedd   : > { %2999 = vadd.xlane.f32.xlu1 %v2996_v19 }
 0xf68   : > { %v2998_v24 = vpop.xlane.xlu0 %2997 }
 0xf69   : > { %v3001_v47 = vmul.f32 0.0078125, %v2998_v24 }
 0xf6a   : > { %v3000_v48 = vpop.xlane.xlu1 %2999 }
 0xf6b   : > { %v3003_v49 = vadd.f32 1e-05, %v3001_v47  ;;  %v3002_v50 = vmul.f32 0.0078125, %v3000_v48 }
 0xf6d   : > { %4593 = vrsqrt.f32 %v3003_v49  ;;  %v3004_v52 = vadd.f32 1e-05, %v3002_v50  ;;  %v3997_v49 = vld [vmem:[%s1103_s30] ss:$0 sm:$0xff]  ;;  %s5924_s30 = sld [smem:[#allocation44_spill]] (!%p3999_p4) }
 0xf6f   : > { %4595 = vrsqrt.f32 %v3004_v52 }
 0xf77   : > { %v4594_v39 = vpop.eup %4593 }
 0xf78   : > { %v3007_v53 = vmul.f32 %v4594_v39, %v5679_v54  ;;  %v3998_v39 = vld [vmem:[%s1106_s26] ss:$0 sm:$0xff] }
 0xf79   : > { %v4596_v59 = vpop.eup %4595 }
 0xf7a   : > { %v3008_v63 = vmul.f32 %v4596_v59, %v5681_v57  ;;  %v3015_v1 = vmul.f32 %v3962_v41, %v3007_v53 }
 0xf7c   : > { %v3016_v43 = vmul.f32 %v3962_v41, %v3008_v63  ;;  %v3023_v2 = vadd.f32 %v3963_v62, %v3015_v1 }
 0xf7e   : > { %v3024_v45 = vadd.f32 %v3963_v62, %v3016_v43  ;;  %v4601_v62 = vld [vmem:[#allocation9 + $0x4] ss:$8 sps:$4 sm:$0xff] (!%p3999_p4)   ;;  %v4603_v43 = vld [vmem:[#allocation9] ss:$8 sps:$4 sm:$0xff] (!%p3999_p4)  }
 0xf7f   : > { %3516 = vmatprep.subr.bf16.mxu0 (!%p3999_p4), %v4601_v62 }
 0xf80   : > { %v3025_v3 = vpack.c.bf16 %v3024_v45, %v3023_v2 }
 0xf82   : > { %3167 = vmatmul.mubr.bf16.vlgmr.msra.gmra.mrb[56].mxu1 %v3025_v3  ;;  %v4606_v3 = vld [vmem:[#allocation9 + $0x10] ss:$8 sps:$4 sm:$0xff] (!%p3999_p4)  }
0x1055   : > { %v3168_v25 = vpop.f32.mrb[56].mxu1 }
0x1056   : > { %v3169_v10 = vadd.f32 %v3168_v25, %v3047_v8  ;;  %v3170_v11 = vpop.f32.mrb[57].mxu1  ;;  %v4619_v25 = vld [vmem:[#allocation9 + $0x64] ss:$8 sps:$4 sm:$0xff] (!%p3999_p4)  }
0x1057   : > { %v3171_v12 = vadd.f32 %v3170_v11, %v3051_v9  ;;  %v3172_v13 = vpop.f32.mrb[58].mxu1  ;;  %v4622_v11 = vld [vmem:[#allocation9 + $0x74] ss:$8 sps:$4 sm:$0xff] (!%p3999_p4)  }
0x1058   : > { %v3173_v14 = vadd.f32 %v3172_v13, %v3047_v8  ;;  %v3174_v15 = vpop.f32.mrb[59].mxu1  ;;  %v3177_v17 = vmax.f32 %v3169_v10, 0.0  ;;  %v4616_v8 = vld [vmem:[#allocation9 + $0x54] ss:$8 sps:$4 sm:$0xff] (!%p3999_p4)   ;;  %v4621_v10 = vld [vmem:[#allocation9 + $0x60] ss:$8 sps:$4 sm:$0xff] (!%p3999_p4)  }
0x1059   : > { %v3175_v16 = vadd.f32 %v3174_v15, %v3051_v9  ;;  %v3178_v55 = vmax.f32 %v3171_v12, 0.0  ;;  %v4618_v9 = vld [vmem:[#allocation9 + $0x50] ss:$8 sps:$4 sm:$0xff] (!%p3999_p4)  }
0x105a   : > { %v3179_v54 = vmax.f32 %v3173_v14, 0.0  ;;  %v4624_v12 = vld [vmem:[#allocation9 + $0x70] ss:$8 sps:$4 sm:$0xff] (!%p3999_p4)  }
0x105b   : > { %v3180_v57 = vmax.f32 %v3175_v16, 0.0  ;;  %v3424_v14 = vld [vmem:[%s5924_s30] sm:$0x3] (!%p3999_p4) }
0x105c   : > { %v3181_v18 = vpack.c.bf16 %v3179_v54, %v3177_v17  ;;  %v3429_v15 = vrot.slane (!%p3999_p4), %v3424_v14, %v5331_v33  ;;  %v3433_v16 = vrot.slane (!%p3999_p4), %v3424_v14, %v5334_v35 }
0x105d   : > { %v3182_v19 = vpack.c.bf16 %v3180_v57, %v3178_v55 }
0x105f   : > { %3350 = vmatprep.mubr.bf16.mxu0 %v3182_v19 }
0x1060   : > { %3351 = vmatmul.mubr.bf16.vlgmr.msra.gmra.mrb[32].mxu0 %v3181_v18 }
0x1061   : > { %3517 = vmatpush1.bf16.msra.mxu0 (!%p3999_p4), %v4603_v43 }
0x1133   : > { %v4110_v20 = vpop.f32.mrb[32].mxu0 }
0x1134   : > { %v4111_v22 = vpop.f32.mrb[33].mxu0 }
0x1135   : > { %v4112_v27 = vadd.f32 %v4111_v22, %v4110_v20  ;;  %v4113_v28 = vpop.f32.mrb[34].mxu0 }
0x1136   : > { %v4114_v29 = vpop.f32.mrb[35].mxu0 }
0x1137   : > { %v3353_v30 = vadd.f32 %v4112_v27, %v3980_v21  ;;  %v4115_v58 = vadd.f32 %v4114_v29, %v4113_v28 }
0x1139   : > { %v3356_v60 = vadd.f32 %v4115_v58, %v3980_v21  ;;  %v3359_v61 = vadd.f32 %v3353_v30, %v3023_v2  ;;  %v4832_v2 = vmov (!%p3999_p4), 0  }
0x113a   : > { %3548 = vmatprep.mubr.bf16.mxu0 (!%p3999_p4), %v4832_v2 }
0x113b   : > { %3363 = vadd.xlane.f32.xlu0 %v3359_v61  ;;  %v3360_v31 = vadd.f32 %v3356_v60, %v3024_v45  ;;  %v4604_v45 = vld [vmem:[#allocation9 + $0x14] ss:$8 sps:$4 sm:$0xff] (!%p3999_p4)  }
0x113c   : > { %3518 = vmatprep.subr.bf16.mxu0 (!%p3999_p4), %v4604_v45 }
0x113d   : > { %3365 = vadd.xlane.f32.xlu1 %v3360_v31  ;;  %3519 = vmatpush1.bf16.msra.mxu0 (!%p3999_p4), %v4606_v3 }
0x113e   : > { %3520 = vmatprep.subr.bf16.mxu0 (!%p3999_p4), %v4607_v51 }
0x1141   : > { %3521 = vmatpush1.bf16.msra.mxu0 (!%p3999_p4), %v4609_v56 }
0x1142   : > { %3522 = vmatprep.subr.bf16.mxu0 (!%p3999_p4), %v4610_v0 }
0x1145   : > { %3523 = vmatpush1.bf16.msra.mxu0 (!%p3999_p4), %v4612_v6 }
0x1146   : > { %3524 = vmatprep.subr.bf16.mxu0 (!%p3999_p4), %v4613_v7 }
0x1149   : > { %3525 = vmatpush1.bf16.msra.mxu0 (!%p3999_p4), %v4615_v4 }
0x114a   : > { %3526 = vmatprep.subr.bf16.mxu0 (!%p3999_p4), %v4616_v8 }
0x114d   : > { %3527 = vmatpush1.bf16.msra.mxu0 (!%p3999_p4), %v4618_v9 }
0x114e   : > { %3528 = vmatprep.subr.bf16.mxu0 (!%p3999_p4), %v4619_v25 }
0x1151   : > { %3529 = vmatpush1.bf16.msra.mxu0 (!%p3999_p4), %v4621_v10 }
0x1152   : > { %3530 = vmatprep.subr.bf16.mxu0 (!%p3999_p4), %v4622_v11 }
0x1155   : > { %3531 = vmatpush1.bf16.msra.mxu0 (!%p3999_p4), %v4624_v12 }
0x11c8   : > { %v3364_v32 = vpop.xlane.xlu0 %3363 }
0x11c9   : > { %v3367_v34 = vmul.f32 0.0078125, %v3364_v32 }
0x11ca   : > { %v3366_v36 = vpop.xlane.xlu1 %3365 }
0x11cb   : > { %v3369_v26 = vsub.f32 %v3359_v61, %v3367_v34  ;;  %v3368_v37 = vmul.f32 0.0078125, %v3366_v36 }
0x11cd   : > { %v3370_v38 = vsub.f32 %v3360_v31, %v3368_v37  ;;  %v3371_v40 = vmul.f32 %v3369_v26, %v3369_v26 }
0x11cf   : > { %3373 = vadd.xlane.f32.xlu0 %v3371_v40  ;;  %v3372_v42 = vmul.f32 %v3370_v38, %v3370_v38 }
0x11d1   : > { %3375 = vadd.xlane.f32.xlu1 %v3372_v42 }
0x125c   : > { %v3374_v5 = vpop.xlane.xlu0 %3373 }
0x125d   : > { %v3377_v44 = vmul.f32 0.0078125, %v3374_v5 }
0x125e   : > { %v3376_v46 = vpop.xlane.xlu1 %3375 }
0x125f   : > { %v3379_v23 = vadd.f32 1e-05, %v3377_v44  ;;  %v3378_v24 = vmul.f32 0.0078125, %v3376_v46 }
0x1261   : > { %4597 = vrsqrt.f32 %v3379_v23  ;;  %v3380_v47 = vadd.f32 1e-05, %v3378_v24 }
0x1263   : > { %4599 = vrsqrt.f32 %v3380_v47 }
0x126b   : > { %v4598_v48 = vpop.eup %4597 }
0x126c   : > { %v3383_v50 = vmul.f32 %v4598_v48, %v3369_v26 }
0x126d   : > { %v4600_v52 = vpop.eup %4599 }
0x126e   : > { %v3391_v41 = vmul.f32 %v3997_v49, %v3383_v50  ;;  %v3384_v53 = vmul.f32 %v4600_v52, %v3370_v38  ;;  %3406 = sbr.rel (%p3999_p4) target bundleno = 4944 (0x1350), region = 140 }
0x1270   : > { %v3399_v59 = vadd.f32 %v3998_v39, %v3391_v41  ;;  %v3392_v63 = vmul.f32 %v3997_v49, %v3384_v53 }
0x1272   : > { %3401 = vst [vmem:[#allocation2] sm:$0xff] %v3399_v59  ;;  %v3400_v1 = vadd.f32 %v3998_v39, %v3392_v63 }
0x1274   : > { %3402 = vst [vmem:[#allocation2 + $0x8] sm:$0xff] %v3400_v1  ;;  %v3407_v13 = vpack.c.bf16 (!%p3999_p4), %v3400_v1, %v3399_v59 }
0x1276   : > { %3549 = vmatmul.mubr.bf16.vlgmr.msra.gmra.mrb[0].mxu0 %v3407_v13 }
0x1349   : > { %v3550_v17 = vpop.f32.mrb[0].mxu0 }
0x134a   : > { %v3551_v54 = vadd.f32 %v3550_v17, %v3429_v15  ;;  %v3552_v55 = vpop.f32.mrb[1].mxu0 }
0x134b   : > { %v3553_v57 = vadd.f32 %v3552_v55, %v3433_v16  ;;  %v3554_v18 = vpop.f32.mrb[2].mxu0 }
0x134c   : > { %3559 = vst [vmem:[#allocation11] sm:$0xff] %v3551_v54  ;;  %v3555_v19 = vadd.f32 %v3554_v18, %v3429_v15  ;;  %v3556_v20 = vpop.f32.mrb[3].mxu0 }
0x134d   : > { %3560 = vst [vmem:[#allocation11 + $0x8] sm:$0xff] %v3553_v57  ;;  %v3557_v21 = vadd.f32 %v3556_v20, %v3433_v16 }
0x134e   : > { %3561 = vst [vmem:[#allocation11 + $0x10] sm:$0xff] %v3555_v19 }
0x134f   : > { %3562 = vst [vmem:[#allocation11 + $0x18] sm:$0xff] %v3557_v21 }
0x1350 PF: > { %p4325_p5 = scmp.eq.s32.totalorder %s5050_s7, 1  ;;  %s4833_s17 = smov [#allocation11]  }
0x1351   : > { %s3569_s29 = sshll.u32 %s4833_s17, 4  ;;  %s3570_s29 = int_to_ptr.vmem [resolvable:$true] %s3569_s29 }
0x1352   : > { %s4743_s27 = scalar_lea.vmem %s3570_s29, 512  ;;  %p4750_p8 = scmp.lt.s32.totalorder %s3570_s29, %s3570_s29 }
0x1353   : > { %p4744_p12 = scmp.ne.s32.totalorder %s3570_s29, %s4743_s27  ;;  %p4751_p6 = scmp.lt.s32.totalorder %s4743_s27, %s4743_s27 }
0x1355   : > { %p4745_p2 = pnand %p4744_p12, %p4325_p5  ;;  %p4752_p11 = por %p4751_p6, %p4750_p8 }
0x1357   : > { %p4746_p3 = pneg %p4745_p2 }
0x1359   : > { %p4753_p7 = pnand %p4752_p11, %p4746_p3 }
0x135b   : > { %4756 = shalt.err (!%p4753_p7)
}
0x135c   : > { %s5925_s25 = sld [smem:[#allocation45_spill]] }
0x1362   : > { %s4757_s19 = scalar_lea.hbm %s5925_s25, 512 }
0x1363   : > { %p4758_p10 = scmp.ne.s32.totalorder %s5925_s25, %s4757_s19  ;;  %p4763_p13 = scmp.lt.u32.totalorder %s4757_s19, %s5925_s25 }
0x1365   : > { %p4759_p1 = pnand %p4758_p10, %p4325_p5 }
0x1367   : > { %p4760_p9 = pneg %p4759_p1 }
0x1369   : > { %p4765_p0 = pnand %p4763_p13, %p4760_p9 }
0x136b   : > { %4768 = shalt.err (!%p4765_p0)
}
0x136c   : > { %s4834_s8 = smov 256   ;;  %s4835_s21 = smov 16  }
0x136d   : > { %4305 = dma.vmem_to_hbm [thread:$0]  (%p4325_p5), %s3570_s29, 512, %s5925_s25, [#allocation5], %s4834_s8, %s4834_s8, %s4835_s21  }
0x136e   : > { %4798 = dma.done.wait (%p4325_p5), [#allocation5], 512  }
0x136f   : > { %4800 = vsyncadd (%p4325_p5), [#allocation5], 4294966784 }
0x1370 PF: > { %s5926_s28 = sld [smem:[#allocation18_spill]]  ;;  %s5927_s5 = sld [smem:[#allocation16_spill]] }
0x1371   : > { %s5928_s26 = sld [smem:[#allocation17_spill]]  ;;  %s5929_s27 = sld [smem:[#allocation19_spill]] }
0x1376   : > { %p39_p4 = scmp.ge.s32.totalorder %s5926_s28, 4  }
0x1378   :  { %41 = sbr.rel (!%p39_p4) target bundleno = 32 (0x20), region = 240 }
0x137f   :  { %3585 = vsyncpa [#allocation4], 1 }
0x1380   :  { %3587 = vsyncpa [#allocation4 + $0x1], 1 }
0x1381   :  { %3588 = vsyncpa [#allocation7], 1 }
0x1382   :  { %3590 = vsyncpa [#allocation7 + $0x1], 1 }
0x1383   :  { %3591 = vsyncpa [#allocation10], 1 }
0x1384   :  { %3592 = vsyncpa [#allocation5], 1 }
0x1385   :  { %3594 = vsyncpa [#allocation5 + $0x1], 1 }

</bundles_post_ra>
